<compile_context>
chip_gen: v5e
topology: v5e:2x2
jax: 0.10.0
libtpu: 0.0.40
codegen_flags: <defaults>
</compile_context>

<pallas_src>
import functools

import jax
import jax.numpy as jnp
from jax import lax
from jax.experimental import pallas as pl
from jax.experimental.pallas import tpu as pltpu

EPS = 1e-5          # nn.BatchNorm2d default eps
NEG_SLOPE = 0.01    # nn.LeakyReLU default negative_slope
LANE = 128


def _conv_tile(x_ref, w_ref, ho, wo, stride):
    """3x3 conv of one padded image: 9 shifted-window MXU dots, f32 accumulation.

    x_ref: (1, Hp, Wp, Cin) bf16 block (spatial padding of 1 already applied)
    w_ref: (9, Cin, Coutp) bf16, tap-major order (kh*3 + kw)
    returns: (ho*wo, Coutp) f32
    """
    cin = x_ref.shape[-1]
    x = x_ref[0]                                            # (Hp, Wp, Cin)
    acc = None
    for kh in range(3):
        for kw in range(3):
            win = x[kh:kh + (ho - 1) * stride + 1:stride,
                    kw:kw + (wo - 1) * stride + 1:stride, :]        # (ho, wo, Cin)
            part = jnp.dot(win.reshape(ho * wo, cin), w_ref[kh * 3 + kw],
                           preferred_element_type=jnp.float32)
            acc = part if acc is None else acc + part
    return acc


def _stats_kernel(x_ref, w_ref, s1_ref, s2_ref, *, ho, wo, stride):
    """Pass 1: accumulate global per-channel sum and sum-of-squares of the conv."""
    @pl.when(pl.program_id(0) == 0)
    def _():
        s1_ref[...] = jnp.zeros_like(s1_ref)
        s2_ref[...] = jnp.zeros_like(s2_ref)

    y = _conv_tile(x_ref, w_ref, ho, wo, stride)            # (ho*wo, Coutp) f32
    # single traversal of the tile: sum and sum-of-squares together
    s1_ref[...] += jnp.sum(y, axis=0, keepdims=True)
    s2_ref[...] += jnp.sum(y * y, axis=0, keepdims=True)


def _norm_kernel(x_ref, w_ref, scale_ref, shift_ref, o_ref, *, ho, wo, stride):
    """Pass 2: recompute conv tile, fused BN scale/shift + LeakyReLU, lane-dense store."""
    y = _conv_tile(x_ref, w_ref, ho, wo, stride)            # (ho*wo, Coutp) f32
    z = y * scale_ref[...] + shift_ref[...]
    o_ref[0] = jnp.where(z > 0, z, NEG_SLOPE * z)


@functools.partial(jax.jit, static_argnames=("stride",))
def conv_bn_relu(x_nchw, weight, bias, gamma, beta, stride=1):
    """x_nchw: (N, Cin, H, W) f32; weight: (Cout, Cin, 3, 3) OIHW. Returns NCHW f32."""
    N, Cin, H, W = x_nchw.shape
    Cout = weight.shape[0]
    Ho = (H + 2 - 3) // stride + 1
    Wo = (W + 2 - 3) // stride + 1
    Hp, Wp = H + 2, W + 2
    Coutp = ((Cout + LANE - 1) // LANE) * LANE

    # Conv2d bias is dropped on purpose: it cancels exactly under BN mean subtraction.
    del bias

    # ---- glue (plain JAX): NCHW -> NHWC, pad spatial by 1, bf16 MXU operands ----
    xp = jnp.pad(jnp.transpose(x_nchw, (0, 2, 3, 1)).astype(jnp.bfloat16),
                 ((0, 0), (1, 1), (1, 1), (0, 0)))
    # weight (Cout, Cin, kh, kw) -> (kh*3+kw, Cin, Coutp), zero-padded output channels
    w = jnp.transpose(weight, (2, 3, 1, 0)).reshape(9, Cin, Cout)
    w = jnp.pad(w, ((0, 0), (0, 0), (0, Coutp - Cout))).astype(jnp.bfloat16)

    x_spec = pl.BlockSpec((1, Hp, Wp, Cin), lambda n: (n, 0, 0, 0))
    w_spec = pl.BlockSpec((9, Cin, Coutp), lambda n: (0, 0, 0))
    ch_spec = pl.BlockSpec((1, Coutp), lambda n: (0, 0))

    # ---- pass 1: global per-channel sum / sum-of-squares (resident accumulators) ----
    s1, s2 = pl.pallas_call(
        functools.partial(_stats_kernel, ho=Ho, wo=Wo, stride=stride),
        out_shape=(jax.ShapeDtypeStruct((1, Coutp), jnp.float32),
                   jax.ShapeDtypeStruct((1, Coutp), jnp.float32)),
        grid=(N,),
        in_specs=[x_spec, w_spec],
        out_specs=(ch_spec, ch_spec),
        compiler_params=pltpu.CompilerParams(
            dimension_semantics=("arbitrary",)),
    )(xp, w)

    # ---- tiny (1, Coutp) BN algebra: fold mean/var/gamma/beta into scale & shift ----
    count = float(N * Ho * Wo)
    mean = s1 / count
    var = jnp.maximum(s2 / count - mean * mean, 0.0)   # biased var = BN training mode
    gamma_p = jnp.pad(gamma.astype(jnp.float32), (0, Coutp - Cout)).reshape(1, Coutp)
    beta_p = jnp.pad(beta.astype(jnp.float32), (0, Coutp - Cout)).reshape(1, Coutp)
    scale = gamma_p * lax.rsqrt(var + EPS)
    shift = beta_p - mean * scale

    # ---- pass 2: conv + normalize + LeakyReLU ("parallel" -> both TCs on v7x) ----
    out3 = pl.pallas_call(
        functools.partial(_norm_kernel, ho=Ho, wo=Wo, stride=stride),
        out_shape=jax.ShapeDtypeStruct((N, Ho * Wo, Coutp), jnp.float32),
        grid=(N,),
        in_specs=[x_spec, w_spec, ch_spec, ch_spec],
        out_specs=pl.BlockSpec((1, Ho * Wo, Coutp), lambda n: (n, 0, 0)),
        compiler_params=pltpu.CompilerParams(
            dimension_semantics=("parallel",)),
    )(xp, w, scale, shift)

    # lane-dense (Coutp) output -> slice real channels, back to NCHW
    out = out3.reshape(N, Ho, Wo, Coutp)[..., :Cout]
    return jnp.transpose(out, (0, 3, 1, 2))


def _reference(x, weight, bias, gamma, beta, stride=1):
    # Mirrors the kernel's MXU precision: bf16 conv operands, f32 accumulation.
    conv = lax.conv_general_dilated(
        x.astype(jnp.bfloat16), weight.astype(jnp.bfloat16),
        window_strides=(stride, stride), padding=((1, 1), (1, 1)),
        dimension_numbers=("NCHW", "OIHW", "NCHW"),
        preferred_element_type=jnp.float32)
    conv = conv + bias.reshape(1, -1, 1, 1)   # cancels under BN; kept for fidelity
    mean = conv.mean(axis=(0, 2, 3), keepdims=True)
    var = conv.var(axis=(0, 2, 3), keepdims=True)   # biased, training-mode BN
    bn = (conv - mean) / jnp.sqrt(var + EPS)
    bn = bn * gamma.reshape(1, -1, 1, 1) + beta.reshape(1, -1, 1, 1)
    return jnp.where(bn > 0, bn, NEG_SLOPE * bn)


if __name__ == "__main__":
    # small shapes: batch=2, nin=4, nout=8, spatial=16, stride=1
    N, Cin, Cout, H, W, stride = 2, 4, 8, 16, 16, 1

    key = jax.random.PRNGKey(0)
    kx, kw, kb, kg, kbt = jax.random.split(key, 5)
    x = jax.random.normal(kx, (N, Cin, H, W), dtype=jnp.float32)
    weight = 0.1 * jax.random.normal(kw, (Cout, Cin, 3, 3), dtype=jnp.float32)
    bias = 0.1 * jax.random.normal(kb, (Cout,), dtype=jnp.float32)
    gamma = 1.0 + 0.1 * jax.random.normal(kg, (Cout,), dtype=jnp.float32)
    beta = 0.1 * jax.random.normal(kbt, (Cout,), dtype=jnp.float32)

    out = conv_bn_relu(x, weight, bias, gamma, beta, stride=stride)
    out = jax.block_until_ready(out)

    ref = _reference(x, weight, bias, gamma, beta, stride=stride)
    assert out.shape == (N, Cout, H, W), out.shape
    max_err = float(jnp.max(jnp.abs(out - ref)))
    assert jnp.allclose(out, ref, atol=2e-4, rtol=2e-4), max_err

    print("KERNEL_OK")
</pallas_src>

<mosaic_0001>
module attributes {stable_mosaic.version = 11 : i64} {
  func.func @_stats_kernel(%arg0: i32, %arg1: memref<1x18x18x4xbf16, #tpu.memory_space<vmem>>, %arg2: memref<9x4x128xbf16, #tpu.memory_space<vmem>>, %arg3: memref<1x128xf32, #tpu.memory_space<vmem>>, %arg4: memref<1x128xf32, #tpu.memory_space<vmem>>) attributes {dimension_semantics = [#tpu.dimension_semantics<arbitrary>], iteration_bounds = array<i64: 2>, scalar_prefetch = 0 : i64, scratch_operands = 0 : i64, tpu.core_type = #tpu.core_type<tc>, window_params = [{transform_indices = @transform_0, window_bounds = array<i64: 1, 18, 18, 4>}, {pipeline_mode = #tpu.pipeline_mode<synchronous>, transform_indices = @transform_1, window_bounds = array<i64: 9, 4, 128>}, {pipeline_mode = #tpu.pipeline_mode<synchronous>, transform_indices = @transform_2, window_bounds = array<i64: 1, 128>}, {pipeline_mode = #tpu.pipeline_mode<synchronous>, transform_indices = @transform_3, window_bounds = array<i64: 1, 128>}]} {
    %c0_i32 = arith.constant 0 : i32
    %0 = arith.cmpi eq, %arg0, %c0_i32 : i32
    %1 = arith.extui %0 : i1 to i32
    %c0_i32_0 = arith.constant 0 : i32
    %2 = arith.cmpi ne, %1, %c0_i32_0 : i32
    scf.if %2 {
      %cst_41 = arith.constant 0.000000e+00 : f32
      %69 = vector.broadcast %cst_41 : f32 to vector<1x128xf32>
      %c0_42 = arith.constant 0 : index
      %c0_43 = arith.constant 0 : index
      %70 = vector.load %arg3[%c0_42, %c0_43] : memref<1x128xf32, #tpu.memory_space<vmem>>, vector<1x128xf32>
      tpu.vector_store %arg3[%c0_42, %c0_43], %69 {strides = array<i32>} : memref<1x128xf32, #tpu.memory_space<vmem>>, vector<1x128xf32>,
      %cst_44 = arith.constant 0.000000e+00 : f32
      %71 = vector.broadcast %cst_44 : f32 to vector<1x128xf32>
      %c0_45 = arith.constant 0 : index
      %c0_46 = arith.constant 0 : index
      %72 = vector.load %arg4[%c0_45, %c0_46] : memref<1x128xf32, #tpu.memory_space<vmem>>, vector<1x128xf32>
      tpu.vector_store %arg4[%c0_45, %c0_46], %71 {strides = array<i32>} : memref<1x128xf32, #tpu.memory_space<vmem>>, vector<1x128xf32>,
    } else {
    }
    %c0 = arith.constant 0 : index
    %c0_1 = arith.constant 0 : index
    %c0_2 = arith.constant 0 : index
    %c0_3 = arith.constant 0 : index
    %3 = vector.load %arg1[%c0, %c0_1, %c0_2, %c0_3] : memref<1x18x18x4xbf16, #tpu.memory_space<vmem>>, vector<1x18x18x4xbf16>
    %4 = vector.shape_cast %3 : vector<1x18x18x4xbf16> to vector<18x18x4xbf16>
    %5 = vector.extract_strided_slice %4 {offsets = [0, 0, 0], sizes = [16, 16, 4], strides = [1, 1, 1]} : vector<18x18x4xbf16> to vector<16x16x4xbf16>
    %6 = vector.shape_cast %5 : vector<16x16x4xbf16> to vector<256x4xbf16>
    %c0_4 = arith.constant 0 : index
    %c0_5 = arith.constant 0 : index
    %c0_6 = arith.constant 0 : index
    %7 = vector.load %arg2[%c0_4, %c0_5, %c0_6] : memref<9x4x128xbf16, #tpu.memory_space<vmem>>, vector<1x4x128xbf16>
    %8 = vector.shape_cast %7 : vector<1x4x128xbf16> to vector<4x128xbf16>
    %cst = arith.constant dense<0.000000e+00> : vector<256x128xf32>
    %9 = tpu.matmul %6, %8, %cst {dimension_numbers = #tpu.dot_dimension_numbers<[1], [0], [0], [1], [0, 0, 1, 1], [], []>} : vector<256x4xbf16>, vector<4x128xbf16>, vector<256x128xf32> -> vector<256x128xf32>
    %10 = vector.extract_strided_slice %4 {offsets = [0, 1, 0], sizes = [16, 16, 4], strides = [1, 1, 1]} : vector<18x18x4xbf16> to vector<16x16x4xbf16>
    %11 = vector.shape_cast %10 : vector<16x16x4xbf16> to vector<256x4xbf16>
    %c1 = arith.constant 1 : index
    %c0_7 = arith.constant 0 : index
    %c0_8 = arith.constant 0 : index
    %12 = vector.load %arg2[%c1, %c0_7, %c0_8] : memref<9x4x128xbf16, #tpu.memory_space<vmem>>, vector<1x4x128xbf16>
    %13 = vector.shape_cast %12 : vector<1x4x128xbf16> to vector<4x128xbf16>
    %cst_9 = arith.constant dense<0.000000e+00> : vector<256x128xf32>
    %14 = tpu.matmul %11, %13, %cst_9 {dimension_numbers = #tpu.dot_dimension_numbers<[1], [0], [0], [1], [0, 0, 1, 1], [], []>} : vector<256x4xbf16>, vector<4x128xbf16>, vector<256x128xf32> -> vector<256x128xf32>
    %15 = arith.addf %9, %14 : vector<256x128xf32>
    %16 = vector.extract_strided_slice %4 {offsets = [0, 2, 0], sizes = [16, 16, 4], strides = [1, 1, 1]} : vector<18x18x4xbf16> to vector<16x16x4xbf16>
    %17 = vector.shape_cast %16 : vector<16x16x4xbf16> to vector<256x4xbf16>
    %c2 = arith.constant 2 : index
    %c0_10 = arith.constant 0 : index
    %c0_11 = arith.constant 0 : index
    %18 = vector.load %arg2[%c2, %c0_10, %c0_11] : memref<9x4x128xbf16, #tpu.memory_space<vmem>>, vector<1x4x128xbf16>
    %19 = vector.shape_cast %18 : vector<1x4x128xbf16> to vector<4x128xbf16>
    %cst_12 = arith.constant dense<0.000000e+00> : vector<256x128xf32>
    %20 = tpu.matmul %17, %19, %cst_12 {dimension_numbers = #tpu.dot_dimension_numbers<[1], [0], [0], [1], [0, 0, 1, 1], [], []>} : vector<256x4xbf16>, vector<4x128xbf16>, vector<256x128xf32> -> vector<256x128xf32>
    %21 = arith.addf %15, %20 : vector<256x128xf32>
    %22 = vector.extract_strided_slice %4 {offsets = [1, 0, 0], sizes = [16, 16, 4], strides = [1, 1, 1]} : vector<18x18x4xbf16> to vector<16x16x4xbf16>
    %23 = vector.shape_cast %22 : vector<16x16x4xbf16> to vector<256x4xbf16>
    %c3 = arith.constant 3 : index
    %c0_13 = arith.constant 0 : index
    %c0_14 = arith.constant 0 : index
    %24 = vector.load %arg2[%c3, %c0_13, %c0_14] : memref<9x4x128xbf16, #tpu.memory_space<vmem>>, vector<1x4x128xbf16>
    %25 = vector.shape_cast %24 : vector<1x4x128xbf16> to vector<4x128xbf16>
    %cst_15 = arith.constant dense<0.000000e+00> : vector<256x128xf32>
    %26 = tpu.matmul %23, %25, %cst_15 {dimension_numbers = #tpu.dot_dimension_numbers<[1], [0], [0], [1], [0, 0, 1, 1], [], []>} : vector<256x4xbf16>, vector<4x128xbf16>, vector<256x128xf32> -> vector<256x128xf32>
    %27 = arith.addf %21, %26 : vector<256x128xf32>
    %28 = vector.extract_strided_slice %4 {offsets = [1, 1, 0], sizes = [16, 16, 4], strides = [1, 1, 1]} : vector<18x18x4xbf16> to vector<16x16x4xbf16>
    %29 = vector.shape_cast %28 : vector<16x16x4xbf16> to vector<256x4xbf16>
    %c4 = arith.constant 4 : index
    %c0_16 = arith.constant 0 : index
    %c0_17 = arith.constant 0 : index
    %30 = vector.load %arg2[%c4, %c0_16, %c0_17] : memref<9x4x128xbf16, #tpu.memory_space<vmem>>, vector<1x4x128xbf16>
    %31 = vector.shape_cast %30 : vector<1x4x128xbf16> to vector<4x128xbf16>
    %cst_18 = arith.constant dense<0.000000e+00> : vector<256x128xf32>
    %32 = tpu.matmul %29, %31, %cst_18 {dimension_numbers = #tpu.dot_dimension_numbers<[1], [0], [0], [1], [0, 0, 1, 1], [], []>} : vector<256x4xbf16>, vector<4x128xbf16>, vector<256x128xf32> -> vector<256x128xf32>
    %33 = arith.addf %27, %32 : vector<256x128xf32>
    %34 = vector.extract_strided_slice %4 {offsets = [1, 2, 0], sizes = [16, 16, 4], strides = [1, 1, 1]} : vector<18x18x4xbf16> to vector<16x16x4xbf16>
    %35 = vector.shape_cast %34 : vector<16x16x4xbf16> to vector<256x4xbf16>
    %c5 = arith.constant 5 : index
    %c0_19 = arith.constant 0 : index
    %c0_20 = arith.constant 0 : index
    %36 = vector.load %arg2[%c5, %c0_19, %c0_20] : memref<9x4x128xbf16, #tpu.memory_space<vmem>>, vector<1x4x128xbf16>
    %37 = vector.shape_cast %36 : vector<1x4x128xbf16> to vector<4x128xbf16>
    %cst_21 = arith.constant dense<0.000000e+00> : vector<256x128xf32>
    %38 = tpu.matmul %35, %37, %cst_21 {dimension_numbers = #tpu.dot_dimension_numbers<[1], [0], [0], [1], [0, 0, 1, 1], [], []>} : vector<256x4xbf16>, vector<4x128xbf16>, vector<256x128xf32> -> vector<256x128xf32>
    %39 = arith.addf %33, %38 : vector<256x128xf32>
    %40 = vector.extract_strided_slice %4 {offsets = [2, 0, 0], sizes = [16, 16, 4], strides = [1, 1, 1]} : vector<18x18x4xbf16> to vector<16x16x4xbf16>
    %41 = vector.shape_cast %40 : vector<16x16x4xbf16> to vector<256x4xbf16>
    %c6 = arith.constant 6 : index
    %c0_22 = arith.constant 0 : index
    %c0_23 = arith.constant 0 : index
    %42 = vector.load %arg2[%c6, %c0_22, %c0_23] : memref<9x4x128xbf16, #tpu.memory_space<vmem>>, vector<1x4x128xbf16>
    %43 = vector.shape_cast %42 : vector<1x4x128xbf16> to vector<4x128xbf16>
    %cst_24 = arith.constant dense<0.000000e+00> : vector<256x128xf32>
    %44 = tpu.matmul %41, %43, %cst_24 {dimension_numbers = #tpu.dot_dimension_numbers<[1], [0], [0], [1], [0, 0, 1, 1], [], []>} : vector<256x4xbf16>, vector<4x128xbf16>, vector<256x128xf32> -> vector<256x128xf32>
    %45 = arith.addf %39, %44 : vector<256x128xf32>
    %46 = vector.extract_strided_slice %4 {offsets = [2, 1, 0], sizes = [16, 16, 4], strides = [1, 1, 1]} : vector<18x18x4xbf16> to vector<16x16x4xbf16>
    %47 = vector.shape_cast %46 : vector<16x16x4xbf16> to vector<256x4xbf16>
    %c7 = arith.constant 7 : index
    %c0_25 = arith.constant 0 : index
    %c0_26 = arith.constant 0 : index
    %48 = vector.load %arg2[%c7, %c0_25, %c0_26] : memref<9x4x128xbf16, #tpu.memory_space<vmem>>, vector<1x4x128xbf16>
    %49 = vector.shape_cast %48 : vector<1x4x128xbf16> to vector<4x128xbf16>
    %cst_27 = arith.constant dense<0.000000e+00> : vector<256x128xf32>
    %50 = tpu.matmul %47, %49, %cst_27 {dimension_numbers = #tpu.dot_dimension_numbers<[1], [0], [0], [1], [0, 0, 1, 1], [], []>} : vector<256x4xbf16>, vector<4x128xbf16>, vector<256x128xf32> -> vector<256x128xf32>
    %51 = arith.addf %45, %50 : vector<256x128xf32>
    %52 = vector.extract_strided_slice %4 {offsets = [2, 2, 0], sizes = [16, 16, 4], strides = [1, 1, 1]} : vector<18x18x4xbf16> to vector<16x16x4xbf16>
    %53 = vector.shape_cast %52 : vector<16x16x4xbf16> to vector<256x4xbf16>
    %c8 = arith.constant 8 : index
    %c0_28 = arith.constant 0 : index
    %c0_29 = arith.constant 0 : index
    %54 = vector.load %arg2[%c8, %c0_28, %c0_29] : memref<9x4x128xbf16, #tpu.memory_space<vmem>>, vector<1x4x128xbf16>
    %55 = vector.shape_cast %54 : vector<1x4x128xbf16> to vector<4x128xbf16>
    %cst_30 = arith.constant dense<0.000000e+00> : vector<256x128xf32>
    %56 = tpu.matmul %53, %55, %cst_30 {dimension_numbers = #tpu.dot_dimension_numbers<[1], [0], [0], [1], [0, 0, 1, 1], [], []>} : vector<256x4xbf16>, vector<4x128xbf16>, vector<256x128xf32> -> vector<256x128xf32>
    %57 = arith.addf %51, %56 : vector<256x128xf32>
    %c0_31 = arith.constant 0 : index
    %c0_32 = arith.constant 0 : index
    %58 = vector.load %arg3[%c0_31, %c0_32] : memref<1x128xf32, #tpu.memory_space<vmem>>, vector<1x128xf32>
    %cst_33 = arith.constant dense<0.000000e+00> : vector<128xf32>
    %59 = vector.multi_reduction <add>, %57, %cst_33 [0] : vector<256x128xf32> to vector<128xf32>
    %60 = vector.shape_cast %59 : vector<128xf32> to vector<1x128xf32>
    %61 = arith.addf %58, %60 : vector<1x128xf32>
    %c0_34 = arith.constant 0 : index
    %c0_35 = arith.constant 0 : index
    %62 = vector.load %arg3[%c0_34, %c0_35] : memref<1x128xf32, #tpu.memory_space<vmem>>, vector<1x128xf32>
    tpu.vector_store %arg3[%c0_34, %c0_35], %61 {strides = array<i32>} : memref<1x128xf32, #tpu.memory_space<vmem>>, vector<1x128xf32>,
    %c0_36 = arith.constant 0 : index
    %c0_37 = arith.constant 0 : index
    %63 = vector.load %arg4[%c0_36, %c0_37] : memref<1x128xf32, #tpu.memory_space<vmem>>, vector<1x128xf32>
    %64 = arith.mulf %57, %57 : vector<256x128xf32>
    %cst_38 = arith.constant dense<0.000000e+00> : vector<128xf32>
    %65 = vector.multi_reduction <add>, %64, %cst_38 [0] : vector<256x128xf32> to vector<128xf32>
    %66 = vector.shape_cast %65 : vector<128xf32> to vector<1x128xf32>
    %67 = arith.addf %63, %66 : vector<1x128xf32>
    %c0_39 = arith.constant 0 : index
    %c0_40 = arith.constant 0 : index
    %68 = vector.load %arg4[%c0_39, %c0_40] : memref<1x128xf32, #tpu.memory_space<vmem>>, vector<1x128xf32>
    tpu.vector_store %arg4[%c0_39, %c0_40], %67 {strides = array<i32>} : memref<1x128xf32, #tpu.memory_space<vmem>>, vector<1x128xf32>,
    return
  }
  func.func @transform_0(%arg0: i32) -> (i32, i32, i32, i32) {
    %c0_i32 = arith.constant 0 : i32
    %c0_i32_0 = arith.constant 0 : i32
    %c0_i32_1 = arith.constant 0 : i32
    %c0_i32_2 = arith.constant 0 : i32
    return %arg0, %c0_i32, %c0_i32_0, %c0_i32_1 : i32, i32, i32, i32
  }
  func.func @transform_1(%arg0: i32) -> (i32, i32, i32) {
    %c0_i32 = arith.constant 0 : i32
    %c0_i32_0 = arith.constant 0 : i32
    %c0_i32_1 = arith.constant 0 : i32
    %c0_i32_2 = arith.constant 0 : i32
    return %c0_i32, %c0_i32_0, %c0_i32_1 : i32, i32, i32
  }
  func.func @transform_2(%arg0: i32) -> (i32, i32) {
    %c0_i32 = arith.constant 0 : i32
    %c0_i32_0 = arith.constant 0 : i32
    %c0_i32_1 = arith.constant 0 : i32
    return %c0_i32, %c0_i32_0 : i32, i32
  }
  func.func @transform_3(%arg0: i32) -> (i32, i32) {
    %c0_i32 = arith.constant 0 : i32
    %c0_i32_0 = arith.constant 0 : i32
    %c0_i32_1 = arith.constant 0 : i32
    return %c0_i32, %c0_i32_0 : i32, i32
  }
}

module attributes {stable_mosaic.version = 11 : i64} {
  func.func @_norm_kernel(%arg0: i32, %arg1: memref<1x18x18x4xbf16, #tpu.memory_space<vmem>>, %arg2: memref<9x4x128xbf16, #tpu.memory_space<vmem>>, %arg3: memref<1x128xf32, #tpu.memory_space<vmem>>, %arg4: memref<1x128xf32, #tpu.memory_space<vmem>>, %arg5: memref<1x256x128xf32, #tpu.memory_space<vmem>>) attributes {dimension_semantics = [#tpu.dimension_semantics<parallel>], iteration_bounds = array<i64: 2>, scalar_prefetch = 0 : i64, scratch_operands = 0 : i64, tpu.core_type = #tpu.core_type<tc>, window_params = [{transform_indices = @transform_0, window_bounds = array<i64: 1, 18, 18, 4>}, {pipeline_mode = #tpu.pipeline_mode<synchronous>, transform_indices = @transform_1, window_bounds = array<i64: 9, 4, 128>}, {pipeline_mode = #tpu.pipeline_mode<synchronous>, transform_indices = @transform_2, window_bounds = array<i64: 1, 128>}, {pipeline_mode = #tpu.pipeline_mode<synchronous>, transform_indices = @transform_3, window_bounds = array<i64: 1, 128>}, {transform_indices = @transform_4, window_bounds = array<i64: 1, 256, 128>}]} {
    %c0 = arith.constant 0 : index
    %c0_0 = arith.constant 0 : index
    %c0_1 = arith.constant 0 : index
    %c0_2 = arith.constant 0 : index
    %0 = vector.load %arg1[%c0, %c0_0, %c0_1, %c0_2] : memref<1x18x18x4xbf16, #tpu.memory_space<vmem>>, vector<1x18x18x4xbf16>
    %1 = vector.shape_cast %0 : vector<1x18x18x4xbf16> to vector<18x18x4xbf16>
    %2 = vector.extract_strided_slice %1 {offsets = [0, 0, 0], sizes = [16, 16, 4], strides = [1, 1, 1]} : vector<18x18x4xbf16> to vector<16x16x4xbf16>
    %3 = vector.shape_cast %2 : vector<16x16x4xbf16> to vector<256x4xbf16>
    %c0_3 = arith.constant 0 : index
    %c0_4 = arith.constant 0 : index
    %c0_5 = arith.constant 0 : index
    %4 = vector.load %arg2[%c0_3, %c0_4, %c0_5] : memref<9x4x128xbf16, #tpu.memory_space<vmem>>, vector<1x4x128xbf16>
    %5 = vector.shape_cast %4 : vector<1x4x128xbf16> to vector<4x128xbf16>
    %cst = arith.constant dense<0.000000e+00> : vector<256x128xf32>
    %6 = tpu.matmul %3, %5, %cst {dimension_numbers = #tpu.dot_dimension_numbers<[1], [0], [0], [1], [0, 0, 1, 1], [], []>} : vector<256x4xbf16>, vector<4x128xbf16>, vector<256x128xf32> -> vector<256x128xf32>
    %7 = vector.extract_strided_slice %1 {offsets = [0, 1, 0], sizes = [16, 16, 4], strides = [1, 1, 1]} : vector<18x18x4xbf16> to vector<16x16x4xbf16>
    %8 = vector.shape_cast %7 : vector<16x16x4xbf16> to vector<256x4xbf16>
    %c1 = arith.constant 1 : index
    %c0_6 = arith.constant 0 : index
    %c0_7 = arith.constant 0 : index
    %9 = vector.load %arg2[%c1, %c0_6, %c0_7] : memref<9x4x128xbf16, #tpu.memory_space<vmem>>, vector<1x4x128xbf16>
    %10 = vector.shape_cast %9 : vector<1x4x128xbf16> to vector<4x128xbf16>
    %cst_8 = arith.constant dense<0.000000e+00> : vector<256x128xf32>
    %11 = tpu.matmul %8, %10, %cst_8 {dimension_numbers = #tpu.dot_dimension_numbers<[1], [0], [0], [1], [0, 0, 1, 1], [], []>} : vector<256x4xbf16>, vector<4x128xbf16>, vector<256x128xf32> -> vector<256x128xf32>
    %12 = arith.addf %6, %11 : vector<256x128xf32>
    %13 = vector.extract_strided_slice %1 {offsets = [0, 2, 0], sizes = [16, 16, 4], strides = [1, 1, 1]} : vector<18x18x4xbf16> to vector<16x16x4xbf16>
    %14 = vector.shape_cast %13 : vector<16x16x4xbf16> to vector<256x4xbf16>
    %c2 = arith.constant 2 : index
    %c0_9 = arith.constant 0 : index
    %c0_10 = arith.constant 0 : index
    %15 = vector.load %arg2[%c2, %c0_9, %c0_10] : memref<9x4x128xbf16, #tpu.memory_space<vmem>>, vector<1x4x128xbf16>
    %16 = vector.shape_cast %15 : vector<1x4x128xbf16> to vector<4x128xbf16>
    %cst_11 = arith.constant dense<0.000000e+00> : vector<256x128xf32>
    %17 = tpu.matmul %14, %16, %cst_11 {dimension_numbers = #tpu.dot_dimension_numbers<[1], [0], [0], [1], [0, 0, 1, 1], [], []>} : vector<256x4xbf16>, vector<4x128xbf16>, vector<256x128xf32> -> vector<256x128xf32>
    %18 = arith.addf %12, %17 : vector<256x128xf32>
    %19 = vector.extract_strided_slice %1 {offsets = [1, 0, 0], sizes = [16, 16, 4], strides = [1, 1, 1]} : vector<18x18x4xbf16> to vector<16x16x4xbf16>
    %20 = vector.shape_cast %19 : vector<16x16x4xbf16> to vector<256x4xbf16>
    %c3 = arith.constant 3 : index
    %c0_12 = arith.constant 0 : index
    %c0_13 = arith.constant 0 : index
    %21 = vector.load %arg2[%c3, %c0_12, %c0_13] : memref<9x4x128xbf16, #tpu.memory_space<vmem>>, vector<1x4x128xbf16>
    %22 = vector.shape_cast %21 : vector<1x4x128xbf16> to vector<4x128xbf16>
    %cst_14 = arith.constant dense<0.000000e+00> : vector<256x128xf32>
    %23 = tpu.matmul %20, %22, %cst_14 {dimension_numbers = #tpu.dot_dimension_numbers<[1], [0], [0], [1], [0, 0, 1, 1], [], []>} : vector<256x4xbf16>, vector<4x128xbf16>, vector<256x128xf32> -> vector<256x128xf32>
    %24 = arith.addf %18, %23 : vector<256x128xf32>
    %25 = vector.extract_strided_slice %1 {offsets = [1, 1, 0], sizes = [16, 16, 4], strides = [1, 1, 1]} : vector<18x18x4xbf16> to vector<16x16x4xbf16>
    %26 = vector.shape_cast %25 : vector<16x16x4xbf16> to vector<256x4xbf16>
    %c4 = arith.constant 4 : index
    %c0_15 = arith.constant 0 : index
    %c0_16 = arith.constant 0 : index
    %27 = vector.load %arg2[%c4, %c0_15, %c0_16] : memref<9x4x128xbf16, #tpu.memory_space<vmem>>, vector<1x4x128xbf16>
    %28 = vector.shape_cast %27 : vector<1x4x128xbf16> to vector<4x128xbf16>
    %cst_17 = arith.constant dense<0.000000e+00> : vector<256x128xf32>
    %29 = tpu.matmul %26, %28, %cst_17 {dimension_numbers = #tpu.dot_dimension_numbers<[1], [0], [0], [1], [0, 0, 1, 1], [], []>} : vector<256x4xbf16>, vector<4x128xbf16>, vector<256x128xf32> -> vector<256x128xf32>
    %30 = arith.addf %24, %29 : vector<256x128xf32>
    %31 = vector.extract_strided_slice %1 {offsets = [1, 2, 0], sizes = [16, 16, 4], strides = [1, 1, 1]} : vector<18x18x4xbf16> to vector<16x16x4xbf16>
    %32 = vector.shape_cast %31 : vector<16x16x4xbf16> to vector<256x4xbf16>
    %c5 = arith.constant 5 : index
    %c0_18 = arith.constant 0 : index
    %c0_19 = arith.constant 0 : index
    %33 = vector.load %arg2[%c5, %c0_18, %c0_19] : memref<9x4x128xbf16, #tpu.memory_space<vmem>>, vector<1x4x128xbf16>
    %34 = vector.shape_cast %33 : vector<1x4x128xbf16> to vector<4x128xbf16>
    %cst_20 = arith.constant dense<0.000000e+00> : vector<256x128xf32>
    %35 = tpu.matmul %32, %34, %cst_20 {dimension_numbers = #tpu.dot_dimension_numbers<[1], [0], [0], [1], [0, 0, 1, 1], [], []>} : vector<256x4xbf16>, vector<4x128xbf16>, vector<256x128xf32> -> vector<256x128xf32>
    %36 = arith.addf %30, %35 : vector<256x128xf32>
    %37 = vector.extract_strided_slice %1 {offsets = [2, 0, 0], sizes = [16, 16, 4], strides = [1, 1, 1]} : vector<18x18x4xbf16> to vector<16x16x4xbf16>
    %38 = vector.shape_cast %37 : vector<16x16x4xbf16> to vector<256x4xbf16>
    %c6 = arith.constant 6 : index
    %c0_21 = arith.constant 0 : index
    %c0_22 = arith.constant 0 : index
    %39 = vector.load %arg2[%c6, %c0_21, %c0_22] : memref<9x4x128xbf16, #tpu.memory_space<vmem>>, vector<1x4x128xbf16>
    %40 = vector.shape_cast %39 : vector<1x4x128xbf16> to vector<4x128xbf16>
    %cst_23 = arith.constant dense<0.000000e+00> : vector<256x128xf32>
    %41 = tpu.matmul %38, %40, %cst_23 {dimension_numbers = #tpu.dot_dimension_numbers<[1], [0], [0], [1], [0, 0, 1, 1], [], []>} : vector<256x4xbf16>, vector<4x128xbf16>, vector<256x128xf32> -> vector<256x128xf32>
    %42 = arith.addf %36, %41 : vector<256x128xf32>
    %43 = vector.extract_strided_slice %1 {offsets = [2, 1, 0], sizes = [16, 16, 4], strides = [1, 1, 1]} : vector<18x18x4xbf16> to vector<16x16x4xbf16>
    %44 = vector.shape_cast %43 : vector<16x16x4xbf16> to vector<256x4xbf16>
    %c7 = arith.constant 7 : index
    %c0_24 = arith.constant 0 : index
    %c0_25 = arith.constant 0 : index
    %45 = vector.load %arg2[%c7, %c0_24, %c0_25] : memref<9x4x128xbf16, #tpu.memory_space<vmem>>, vector<1x4x128xbf16>
    %46 = vector.shape_cast %45 : vector<1x4x128xbf16> to vector<4x128xbf16>
    %cst_26 = arith.constant dense<0.000000e+00> : vector<256x128xf32>
    %47 = tpu.matmul %44, %46, %cst_26 {dimension_numbers = #tpu.dot_dimension_numbers<[1], [0], [0], [1], [0, 0, 1, 1], [], []>} : vector<256x4xbf16>, vector<4x128xbf16>, vector<256x128xf32> -> vector<256x128xf32>
    %48 = arith.addf %42, %47 : vector<256x128xf32>
    %49 = vector.extract_strided_slice %1 {offsets = [2, 2, 0], sizes = [16, 16, 4], strides = [1, 1, 1]} : vector<18x18x4xbf16> to vector<16x16x4xbf16>
    %50 = vector.shape_cast %49 : vector<16x16x4xbf16> to vector<256x4xbf16>
    %c8 = arith.constant 8 : index
    %c0_27 = arith.constant 0 : index
    %c0_28 = arith.constant 0 : index
    %51 = vector.load %arg2[%c8, %c0_27, %c0_28] : memref<9x4x128xbf16, #tpu.memory_space<vmem>>, vector<1x4x128xbf16>
    %52 = vector.shape_cast %51 : vector<1x4x128xbf16> to vector<4x128xbf16>
    %cst_29 = arith.constant dense<0.000000e+00> : vector<256x128xf32>
    %53 = tpu.matmul %50, %52, %cst_29 {dimension_numbers = #tpu.dot_dimension_numbers<[1], [0], [0], [1], [0, 0, 1, 1], [], []>} : vector<256x4xbf16>, vector<4x128xbf16>, vector<256x128xf32> -> vector<256x128xf32>
    %54 = arith.addf %48, %53 : vector<256x128xf32>
    %c0_30 = arith.constant 0 : index
    %c0_31 = arith.constant 0 : index
    %55 = vector.load %arg3[%c0_30, %c0_31] : memref<1x128xf32, #tpu.memory_space<vmem>>, vector<1x128xf32>
    %56 = vector.broadcast %55 : vector<1x128xf32> to vector<256x128xf32>
    %57 = arith.mulf %54, %56 : vector<256x128xf32>
    %c0_32 = arith.constant 0 : index
    %c0_33 = arith.constant 0 : index
    %58 = vector.load %arg4[%c0_32, %c0_33] : memref<1x128xf32, #tpu.memory_space<vmem>>, vector<1x128xf32>
    %59 = vector.broadcast %58 : vector<1x128xf32> to vector<256x128xf32>
    %60 = arith.addf %57, %59 : vector<256x128xf32>
    %cst_34 = arith.constant 0.000000e+00 : f32
    %61 = vector.broadcast %cst_34 : f32 to vector<256x128xf32>
    %62 = arith.cmpf ogt, %60, %61 : vector<256x128xf32>
    %cst_35 = arith.constant 0.00999999977 : f32
    %63 = vector.broadcast %cst_35 : f32 to vector<256x128xf32>
    %64 = arith.mulf %63, %60 : vector<256x128xf32>
    %65 = arith.select %62, %60, %64 : vector<256x128xi1>, vector<256x128xf32>
    %c0_36 = arith.constant 0 : index
    %c0_37 = arith.constant 0 : index
    %c0_38 = arith.constant 0 : index
    %66 = vector.load %arg5[%c0_36, %c0_37, %c0_38] : memref<1x256x128xf32, #tpu.memory_space<vmem>>, vector<1x256x128xf32>
    %67 = vector.shape_cast %66 : vector<1x256x128xf32> to vector<256x128xf32>
    %68 = vector.shape_cast %65 : vector<256x128xf32> to vector<1x256x128xf32>
    tpu.vector_store %arg5[%c0_36, %c0_37, %c0_38], %68 {strides = array<i32>} : memref<1x256x128xf32, #tpu.memory_space<vmem>>, vector<1x256x128xf32>,
    return
  }
  func.func @transform_0(%arg0: i32) -> (i32, i32, i32, i32) {
    %c0_i32 = arith.constant 0 : i32
    %c0_i32_0 = arith.constant 0 : i32
    %c0_i32_1 = arith.constant 0 : i32
    %c0_i32_2 = arith.constant 0 : i32
    return %arg0, %c0_i32, %c0_i32_0, %c0_i32_1 : i32, i32, i32, i32
  }
  func.func @transform_1(%arg0: i32) -> (i32, i32, i32) {
    %c0_i32 = arith.constant 0 : i32
    %c0_i32_0 = arith.constant 0 : i32
    %c0_i32_1 = arith.constant 0 : i32
    %c0_i32_2 = arith.constant 0 : i32
    return %c0_i32, %c0_i32_0, %c0_i32_1 : i32, i32, i32
  }
  func.func @transform_2(%arg0: i32) -> (i32, i32) {
    %c0_i32 = arith.constant 0 : i32
    %c0_i32_0 = arith.constant 0 : i32
    %c0_i32_1 = arith.constant 0 : i32
    return %c0_i32, %c0_i32_0 : i32, i32
  }
  func.func @transform_3(%arg0: i32) -> (i32, i32) {
    %c0_i32 = arith.constant 0 : i32
    %c0_i32_0 = arith.constant 0 : i32
    %c0_i32_1 = arith.constant 0 : i32
    return %c0_i32, %c0_i32_0 : i32, i32
  }
  func.func @transform_4(%arg0: i32) -> (i32, i32, i32) {
    %c0_i32 = arith.constant 0 : i32
    %c0_i32_0 = arith.constant 0 : i32
    %c0_i32_1 = arith.constant 0 : i32
    return %arg0, %c0_i32, %c0_i32_0 : i32, i32, i32
  }
}

</mosaic_0001>

<bundles_post_ra>
// kernel: conv_bn_relu.3
= control target key start
LH: loop header
LB: loop body
LE: loop exit
PB: predicated region body
PF: predicated region fallthrough
CT: control target
= control target key end

     0   :  { %s2847_s15 = smov 0   ;;  %s4021_s0 = inlined_call_operand.vmem [shape: bf16[2,18,18,4], index: 0, kind: input, shape index: {}]   ;;  %s4022_s1 = inlined_call_operand.vmem [shape: bf16[9,4,128], index: 1, kind: input, shape index: {}]   ;;  %s4023_s2 = inlined_call_operand.vmem [shape: f32[1,128], index: 2, kind: input, shape index: {}]   ;;  %s4024_s3 = inlined_call_operand.vmem [shape: f32[1,128], index: 3, kind: input, shape index: {}]   ;;  %s4025_s4 = inlined_call_operand.vmem [shape: f32[2,256,128], index: 4, kind: output, shape index: {}]  }
   0x1 LB: > { %s2521_s16 = sadd.s32 4294967295, %s2820_s15   ;;  %p2525_p0 = scmp.ge.s32.totalorder %s2820_s15, 1  ;;  %s2820_s15 = sphi %s2847_s15, %s14_s15  }
   0x2   : > { %p162_p1 = scmp.lt.s32.totalorder %s2820_s15, 3 }
   0x4   : > { %p163_p2 = pnand %p2525_p0, %p162_p1 }
   0x6   : > { %166 = sbr.rel (%p163_p2) target bundleno = 761 (0x2f9), region = 36 }
   0xb   : > { %v2529_v0 = vld [vmem:[%s4022_s1 + $0x2] sm:$0x3]  ;;  %vm740_vm0 = vcmask 1041408   ;;  %p188_p3 = scmp.lt.s32.totalorder %s2521_s16, 1  ;;  %v2642_v2 = vld [vmem:[%s4022_s1 + $0x4] sm:$0x3] }
   0xc   : > { %v742_v1 = vsel %vm740_vm0, %v2529_v0, 0  ;;  %v1283_v3 = vsel %vm740_vm0, %v2642_v2, 0  ;;  %v2659_v4 = vld [vmem:[%s4022_s1 + $0x6] sm:$0x3]  ;;  %v253_v5 = vld [vmem:[%s4022_s1] sm:$0x3] }
   0xd   : > { %2792 = vmatpush.bf16.msra.mxu1 %v742_v1  ;;  %2793 = vmatpush.bf16.msra.mxu2 %v742_v1  ;;  %s4165_s16 = smov (!%p188_p3, %s2521_s16), 1  ;;  %v2680_v6 = vld [vmem:[%s4022_s1 + $0x8] sm:$0x3]  ;;  %v1417_v7 = vsel %vm740_vm0, %v2659_v4, 0  ;;  %v962_v8 = vsel %vm740_vm0, %v253_v5, 0  ;;  %vm691_vm4 = vcmask 31744  }
   0xe   : > { %2794 = vmatpush.bf16.msra.mxu3 %v742_v1  ;;  %751 = vmatpush.bf16.msra.mxu0 %v742_v1  ;;  %s2795_s27 = smul.u32 216, %s4165_s16  ;;  %v1573_v9 = vsel %vm740_vm0, %v2680_v6, 0  ;;  %vm254_vm1 = vsmask.f32 3328  ;;  %vm255_vm2 = vsmask.f32 7440 }
   0xf   : > { %vm2908_vm3 = vmor %vm254_vm1, %vm255_vm2  ;;  %vm1069_vm5 = vcmask 1042432   ;;  %vm1070_vm6 = vcmask 1046532   ;;  %s2773_s19 = sshll.u32 %s4165_s16, 8 }
  0x10   : > { %s2881_s30 = scalar_lea.vmem %s4021_s0, %s2795_s27  ;;  %vm3211_vm7 = vmor %vm1069_vm5, %vm1070_vm6  ;;  %s3816_s22 = scalar_lea.vmem %s4025_s4, %s2773_s19 }
  0x11   : > { %1292 = vmatpush.bf16.msrb.mxu2 %v1283_v3  ;;  %971 = vmatpush.bf16.msrb.mxu1 %v962_v8  ;;  %v2884_v10 = vld [vmem:[%s2881_s30 + $0x30] sm:$0xf]  ;;  %v2887_v11 = vld [vmem:[%s2881_s30 + $0x34] sm:$0xf]  ;;  %v2890_v12 = vld [vmem:[%s2881_s30 + $0x38] sm:$0x1] }
  0x12   : > { %1426 = vmatpush.bf16.msrb.mxu3 %v1417_v7  ;;  %1582 = vmatpush.bf16.msrb.mxu0 %v1573_v9  ;;  %v354_v13 = vshrl.u32 %v2884_v10, 16  ;;  %v357_v14 = vshll.u32 %v2884_v10, 16  ;;  %v363_v15 = vshll.u32 %v2887_v11, 16  ;;  %v367_v16 = vshrl.u32 %v2887_v11, 16  ;;  %v223_v17 = vld [vmem:[%s2881_s30 + $0x60] sm:$0xf] }
  0x13   : > { %v373_v18 = vshll.u32 %v2890_v12, 16  ;;  %v2899_v19 = vld [vmem:[%s2881_s30 + $0x64] sm:$0xf]  ;;  %v225_v20 = vld [vmem:[%s2881_s30 + $0x68] sm:$0x1]  ;;  %v450_v21 = vshrl.u32 %v223_v17, 16 }
  0x14   : > { %v356_v22 = vrot.slane %v354_v13, 4  ;;  %v359_v23 = vrot.slane %v357_v14, 5  ;;  %v365_v24 = vrot.slane %v363_v15, 5  ;;  %v369_v25 = vrot.slane %v367_v16, 4  ;;  %v235_v26 = vld [vmem:[%s2881_s30 + $0x90] sm:$0xf] }
  0x15   : > { %v375_v27 = vrot.slane %v373_v18, 5  ;;  %v452_v28 = vrot.slane %v450_v21, 4  ;;  %v453_v29 = vshll.u32 %v223_v17, 16  ;;  %v459_v30 = vshll.u32 %v2899_v19, 16  ;;  %v236_v35 = vld [vmem:[%s2881_s30 + $0x94] sm:$0xf] }
  0x16   : > { %v360_v31 = vor.u32 %v359_v23, %v356_v22  ;;  %v370_v32 = vor.u32 %v369_v25, %v365_v24  ;;  %v463_v33 = vshrl.u32 %v2899_v19, 16  ;;  %v469_v34 = vshll.u32 %v225_v20, 16  ;;  %v237_v45 = vld [vmem:[%s2881_s30 + $0x98] sm:$0x1]  ;;  %v2918_v61 = vld [vmem:[%s2881_s30] sm:$0xf] }
  0x17   : > { %v455_v37 = vrot.slane %v453_v29, 5  ;;  %v461_v38 = vrot.slane %v459_v30, 5  ;;  %v546_v39 = vshrl.u32 %v235_v26, 16  ;;  %v549_v47 = vshll.u32 %v235_v26, 16  ;;  %v2925_v1 = vld [vmem:[%s2881_s30 + $0x4] sm:$0xf] }
  0x18   : > { %v361_v40 = vrot.slane %v360_v31, 4  ;;  %v371_v41 = vrot.slane %v370_v32, 4  ;;  %v465_v42 = vrot.slane %v463_v33, 4  ;;  %v471_v43 = vrot.slane %v469_v34, 5  ;;  %v2928_v2 = vld [vmem:[%s2881_s30 + $0x8] sm:$0x1] }
  0x19   : > { %v456_v44 = vor.u32 %v455_v37, %v452_v28  ;;  %v548_v46 = vrot.slane %v546_v39, 4  ;;  %v555_v48 = vshll.u32 %v236_v35, 16  ;;  %v559_v52 = vshrl.u32 %v236_v35, 16  ;;  %v2944_v23 = vld [vmem:[%s2881_s30 + $0x3c] sm:$0xf] }
  0x1a   : > { %v366_v49 = vsel %vm2908_vm3, %v361_v40, %v365_v24  ;;  %v376_v50 = vsel %vm2908_vm3, %v371_v41, %v375_v27  ;;  %v466_v51 = vor.u32 %v465_v42, %v461_v38  ;;  %v551_v56 = vrot.slane %v549_v47, 5  ;;  %v2947_v24 = vld [vmem:[%s2881_s30 + $0x40] sm:$0xf]  ;;  %v2952_v29 = vld [vmem:[%s2881_s30 + $0x44] sm:$0x1] }
  0x1b   : > { %v651_v53 = vunpack.c.l.b16 %v366_v49  ;;  %v652_v54 = vunpack.c.l.b16 %v376_v50  ;;  %v457_v55 = vrot.slane %v456_v44, 4  ;;  %v557_v58 = vrot.slane %v555_v48, 5  ;;  %v2967_v47 = vld [vmem:[%s2881_s30 + $0x70] sm:$0xf] }
  0x1c   : > { %v467_v57 = vrot.slane %v466_v51, 4  ;;  %v561_v59 = vrot.slane %v559_v52, 4  ;;  %v565_v60 = vshll.u32 %v237_v45, 16  ;;  %v552_v0 = vor.u32 %v551_v56, %v548_v46  ;;  %v2974_v51 = vld [vmem:[%s2881_s30 + $0x74] sm:$0x1] }
  0x1d   : > { %v2920_v62 = vpack.c.b16 %v652_v54, %v651_v53  ;;  %v462_v63 = vsel %vm2908_vm3, %v457_v55, %v461_v38  ;;  %v258_v9 = vshrl.u32 %v2918_v61, 16  ;;  %v261_v13 = vshll.u32 %v2918_v61, 16  ;;  %v2960_v38 = vld [vmem:[%s2881_s30 + $0x6c] sm:$0xf] }
  0x1e   : > { %v472_v3 = vsel %vm2908_vm3, %v467_v57, %v471_v43  ;;  %v659_v4 = vunpack.c.l.b16 %v462_v63  ;;  %v562_v5 = vor.u32 %v561_v59, %v557_v58  ;;  %v567_v6 = vrot.slane %v565_v60, 5 }
  0x1f   : > { %2534 = vmatmul.msk.bf16.vlgmr.msra.gmra.mxu1 %vm691_vm4, %v2920_v62  ;;  %v660_v7 = vunpack.c.l.b16 %v472_v3  ;;  %v553_v8 = vrot.slane %v552_v0, 4  ;;  %v267_v15 = vshll.u32 %v2925_v1, 16  ;;  %v271_v16 = vshrl.u32 %v2925_v1, 16 }
  0x20   : > { %v563_v14 = vrot.slane %v562_v5, 4  ;;  %v277_v17 = vshll.u32 %v2928_v2, 16  ;;  %v260_v21 = vrot.slane %v258_v9, 4  ;;  %v263_v22 = vrot.slane %v261_v13, 5  ;;  %v238_v5 = vld [vmem:[%s2881_s30 + $0x9c] sm:$0xf] }
  0x21   : > { %v2939_v18 = vpack.c.b16 %v660_v7, %v659_v4  ;;  %v558_v20 = vsel %vm2908_vm3, %v553_v8, %v557_v58  ;;  %v269_v27 = vrot.slane %v267_v15, 5  ;;  %v273_v28 = vrot.slane %v271_v16, 4  ;;  %v239_v9 = vld [vmem:[%s2881_s30 + $0xa0] sm:$0xf] }
  0x22   : > { %v568_v25 = vsel %vm2908_vm3, %v563_v14, %v567_v6  ;;  %v667_v26 = vunpack.c.l.b16 %v558_v20  ;;  %v264_v31 = vor.u32 %v263_v22, %v260_v21  ;;  %v279_v32 = vrot.slane %v277_v17, 5  ;;  %v240_v17 = vld [vmem:[%s2881_s30 + $0xa4] sm:$0x1] }
  0x23   : > { %4068 = vst [vmem:[#allocation2_spill] sm:$0xff] %v2939_v18  ;;  %2538 = vmatmul.msk.bf16.vlgmr.msra.gmra.mxu2 %vm691_vm4, %v2939_v18  ;;  %v668_v30 = vunpack.c.l.b16 %v568_v25  ;;  %v274_v33 = vor.u32 %v273_v28, %v269_v27  ;;  %v378_v34 = vshrl.u32 %v2944_v23, 16  ;;  %v381_v35 = vshll.u32 %v2944_v23, 16 }
  0x24   : > { %v387_v37 = vshll.u32 %v2947_v24, 16  ;;  %v265_v40 = vrot.slane %v264_v31, 4  ;;  %v391_v41 = vshrl.u32 %v2947_v24, 16  ;;  %v397_v42 = vshll.u32 %v2952_v29, 16 }
  0x25   : > { %v2962_v39 = vpack.c.b16 %v668_v30, %v667_v26  ;;  %v275_v43 = vrot.slane %v274_v33, 4  ;;  %v380_v44 = vrot.slane %v378_v34, 4  ;;  %v383_v45 = vrot.slane %v381_v35, 5  ;;  %v2992_v35 = vld [vmem:[%s2881_s30 + $0xc] sm:$0xf] }
  0x26   : > { %v389_v46 = vrot.slane %v387_v37, 5  ;;  %v270_v48 = vsel %vm2908_vm3, %v265_v40, %v269_v27  ;;  %v393_v49 = vrot.slane %v391_v41, 4  ;;  %v399_v50 = vrot.slane %v397_v42, 5 }
  0x27   : > { %4069 = vst [vmem:[#allocation3_spill] sm:$0xff] %v2962_v39  ;;  %2542 = vmatmul.msk.bf16.vlgmr.msra.gmra.mxu3 %vm691_vm4, %v2962_v39  ;;  %v474_v52 = vshrl.u32 %v2960_v38, 16  ;;  %v280_v53 = vsel %vm2908_vm3, %v275_v43, %v279_v32  ;;  %v643_v54 = vunpack.c.l.b16 %v270_v48  ;;  %v384_v55 = vor.u32 %v383_v45, %v380_v44  ;;  %v2999_v43 = vld [vmem:[%s2881_s30 + $0x10] sm:$0xf]  ;;  %v3002_v48 = vld [vmem:[%s2881_s30 + $0x14] sm:$0x1] }
  0x28   : > { %v477_v56 = vshll.u32 %v2960_v38, 16  ;;  %v644_v57 = vunpack.c.l.b16 %v280_v53  ;;  %v394_v58 = vor.u32 %v393_v49, %v389_v46  ;;  %v483_v60 = vshll.u32 %v2967_v47, 16  ;;  %v3179_v39 = vld [vmem:[%s2881_s30 + $0x2c] sm:$0x1] }
  0x29   : > { %v476_v59 = vrot.slane %v474_v52, 4  ;;  %v385_v63 = vrot.slane %v384_v55, 4  ;;  %v487_v3 = vshrl.u32 %v2967_v47, 16  ;;  %v493_v4 = vshll.u32 %v2974_v51, 16 }
  0x2a   : > { %v479_v0 = vrot.slane %v477_v56, 5  ;;  %v675_v6 = vpack.c.b16 %v644_v57, %v643_v54  ;;  %v395_v7 = vrot.slane %v394_v58, 4  ;;  %v485_v8 = vrot.slane %v483_v60, 5  ;;  %v3012_v58 = vld [vmem:[%s2881_s30 + $0x48] sm:$0xf] }
  0x2b   : > { %v390_v13 = vsel %vm2908_vm3, %v385_v63, %v389_v46  ;;  %v489_v15 = vrot.slane %v487_v3, 4  ;;  %v495_v16 = vrot.slane %v493_v4, 5  ;;  %v570_v22 = vshrl.u32 %v238_v5, 16  ;;  %v3017_v3 = vld [vmem:[%s2881_s30 + $0x4c] sm:$0xf] }
  0x2c   : > { %v480_v14 = vor.u32 %v479_v0, %v476_v59  ;;  %2530 = vmatmul.msk.bf16.vlgmr.msra.gmra.mxu0 %vm691_vm4, %v675_v6  ;;  %v400_v20 = vsel %vm2908_vm3, %v395_v7, %v399_v50  ;;  %v653_v21 = vunpack.c.l.b16 %v390_v13  ;;  %v573_v25 = vshll.u32 %v238_v5, 16 }
  0x2d   : > { %v654_v26 = vunpack.c.l.b16 %v400_v20  ;;  %v490_v28 = vor.u32 %v489_v15, %v485_v8  ;;  %v579_v30 = vshll.u32 %v239_v9, 16  ;;  %v572_v31 = vrot.slane %v570_v22, 4  ;;  %v3024_v15 = vld [vmem:[%s2881_s30 + $0x50] sm:$0x1] }
  0x2e   : > { %v481_v27 = vrot.slane %v480_v14, 4  ;;  %v575_v32 = vrot.slane %v573_v25, 5  ;;  %v583_v33 = vshrl.u32 %v239_v9, 16  ;;  %v589_v34 = vshll.u32 %v240_v17, 16 }
  0x2f   : > { %v2994_v37 = vpack.c.b16 %v654_v26, %v653_v21  ;;  %v491_v41 = vrot.slane %v490_v28, 4  ;;  %v581_v42 = vrot.slane %v579_v30, 5  ;;  %v282_v52 = vshrl.u32 %v2992_v35, 16  ;;  %v3035_v28 = vld [vmem:[%s2881_s30 + $0x78] sm:$0xf] }
  0x30   : > { %v486_v40 = vsel %vm2908_vm3, %v481_v27, %v485_v8  ;;  %v576_v45 = vor.u32 %v575_v32, %v572_v31  ;;  %v585_v46 = vrot.slane %v583_v33, 4  ;;  %v591_v50 = vrot.slane %v589_v34, 5  ;;  %v3039_v34 = vld [vmem:[%s2881_s30 + $0x7c] sm:$0xf] }
  0x31   : > { %v661_v44 = vunpack.c.l.b16 %v486_v40  ;;  %2535 = vmatmul.msk.bf16.gmra.mxu1 %vm691_vm4, %v2994_v37  ;;  %v496_v49 = vsel %vm2908_vm3, %v491_v41, %v495_v16  ;;  %v285_v53 = vshll.u32 %v2992_v35, 16  ;;  %v291_v57 = vshll.u32 %v2999_v43, 16 }
  0x32   : > { %v662_v54 = vunpack.c.l.b16 %v496_v49  ;;  %v577_v55 = vrot.slane %v576_v45, 4  ;;  %v586_v56 = vor.u32 %v585_v46, %v581_v42  ;;  %v284_v59 = vrot.slane %v282_v52, 4 }
  0x33   : > { %v287_v60 = vrot.slane %v285_v53, 5  ;;  %v295_v63 = vshrl.u32 %v2999_v43, 16  ;;  %v301_v0 = vshll.u32 %v3002_v48, 16  ;;  %v293_v7 = vrot.slane %v291_v57, 5 }
  0x34   : > { %v3019_v4 = vpack.c.b16 %v662_v54, %v661_v44  ;;  %v582_v5 = vsel %vm2908_vm3, %v577_v55, %v581_v42  ;;  %v587_v6 = vrot.slane %v586_v56, 4  ;;  %v402_v17 = vshrl.u32 %v3012_v58, 16 }
  0x35   : > { %v669_v8 = vunpack.c.l.b16 %v582_v5  ;;  %v288_v9 = vor.u32 %v287_v60, %v284_v59  ;;  %v297_v13 = vrot.slane %v295_v63, 4  ;;  %v303_v14 = vrot.slane %v301_v0, 5 }
  0x36   : > { %2539 = vmatmul.msk.bf16.gmra.mxu2 %vm691_vm4, %v3019_v4  ;;  %v592_v16 = vsel %vm2908_vm3, %v587_v6, %v591_v50  ;;  %v405_v20 = vshll.u32 %v3012_v58, 16  ;;  %v411_v21 = vshll.u32 %v3017_v3, 16  ;;  %v415_v27 = vshrl.u32 %v3017_v3, 16  ;;  %v3046_v50 = vld [vmem:[%s2881_s30 + $0x80] sm:$0x1] }
  0x37   : > { %v670_v22 = vunpack.c.l.b16 %v592_v16  ;;  %v289_v25 = vrot.slane %v288_v9, 4  ;;  %v298_v26 = vor.u32 %v297_v13, %v293_v7  ;;  %v404_v30 = vrot.slane %v402_v17, 4  ;;  %v3065_v16 = vld [vmem:[%s2881_s30 + $0xac] sm:$0xf]  ;;  %v3068_v17 = vld [vmem:[%s2881_s30 + $0xb0] sm:$0x1] }
  0x38   : > { %v407_v31 = vrot.slane %v405_v20, 5  ;;  %v413_v32 = vrot.slane %v411_v21, 5  ;;  %v421_v33 = vshll.u32 %v3024_v15, 16  ;;  %v417_v44 = vrot.slane %v415_v27, 4  ;;  %4072 = vst [vmem:[#allocation6_spill] sm:$0xff] %v3065_v16 }
  0x39   : > { %v3041_v40 = vpack.c.b16 %v670_v22, %v669_v8  ;;  %v294_v41 = vsel %vm2908_vm3, %v289_v25, %v293_v7  ;;  %v299_v42 = vrot.slane %v298_v26, 4  ;;  %v498_v52 = vshrl.u32 %v3035_v28, 16  ;;  %v3058_v8 = vld [vmem:[%s2881_s30 + $0xa8] sm:$0xf]  ;;  %4073 = vst [vmem:[#allocation7_spill] sm:$0xff] %v3068_v17 }
  0x3a   : > { %v645_v45 = vunpack.c.l.b16 %v294_v41  ;;  %v408_v46 = vor.u32 %v407_v31, %v404_v30  ;;  %v423_v49 = vrot.slane %v421_v33, 5  ;;  %v418_v54 = vor.u32 %v417_v44, %v413_v32  ;;  %4071 = vst [vmem:[#allocation5_spill] sm:$0xff] %v3058_v8 }
  0x3b   : > { %4070 = vst [vmem:[#allocation4_spill] sm:$0xff] %v3041_v40  ;;  %2543 = vmatmul.msk.bf16.gmra.mxu3 %vm691_vm4, %v3041_v40  ;;  %v304_v53 = vsel %vm2908_vm3, %v299_v42, %v303_v14  ;;  %v501_v55 = vshll.u32 %v3035_v28, 16  ;;  %v507_v56 = vshll.u32 %v3039_v34, 16  ;;  %v500_v60 = vrot.slane %v498_v52, 4  ;;  %v3082_v52 = vld [vmem:[%s2881_s30 + $0x18] sm:$0xf] }
  0x3c   : > { %v646_v57 = vunpack.c.l.b16 %v304_v53  ;;  %v409_v59 = vrot.slane %v408_v46, 4  ;;  %v511_v63 = vshrl.u32 %v3039_v34, 16  ;;  %v419_v0 = vrot.slane %v418_v54, 4  ;;  %v3168_v40 = vld [vmem:[%s2881_s30 + $0x24] sm:$0xf] }
  0x3d   : > { %v503_v5 = vrot.slane %v501_v55, 5  ;;  %v509_v6 = vrot.slane %v507_v56, 5  ;;  %v517_v7 = vshll.u32 %v3046_v50, 16  ;;  %v594_v30 = vshrl.u32 %v3058_v8, 16  ;;  %v3087_v56 = vld [vmem:[%s2881_s30 + $0x1c] sm:$0xf] }
  0x3e   : > { %v3060_v9 = vpack.c.b16 %v646_v57, %v645_v45  ;;  %v414_v13 = vsel %vm2908_vm3, %v409_v59, %v413_v32  ;;  %v513_v14 = vrot.slane %v511_v63, 4  ;;  %v424_v20 = vsel %vm2908_vm3, %v419_v0, %v423_v49  ;;  %v3090_v57 = vld [vmem:[%s2881_s30 + $0x20] sm:$0x1] }
  0x3f   : > { %v655_v21 = vunpack.c.l.b16 %v414_v13  ;;  %v504_v22 = vor.u32 %v503_v5, %v500_v60  ;;  %v519_v25 = vrot.slane %v517_v7, 5  ;;  %v656_v26 = vunpack.c.l.b16 %v424_v20 }
  0x40   : > { %2531 = vmatmul.msk.bf16.gmra.mxu0 %vm691_vm4, %v3060_v9  ;;  %v514_v27 = vor.u32 %v513_v14, %v509_v6  ;;  %v597_v31 = vshll.u32 %v3058_v8, 16  ;;  %v603_v33 = vshll.u32 %v3065_v16, 16  ;;  %v607_v41 = vshrl.u32 %v3065_v16, 16 }
  0x41   : > { %v505_v32 = vrot.slane %v504_v22, 4  ;;  %v613_v42 = vshll.u32 %v3068_v17, 16  ;;  %v3079_v44 = vpack.c.b16 %v656_v26, %v655_v21  ;;  %v596_v46 = vrot.slane %v594_v30, 4  ;;  %v3102_v26 = vld [vmem:[%s2881_s30 + $0x54] sm:$0xf] }
  0x42   : > { %v515_v45 = vrot.slane %v514_v27, 4  ;;  %v599_v49 = vrot.slane %v597_v31, 5  ;;  %v605_v54 = vrot.slane %v603_v33, 5  ;;  %v609_v55 = vrot.slane %v607_v41, 4  ;;  %v3146_v17 = vld [vmem:[%s2881_s30 + $0xb4] sm:$0xf] }
  0x43   : > { %4074 = vst [vmem:[#allocation8_spill] sm:$0xff] %v3079_v44  ;;  %v510_v53 = vsel %vm2908_vm3, %v505_v32, %v509_v6  ;;  %2536 = vmatmul.msk.bf16.gmra.mxu1 %vm691_vm4, %v3079_v44  ;;  %v615_v0 = vrot.slane %v613_v42, 5  ;;  %v306_v6 = vshrl.u32 %v3082_v52, 16  ;;  %v309_v13 = vshll.u32 %v3082_v52, 16  ;;  %v3107_v32 = vld [vmem:[%s2881_s30 + $0x58] sm:$0xf] }
  0x44   : > { %v520_v59 = vsel %vm2908_vm3, %v515_v45, %v519_v25  ;;  %v663_v60 = vunpack.c.l.b16 %v510_v53  ;;  %v600_v63 = vor.u32 %v599_v49, %v596_v46  ;;  %v610_v7 = vor.u32 %v609_v55, %v605_v54  ;;  %v3112_v46 = vld [vmem:[%s2881_s30 + $0x5c] sm:$0x1]  ;;  %4077 = vst [vmem:[#allocation11_spill] sm:$0xff] %v3146_v17 }
  0x45   : > { %v664_v5 = vunpack.c.l.b16 %v520_v59  ;;  %v315_v20 = vshll.u32 %v3087_v56, 16  ;;  %v319_v21 = vshrl.u32 %v3087_v56, 16  ;;  %v325_v22 = vshll.u32 %v3090_v57, 16 }
  0x46   : > { %v601_v14 = vrot.slane %v600_v63, 4  ;;  %v611_v27 = vrot.slane %v610_v7, 4  ;;  %v308_v30 = vrot.slane %v306_v6, 4  ;;  %v311_v31 = vrot.slane %v309_v13, 5  ;;  %v3122_v7 = vld [vmem:[%s2881_s30 + $0x84] sm:$0xf] }
  0x47   : > { %v3104_v25 = vpack.c.b16 %v664_v5, %v663_v60  ;;  %v317_v41 = vrot.slane %v315_v20, 5  ;;  %v321_v42 = vrot.slane %v319_v21, 4  ;;  %v327_v45 = vrot.slane %v325_v22, 5  ;;  %4075 = vst [vmem:[#allocation9_spill] sm:$0xff] %v3122_v7 }
  0x48   : > { %v606_v33 = vsel %vm2908_vm3, %v601_v14, %v605_v54  ;;  %v616_v49 = vsel %vm2908_vm3, %v611_v27, %v615_v0  ;;  %v312_v55 = vor.u32 %v311_v31, %v308_v30  ;;  %v426_v59 = vshrl.u32 %v3102_v26, 16  ;;  %v3129_v30 = vld [vmem:[%s2881_s30 + $0x88] sm:$0xf] }
  0x49   : > { %2540 = vmatmul.msk.bf16.gmra.mxu2 %vm691_vm4, %v3104_v25  ;;  %v671_v53 = vunpack.c.l.b16 %v606_v33  ;;  %v672_v60 = vunpack.c.l.b16 %v616_v49  ;;  %v322_v63 = vor.u32 %v321_v42, %v317_v41  ;;  %v429_v54 = vshll.u32 %v3102_v26, 16  ;;  %v3134_v49 = vld [vmem:[%s2881_s30 + $0x8c] sm:$0x1] }
  0x4a   : > { %v435_v5 = vshll.u32 %v3107_v32, 16  ;;  %v313_v6 = vrot.slane %v312_v55, 4  ;;  %v428_v13 = vrot.slane %v426_v59, 4  ;;  %v439_v14 = vshrl.u32 %v3107_v32, 16 }
  0x4b   : > { %v445_v0 = vshll.u32 %v3112_v46, 16  ;;  %v3126_v20 = vpack.c.b16 %v672_v60, %v671_v53  ;;  %v323_v21 = vrot.slane %v322_v63, 4  ;;  %v431_v22 = vrot.slane %v429_v54, 5 }
  0x4c   : > { %v437_v27 = vrot.slane %v435_v5, 5  ;;  %v318_v31 = vsel %vm2908_vm3, %v313_v6, %v317_v41  ;;  %v441_v33 = vrot.slane %v439_v14, 4  ;;  %v522_v55 = vshrl.u32 %v3122_v7, 16 }
  0x4d   : > { %4076 = vst [vmem:[#allocation10_spill] sm:$0xff] %v3126_v20  ;;  %v447_v42 = vrot.slane %v445_v0, 5  ;;  %2544 = vmatmul.msk.bf16.gmra.mxu3 %vm691_vm4, %v3126_v20  ;;  %v328_v53 = vsel %vm2908_vm3, %v323_v21, %v327_v45  ;;  %v647_v59 = vunpack.c.l.b16 %v318_v31  ;;  %v432_v60 = vor.u32 %v431_v22, %v428_v13  ;;  %v3151_v22 = vld [vmem:[%s2881_s30 + $0xb8] sm:$0xf] }
  0x4e   : > { %v525_v63 = vshll.u32 %v3122_v7, 16  ;;  %v648_v54 = vunpack.c.l.b16 %v328_v53  ;;  %v442_v41 = vor.u32 %v441_v33, %v437_v27  ;;  %v524_v5 = vrot.slane %v522_v55, 4  ;;  %4078 = vst [vmem:[#allocation12_spill] sm:$0xff] %v3151_v22 }
  0x4f   : > { %v531_v6 = vshll.u32 %v3129_v30, 16  ;;  %v433_v14 = vrot.slane %v432_v60, 4  ;;  %v535_v8 = vshrl.u32 %v3129_v30, 16  ;;  %v541_v20 = vshll.u32 %v3134_v49, 16  ;;  %v3156_v60 = vld [vmem:[%s2881_s30 + $0xbc] sm:$0x1] }
  0x50   : > { %v527_v0 = vrot.slane %v525_v63, 5  ;;  %v3148_v45 = vpack.c.b16 %v648_v54, %v647_v59  ;;  %v443_v21 = vrot.slane %v442_v41, 4  ;;  %4079 = vst [vmem:[#allocation13_spill] sm:$0xff] %v3156_v60  ;;  %v618_v54 = vshrl.u32 %v3146_v17, 16 }
  0x51   : > { %v533_v13 = vrot.slane %v531_v6, 5  ;;  %v438_v31 = vsel %vm2908_vm3, %v433_v14, %v437_v27  ;;  %v537_v55 = vrot.slane %v535_v8, 4  ;;  %v543_v53 = vrot.slane %v541_v20, 5 }
  0x52   : > { %v528_v33 = vor.u32 %v527_v0, %v524_v5  ;;  %2532 = vmatmul.msk.bf16.gmra.mxu0 %vm691_vm4, %v3148_v45  ;;  %v448_v59 = vsel %vm2908_vm3, %v443_v21, %v447_v42  ;;  %v657_v63 = vunpack.c.l.b16 %v438_v31  ;;  %v621_v41 = vshll.u32 %v3146_v17, 16 }
  0x53   : > { %v658_v6 = vunpack.c.l.b16 %v448_v59  ;;  %v538_v5 = vor.u32 %v537_v55, %v533_v13  ;;  %v627_v8 = vshll.u32 %v3151_v22, 16  ;;  %v620_v20 = vrot.slane %v618_v54, 4 }
  0x54   : > { %v529_v27 = vrot.slane %v528_v33, 4  ;;  %v623_v14 = vrot.slane %v621_v41, 5  ;;  %v631_v0 = vshrl.u32 %v3151_v22, 16  ;;  %v637_v16 = vshll.u32 %v3156_v60, 16  ;;  %v3175_v33 = vld [vmem:[%s2881_s30 + $0x28] sm:$0xf] }
  0x55   : > { %v3170_v42 = vpack.c.b16 %v658_v6, %v657_v63  ;;  %v539_v31 = vrot.slane %v538_v5, 4  ;;  %v629_v59 = vrot.slane %v627_v8, 5  ;;  %v1077_v55 = vrot.slane %v2928_v2, 5 }
  0x56   : > { %v534_v21 = vsel %vm2908_vm3, %v529_v27, %v533_v13  ;;  %v624_v54 = vor.u32 %v623_v14, %v620_v20  ;;  %v633_v41 = vrot.slane %v631_v0, 4  ;;  %v639_v6 = vrot.slane %v637_v16, 5 }
  0x57   : > { %4080 = vst [vmem:[#allocation14_spill] sm:$0xff] %v3170_v42  ;;  %v665_v17 = vunpack.c.l.b16 %v534_v21  ;;  %2537 = vmatmul.msk.bf16.gmra.mxu1 %vm691_vm4, %v3170_v42  ;;  %v544_v63 = vsel %vm2908_vm3, %v539_v31, %v543_v53  ;;  %v330_v13 = vshrl.u32 %v3168_v40, 16  ;;  %v333_v27 = vshll.u32 %v3168_v40, 16 }
  0x58   : > { %v666_v5 = vunpack.c.l.b16 %v544_v63  ;;  %v625_v8 = vrot.slane %v624_v54, 4  ;;  %v634_v60 = vor.u32 %v633_v41, %v629_v59  ;;  %v339_v2 = vshll.u32 %v3175_v33, 16  ;;  %v2715_v54 = vld [vmem:[%s4022_s1 + $0xc] sm:$0x3]  ;;  %v2736_v41 = vld [vmem:[%s4022_s1 + $0xe] sm:$0x3] }
  0x59   : > { %v332_v20 = vrot.slane %v330_v13, 4  ;;  %v335_v14 = vrot.slane %v333_v27, 5  ;;  %v343_v0 = vshrl.u32 %v3175_v33, 16  ;;  %v349_v21 = vshll.u32 %v3179_v39, 16 }
  0x5a   : > { %v3190_v22 = vpack.c.b16 %v666_v5, %v665_v17  ;;  %v630_v16 = vsel %vm2908_vm3, %v625_v8, %v629_v59  ;;  %v635_v53 = vrot.slane %v634_v60, 4  ;;  %v341_v31 = vrot.slane %v339_v2, 5  ;;  %v2698_v17 = vld [vmem:[%s4022_s1 + $0xa] sm:$0x3]  ;;  %v2754_v60 = vld [vmem:[%s4022_s1 + $0x10] sm:$0x3] }
  0x5b   : > { %v673_v63 = vunpack.c.l.b16 %v630_v16  ;;  %v336_v13 = vor.u32 %v335_v14, %v332_v20  ;;  %v345_v27 = vrot.slane %v343_v0, 4  ;;  %v351_v7 = vrot.slane %v349_v21, 5 }
  0x5c   : > { %4081 = vst [vmem:[#allocation15_spill] sm:$0xff] %v3190_v22  ;;  %2541 = vmatmul.msk.bf16.gmra.mxu2 %vm691_vm4, %v3190_v22  ;;  %v640_v59 = vsel %vm2908_vm3, %v635_v53, %v639_v6  ;;  %v2626_v5 = vrot.slane %v2918_v61, 9  ;;  %v1074_v0 = vrot.slane %v2925_v1, 5  ;;  %v1847_v21 = vsel %vm740_vm0, %v2715_v54, 0 }
  0x5d   : > { %v674_v8 = vunpack.c.l.b16 %v640_v59  ;;  %v337_v2 = vrot.slane %v336_v13, 4  ;;  %v346_v20 = vor.u32 %v345_v27, %v341_v31  ;;  %v2003_v16 = vsel %vm740_vm0, %v2736_v41, 0  ;;  %1856 = vmatpush.bf16.msra.mxu2 %v1847_v21  ;;  %v2775_v21 = vld [vmem:[%s2881_s30 + $0xc] sm:$0xff] }
  0x5e   : > { %v1713_v22 = vsel %vm740_vm0, %v2698_v17, 0  ;;  %v2143_v6 = vsel %vm740_vm0, %v2754_v60, 0  ;;  %v1075_v27 = vsel %vm3211_vm7, %v2626_v5, %v1074_v0  ;;  %2012 = vmatpush.bf16.msra.mxu3 %v2003_v16  ;;  %v1076_v54 = vrot.slane %v1074_v0, 4 }
  0x5f   : > { %v3220_v53 = vpack.c.b16 %v674_v8, %v673_v63  ;;  %v342_v61 = vsel %vm2908_vm3, %v337_v2, %v341_v31  ;;  %v347_v13 = vrot.slane %v346_v20, 4  ;;  %1722 = vmatpush.bf16.msra.mxu1 %v1713_v22  ;;  %2152 = vmatpush.bf16.msra.mxu0 %v2143_v6  ;;  %v2627_v41 = vrot.slane %v2992_v35, 9  ;;  %v2774_v22 = vld [vmem:[%s2881_s30] sm:$0xff]  ;;  %v3257_v6 = vld [vmem:[%s2881_s30 + $0x18] sm:$0xff] }
  0x60   : > { %v649_v1 = vunpack.c.l.b16 %v342_v61  ;;  %v1186_v31 = vunpack.c.l.b16 %v1075_v27  ;;  %v1081_v17 = vrot.slane %v2999_v43, 5  ;;  %v1084_v60 = vrot.slane %v3002_v48, 5 }
  0x61   : > { %2545 = vmatmul.msk.bf16.gmra.mxu3 %vm691_vm4, %v3220_v53  ;;  %v352_v63 = vsel %vm2908_vm3, %v347_v13, %v351_v7  ;;  %v1078_v5 = vsel %vm3211_vm7, %v1076_v54, %v1077_v55  ;;  %v1088_v16 = vrot.slane %v3087_v56, 5  ;;  %v2628_v61 = vrot.slane %v3082_v52, 9 }
  0x62   : > { %v650_v59 = vunpack.c.l.b16 %v352_v63  ;;  %v1187_v8 = vunpack.c.l.b16 %v1078_v5  ;;  %v1082_v35 = vsel %vm3211_vm7, %v2627_v41, %v1081_v17  ;;  %v1083_v2 = vrot.slane %v1081_v17, 4  ;;  %v3277_v41 = vld [vmem:[%s2881_s30 + $0x24] sm:$0xff] }
  0x63   : > { %v1188_v7 = vunpack.c.l.b16 %v1082_v35  ;;  %v1090_v13 = vrot.slane %v1088_v16, 4  ;;  %v1091_v27 = vrot.slane %v3090_v57, 5  ;;  %v1095_v57 = vrot.slane %v3175_v33, 5 }
  0x64   : > { %v3238_v20 = vpack.c.b16 %v650_v59, %v649_v1  ;;  %v1218_v0 = vpack.c.b16 %v1187_v8, %v1186_v31  ;;  %v1085_v43 = vsel %vm3211_vm7, %v1083_v2, %v1084_v60  ;;  %v2629_v63 = vrot.slane %v3168_v40, 9  ;;  %v3299_v8 = vld [vmem:[%s2881_s30 + $0x30] sm:$0xff] }
  0x65   : > { %v1189_v48 = vunpack.c.l.b16 %v1085_v43  ;;  %v1092_v56 = vsel %vm3211_vm7, %v1090_v13, %v1091_v27  ;;  %v1097_v31 = vrot.slane %v1095_v57, 4  ;;  %v1098_v17 = vrot.slane %v3179_v39, 5  ;;  %v3327_v27 = vld [vmem:[%s2881_s30 + $0x3c] sm:$0xff] }
  0x66   : > { %2533 = vmatmul.msk.bf16.gmra.mxu0 %vm691_vm4, %v3238_v20  ;;  %v1191_v54 = vunpack.c.l.b16 %v1092_v56  ;;  %v1096_v60 = vsel %vm3211_vm7, %v2629_v63, %v1095_v57  ;;  %v1102_v39 = vrot.slane %v2887_v11, 5  ;;  %v2630_v35 = vrot.slane %v2884_v10, 9 }
  0x67   : > { %2610 = vmatmul.msk.bf16.vlgmr.msrb.gmra.mxu1 %vm691_vm4, %v2774_v22  ;;  %v3245_v55 = vpack.c.b16 %v1189_v48, %v1188_v7  ;;  %v1099_v33 = vsel %vm3211_vm7, %v1097_v31, %v1098_v17  ;;  %v1192_v59 = vunpack.c.l.b16 %v1096_v60  ;;  %v1105_v7 = vrot.slane %v2890_v12, 5 }
  0x68   : > { %v1193_v5 = vunpack.c.l.b16 %v1099_v33  ;;  %v1104_v2 = vrot.slane %v1102_v39, 4  ;;  %v1109_v13 = vrot.slane %v2947_v24, 5  ;;  %v2631_v56 = vrot.slane %v2944_v23, 9 }
  0x6a   : > { %v3291_v40 = vpack.c.b16 %v1193_v5, %v1192_v59  ;;  %v1106_v11 = vsel %vm3211_vm7, %v1104_v2, %v1105_v7  ;;  %v1110_v24 = vsel %vm3211_vm7, %v2631_v56, %v1109_v13  ;;  %v1116_v5 = vrot.slane %v3017_v3, 5 }
  0x6b   : > { %v1196_v23 = vunpack.c.l.b16 %v1110_v24  ;;  %v2632_v7 = vrot.slane %v3012_v58, 9  ;;  %v1123_v24 = vrot.slane %v3107_v32, 5 }
  0x6c   : > { %2643 = vmatmul.msk.bf16.vlgmr.msrb.gmra.mxu2 %vm691_vm4, %v1218_v0  ;;  %v1103_v0 = vsel %vm3211_vm7, %v2630_v35, %v1102_v39  ;;  %v3361_v35 = vld [vmem:[%s2881_s30 + $0x48] sm:$0xff] }
  0x6d   : > { %v1194_v48 = vunpack.c.l.b16 %v1103_v0  ;;  %4086 = vst [vmem:[#allocation18_spill] sm:$0xff] %v3361_v35  ;;  %v1118_v0 = vrot.slane %v1116_v5, 4 }
  0x71   : > { %2664 = vmatmul.msk.bf16.vlgmr.msrb.gmra.mxu3 %vm691_vm4, %v2775_v21 }
  0x76   : > { %2681 = vmatmul.msk.bf16.vlgmr.msrb.gmra.mxu0 %vm691_vm4, %v3060_v9  ;;  %v1089_v9 = vsel %vm3211_vm7, %v2628_v61, %v1088_v16 }
  0x77   : > { %2611 = vmatmul.msk.bf16.gmra.mxu1 %vm691_vm4, %v2775_v21  ;;  %v1190_v1 = vunpack.c.l.b16 %v1089_v9  ;;  %v1195_v21 = vunpack.c.l.b16 %v1106_v11  ;;  %v1119_v11 = vrot.slane %v3024_v15, 5 }
  0x79   : > { %v3271_v52 = vpack.c.b16 %v1191_v54, %v1190_v1  ;;  %v3319_v12 = vpack.c.b16 %v1195_v21, %v1194_v48  ;;  %v1111_v1 = vrot.slane %v1109_v13, 4  ;;  %v1112_v54 = vrot.slane %v2952_v29, 5 }
  0x7a   : > { %v1117_v21 = vsel %vm3211_vm7, %v2632_v7, %v1116_v5  ;;  %v1120_v13 = vsel %vm3211_vm7, %v1118_v0, %v1119_v11  ;;  %v2633_v5 = vrot.slane %v3102_v26, 9  ;;  %v1125_v7 = vrot.slane %v1123_v24, 4 }
  0x7b   : > { %v1113_v63 = vsel %vm3211_vm7, %v1111_v1, %v1112_v54  ;;  %v1198_v56 = vunpack.c.l.b16 %v1117_v21  ;;  %v1199_v1 = vunpack.c.l.b16 %v1120_v13  ;;  %v1126_v0 = vrot.slane %v3112_v46, 5 }
  0x7c   : > { %2644 = vmatmul.msk.bf16.gmra.mxu2 %vm691_vm4, %v3245_v55  ;;  %v1197_v60 = vunpack.c.l.b16 %v1113_v63  ;;  %v1124_v32 = vsel %vm3211_vm7, %v2633_v5, %v1123_v24  ;;  %v1130_v5 = vrot.slane %v2899_v19, 5 }
  0x7d   : > { %v3385_v54 = vpack.c.b16 %v1199_v1, %v1198_v56  ;;  %v1127_v13 = vsel %vm3211_vm7, %v1125_v7, %v1126_v0  ;;  %v1200_v56 = vunpack.c.l.b16 %v1124_v32  ;;  %v2806_v32 = vld [vmem:[%s2881_s30 + $0x68] sm:$0x1] }
  0x7e   : > { %v3351_v33 = vpack.c.b16 %v1197_v60, %v1196_v23  ;;  %v3395_v60 = vld [vmem:[%s2881_s30 + $0x54] sm:$0xff]  ;;  %v1201_v46 = vunpack.c.l.b16 %v1127_v13  ;;  %v1133_v13 = vrot.slane %v2806_v32, 5 }
  0x7f   : > { %4089 = vst [vmem:[#allocation21_spill] sm:$0xff] %v3385_v54 }
  0x80   : > { %4090 = vst [vmem:[#allocation22_spill] sm:$0xff] %v3395_v60 }
  0x81   : > { %2665 = vmatmul.msk.bf16.gmra.mxu3 %vm691_vm4, %v3257_v6 }
  0x86   : > { %2682 = vmatmul.msk.bf16.gmra.mxu0 %vm691_vm4, %v3148_v45 }
  0x87   : > { %2612 = vmatmul.msk.bf16.gmra.mxu1 %vm691_vm4, %v3257_v6 }
  0x8c   : > { %2645 = vmatmul.msk.bf16.gmra.mxu2 %vm691_vm4, %v3271_v52 }
  0x91   : > { %2666 = vmatmul.msk.bf16.gmra.mxu3 %vm691_vm4, %v3277_v41 }
  0x96   : > { %2683 = vmatmul.msk.bf16.gmra.mxu0 %vm691_vm4, %v3238_v20 }
  0x97   : > { %2613 = vmatmul.msk.bf16.gmra.mxu1 %vm691_vm4, %v3277_v41 }
  0x9c   : > { %v3294_v22 = vpop.f32.mrf.mxu1  ;;  %2646 = vmatmul.msk.bf16.gmra.mxu2 %vm691_vm4, %v3291_v40 }
  0xa1   : > { %2667 = vmatmul.msk.bf16.gmra.mxu3 %vm691_vm4, %v3299_v8 }
  0xa4   : > { %v3309_v43 = vpop.f32.mrf.mxu1 }
  0xa6   : > { %v3311_v16 = vpop.f32.mrf.mxu2  ;;  %2684 = vmatmul.msk.bf16.gmra.mxu0 %vm691_vm4, %v2920_v62 }
  0xa7   : > { %2614 = vmatmul.msk.bf16.gmra.mxu1 %vm691_vm4, %v3299_v8 }
  0xa9   : > { %v3317_v10 = vpop.f32.mrf.mxu0 }
  0xaa   : > { %v3321_v61 = vpop.f32.mrf.mxu3 }
  0xab   : > { %4084 = vst [vmem:[#allocation16_spill] sm:$0xff] %v3321_v61 }
  0xac   : > { %2647 = vmatmul.msk.bf16.gmra.mxu2 %vm691_vm4, %v3319_v12 }
  0xae   : > { %v3329_v9 = vpop.f32.mrf.mxu1  ;;  %v3333_v57 = vpop.f32.mrf.mxu2 }
  0xb1   : > { %2668 = vmatmul.msk.bf16.gmra.mxu3 %vm691_vm4, %v3327_v27  ;;  %v3341_v31 = vpop.f32.mrf.mxu0 }
  0xb2   : > { %v3343_v17 = vpop.f32.mrf.mxu3 }
  0xb3   : > { %4085 = vst [vmem:[#allocation17_spill] sm:$0xff] %v3343_v17 }
  0xb6   : > { %2685 = vmatmul.msk.bf16.gmra.mxu0 %vm691_vm4, %v2994_v37  ;;  %v3347_v29 = vpop.f32.mrf.mxu1 }
  0xb7   : > { %2615 = vmatmul.msk.bf16.gmra.mxu1 %vm691_vm4, %v3327_v27 }
  0xb9   : > { %v3353_v59 = vpop.f32.mrf.mxu2 }
  0xbc   : > { %2648 = vmatmul.msk.bf16.gmra.mxu2 %vm691_vm4, %v3351_v33 }
  0xbd   : > { %v3356_v39 = vpop.f32.mrf.mxu0 }
  0xbe   : > { %v3363_v2 = vpop.f32.mrf.mxu3 }
  0xbf   : > { %4087 = vst [vmem:[#allocation19_spill] sm:$0xff] %v3363_v2 }
  0xc0   : > { %v3367_v48 = vpop.f32.mrf.mxu1 }
  0xc1   : > { %2669 = vmatmul.msk.bf16.gmra.mxu3 %vm691_vm4, %v3361_v35  ;;  %v3371_v3 = vpop.f32.mrf.mxu2 }
  0xc5   : > { %v3377_v58 = vpop.f32.mrf.mxu0 }
  0xc6   : > { %2686 = vmatmul.msk.bf16.gmra.mxu0 %vm691_vm4, %v3079_v44  ;;  %v3381_v15 = vpop.f32.mrf.mxu3 }
  0xc7   : > { %4088 = vst [vmem:[#allocation20_spill] sm:$0xff] %v3381_v15  ;;  %2616 = vmatmul.msk.bf16.gmra.mxu1 %vm691_vm4, %v3361_v35  ;;  %v3430_v15 = vld [vmem:[%s2881_s30 + $0x60] sm:$0xff] }
  0xc8   : > { %v3388_v63 = vpop.f32.mrf.mxu1  ;;  %4094 = vst [vmem:[#allocation26_spill] sm:$0xff] %v3430_v15 }
  0xcc   : > { %v3390_v23 = vpop.f32.mrf.mxu2  ;;  %2649 = vmatmul.msk.bf16.gmra.mxu2 %vm691_vm4, %v3385_v54 }
  0xcf   : > { %v3399_v11 = vpop.f32.mrf.mxu0 }
  0xd0   : > { %v3401_v21 = vpop.f32.mrf.mxu3 }
  0xd1   : > { %4091 = vst [vmem:[#allocation23_spill] sm:$0xff] %v3401_v21  ;;  %2670 = vmatmul.msk.bf16.gmra.mxu3 %vm691_vm4, %v3395_v60  ;;  %v3417_v21 = vpack.c.b16 %v1201_v46, %v1200_v56 }
  0xd3   : > { %4092 = vst [vmem:[#allocation24_spill] sm:$0xff] %v3417_v21 }
  0xd4   : > { %v3409_v26 = vpop.f32.mrf.mxu1  ;;  %v3411_v1 = vpop.f32.mrf.mxu2 }
  0xd6   : > { %2687 = vmatmul.msk.bf16.gmra.mxu0 %vm691_vm4, %v3170_v42  ;;  %v2807_v42 = vld [vmem:[%s2881_s30 + $0x60] sm:$0xf] }
  0xd7   : > { %2617 = vmatmul.msk.bf16.gmra.mxu1 %vm691_vm4, %v3395_v60  ;;  %v3419_v24 = vpop.f32.mrf.mxu0  ;;  %v2634_v2 = vrot.slane %v2807_v42, 9  ;;  %v1132_v60 = vrot.slane %v1130_v5, 4 }
  0xd8   : > { %v3422_v7 = vpop.f32.mrf.mxu3 }
  0xd9   : > { %4093 = vst [vmem:[#allocation25_spill] sm:$0xff] %v3422_v7  ;;  %v1131_v19 = vsel %vm3211_vm7, %v2634_v2, %v1130_v5  ;;  %v1134_v46 = vsel %vm3211_vm7, %v1132_v60, %v1133_v13  ;;  %v1137_v60 = vrot.slane %v2967_v47, 5 }
  0xda   : > { %v1202_v17 = vunpack.c.l.b16 %v1131_v19  ;;  %v1203_v42 = vunpack.c.l.b16 %v1134_v46  ;;  %v3463_v19 = vld [vmem:[%s2881_s30 + $0x6c] sm:$0xff] }
  0xdc   : > { %2650 = vmatmul.msk.bf16.gmra.mxu2 %vm691_vm4, %v3417_v21  ;;  %v3426_v0 = vpop.f32.mrf.mxu1  ;;  %v3452_v2 = vpack.c.b16 %v1203_v42, %v1202_v17  ;;  %v1139_v17 = vrot.slane %v1137_v60, 4 }
  0xde   : > { %4096 = vst [vmem:[#allocation28_spill] sm:$0xff] %v3452_v2 }
  0xdf   : > { %v3433_v56 = vpop.f32.mrf.mxu2 }
  0xe1   : > { %2671 = vmatmul.msk.bf16.gmra.mxu3 %vm691_vm4, %v3430_v15 }
  0xe3   : > { %v3441_v7 = vpop.f32.mrf.mxu0 }
  0xe4   : > { %v3443_v32 = vpop.f32.mrf.mxu3  ;;  %v973_v21 = vpop.f32.mrf.mxu1 }
  0xe5   : > { %4095 = vst [vmem:[#allocation27_spill] sm:$0xff] %v3443_v32  ;;  %v974_v54 = vadd.f32 %v973_v21, %v3317_v10  ;;  %v1140_v21 = vrot.slane %v2974_v51, 5  ;;  %v2635_v32 = vrot.slane %v2960_v38, 9 }
  0xe6   : > { %2688 = vmatmul.msk.bf16.gmra.mxu0 %vm691_vm4, %v2939_v18 }
  0xe7   : > { %v3448_v44 = vpop.f32.mrf.mxu2  ;;  %2618 = vmatmul.msk.bf16.gmra.mxu1 %vm691_vm4, %v3430_v15  ;;  %v1138_v47 = vsel %vm3211_vm7, %v2635_v32, %v1137_v60 }
  0xe8   : > { %v1204_v61 = vunpack.c.l.b16 %v1138_v47 }
  0xeb   : > { %v3455_v5 = vpop.f32.mrf.mxu0 }
  0xec   : > { %v3457_v13 = vpop.f32.mrf.mxu3  ;;  %2651 = vmatmul.msk.bf16.gmra.mxu2 %vm691_vm4, %v3452_v2  ;;  %v975_v10 = vpop.f32.mrf.mxu1 }
  0xed   : > { %4097 = vst [vmem:[#allocation29_spill] sm:$0xff] %v3457_v13  ;;  %v976_v46 = vadd.f32 %v975_v10, %v3341_v31  ;;  %v1141_v13 = vsel %vm3211_vm7, %v1139_v17, %v1140_v21  ;;  %v1144_v21 = vrot.slane %v3039_v34, 5 }
  0xee   : > { %v1205_v35 = vunpack.c.l.b16 %v1141_v13  ;;  %v1147_v13 = vrot.slane %v3046_v50, 5 }
  0xef   : > { %v1294_v42 = vpop.f32.mrf.mxu2 }
  0xf0   : > { %v1374_v18 = vadd.f32 %v1294_v42, %v974_v54  ;;  %v3480_v10 = vpack.c.b16 %v1205_v35, %v1204_v61  ;;  %v3487_v42 = vld [vmem:[%s2881_s30 + $0x78] sm:$0xff] }
  0xf1   : > { %2672 = vmatmul.msk.bf16.gmra.mxu3 %vm691_vm4, %v3463_v19 }
  0xf3   : > { %v1584_v2 = vpop.f32.mrf.mxu0 }
  0xf4   : > { %v1428_v51 = vpop.f32.mrf.mxu3  ;;  %v978_v15 = vpop.f32.mrf.mxu1 }
  0xf5   : > { %v1508_v31 = vadd.f32 %v1428_v51, %v1374_v18  ;;  %v979_v38 = vadd.f32 %v978_v15, %v3356_v39 }
  0xf6   : > { %2689 = vmatmul.msk.bf16.gmra.mxu0 %vm691_vm4, %v3019_v4 }
  0xf7   : > { %v1296_v54 = vpop.f32.mrf.mxu2  ;;  %2619 = vmatmul.msk.bf16.gmra.mxu1 %vm691_vm4, %v3463_v19  ;;  %v3478_v32 = vadd.f32 %v1584_v2, %v1508_v31  ;;  %v2636_v2 = vrot.slane %v3035_v28, 9 }
  0xf8   : > { %v1375_v60 = vadd.f32 %v1296_v54, %v976_v46  ;;  %v1146_v46 = vrot.slane %v1144_v21, 4 }
  0xf9   : > { %v1145_v50 = vsel %vm3211_vm7, %v2636_v2, %v1144_v21 }
  0xfa   : > { %v1148_v51 = vsel %vm3211_vm7, %v1146_v46, %v1147_v13  ;;  %v1154_v46 = vrot.slane %v3134_v49, 5 }
  0xfb   : > { %v1586_v17 = vpop.f32.mrf.mxu0 }
  0xfc   : > { %v1430_v18 = vpop.f32.mrf.mxu3  ;;  %2652 = vmatmul.msk.bf16.gmra.mxu2 %vm691_vm4, %v3480_v10  ;;  %v980_v39 = vpop.f32.mrf.mxu1 }
  0xfd   : > { %v1509_v15 = vadd.f32 %v1430_v18, %v1375_v60  ;;  %v981_v47 = vadd.f32 %v980_v39, %v3377_v58  ;;  %v1206_v58 = vunpack.c.l.b16 %v1145_v50  ;;  %v1207_v18 = vunpack.c.l.b16 %v1148_v51  ;;  %v3513_v50 = vld [vmem:[%s2881_s30 + $0x84] sm:$0xff] }
  0xff   : > { %v1299_v61 = vpop.f32.mrf.mxu2  ;;  %v3491_v35 = vadd.f32 %v1586_v17, %v1509_v15  ;;  %v3506_v13 = vpack.c.b16 %v1207_v18, %v1206_v58  ;;  %v1151_v15 = vrot.slane %v3129_v30, 5 }
 0x100   : > { %v1376_v34 = vadd.f32 %v1299_v61, %v979_v38 }
 0x101   : > { %2673 = vmatmul.msk.bf16.gmra.mxu3 %vm691_vm4, %v3487_v42 }
 0x103   : > { %v1589_v31 = vpop.f32.mrf.mxu0 }
 0x104   : > { %v1433_v54 = vpop.f32.mrf.mxu3  ;;  %v983_v60 = vpop.f32.mrf.mxu1 }
 0x105   : > { %v1510_v28 = vadd.f32 %v1433_v54, %v1376_v34  ;;  %v984_v17 = vadd.f32 %v983_v60, %v3399_v11 }
 0x106   : > { %2690 = vmatmul.msk.bf16.gmra.mxu0 %vm691_vm4, %v3104_v25 }
 0x107   : > { %v1301_v38 = vpop.f32.mrf.mxu2  ;;  %2620 = vmatmul.msk.bf16.gmra.mxu1 %vm691_vm4, %v3487_v42  ;;  %v3504_v21 = vadd.f32 %v1589_v31, %v1510_v28  ;;  %v4098_v31 = vld [vmem:[#allocation9_spill] sm:$0xff] }
 0x108   : > { %v1377_v39 = vadd.f32 %v1301_v38, %v981_v47  ;;  %v2637_v54 = vrot.slane %v4098_v31, 9  ;;  %v1153_v47 = vrot.slane %v1151_v15, 4 }
 0x10a   : > { %v1152_v49 = vsel %vm3211_vm7, %v2637_v54, %v1151_v15  ;;  %v1155_v18 = vsel %vm3211_vm7, %v1153_v47, %v1154_v46  ;;  %v2808_v54 = vld [vmem:[%s2881_s30 + $0x94] sm:$0xf] }
 0x10b   : > { %v1591_v2 = vpop.f32.mrf.mxu0  ;;  %v1158_v47 = vrot.slane %v2808_v54, 5 }
 0x10c   : > { %v1435_v61 = vpop.f32.mrf.mxu3  ;;  %2653 = vmatmul.msk.bf16.gmra.mxu2 %vm691_vm4, %v3506_v13  ;;  %v985_v11 = vpop.f32.mrf.mxu1 }
 0x10d   : > { %v1511_v34 = vadd.f32 %v1435_v61, %v1377_v39  ;;  %v986_v51 = vadd.f32 %v985_v11, %v3419_v24  ;;  %v1208_v39 = vunpack.c.l.b16 %v1152_v49  ;;  %v1209_v61 = vunpack.c.l.b16 %v1155_v18 }
 0x10f   : > { %v1304_v60 = vpop.f32.mrf.mxu2  ;;  %v3517_v58 = vadd.f32 %v1591_v2, %v1511_v34  ;;  %v3532_v31 = vpack.c.b16 %v1209_v61, %v1208_v39 }
 0x110   : > { %v1378_v30 = vadd.f32 %v1304_v60, %v984_v17  ;;  %v4100_v17 = vld [vmem:[#allocation15_spill] sm:$0xff] }
 0x111   : > { %4099 = vst [vmem:[#allocation9_spill] sm:$0xff] %v3517_v58  ;;  %2674 = vmatmul.msk.bf16.gmra.mxu3 %vm691_vm4, %v3513_v50 }
 0x112   : > { %4102 = vst [vmem:[#allocation31_spill] sm:$0xff] %v3532_v31 }
 0x113   : > { %v1594_v28 = vpop.f32.mrf.mxu0 }
 0x114   : > { %v1438_v24 = vpop.f32.mrf.mxu3  ;;  %v988_v38 = vpop.f32.mrf.mxu1 }
 0x115   : > { %v1512_v11 = vadd.f32 %v1438_v24, %v1378_v30  ;;  %v989_v2 = vadd.f32 %v988_v38, %v3441_v7  ;;  %v2809_v30 = vld [vmem:[%s2881_s30 + $0x98] sm:$0x1]  ;;  %v3539_v38 = vld [vmem:[%s2881_s30 + $0x90] sm:$0xff] }
 0x116   : > { %2691 = vmatmul.msk.bf16.gmra.mxu0 %vm691_vm4, %v4100_v17  ;;  %v1161_v49 = vrot.slane %v2809_v30, 5  ;;  %4103 = vst [vmem:[#allocation32_spill] sm:$0xff] %v3539_v38 }
 0x117   : > { %v1306_v34 = vpop.f32.mrf.mxu2  ;;  %2621 = vmatmul.msk.bf16.gmra.mxu1 %vm691_vm4, %v3513_v50  ;;  %v3530_v15 = vadd.f32 %v1594_v28, %v1512_v11  ;;  %v2810_v28 = vld [vmem:[%s2881_s30 + $0x90] sm:$0xf] }
 0x118   : > { %v1379_v46 = vadd.f32 %v1306_v34, %v986_v51  ;;  %v2638_v11 = vrot.slane %v2810_v28, 9  ;;  %v1160_v51 = vrot.slane %v1158_v47, 4 }
 0x119   : > { %4101 = vst [vmem:[#allocation30_spill] sm:$0xff] %v3530_v15 }
 0x11a   : > { %v1159_v54 = vsel %vm3211_vm7, %v2638_v11, %v1158_v47  ;;  %v2811_v11 = vld [vmem:[%s2881_s30 + $0xa0] sm:$0xf] }
 0x11b   : > { %v1596_v60 = vpop.f32.mrf.mxu0 }
 0x11c   : > { %v1440_v7 = vpop.f32.mrf.mxu3  ;;  %2654 = vmatmul.msk.bf16.gmra.mxu2 %vm691_vm4, %v3532_v31  ;;  %v990_v18 = vpop.f32.mrf.mxu1  ;;  %v2813_v31 = vld [vmem:[%s2881_s30 + $0x9c] sm:$0xf] }
 0x11d   : > { %v1513_v24 = vadd.f32 %v1440_v7, %v1379_v46  ;;  %v991_v58 = vadd.f32 %v990_v18, %v3455_v5  ;;  %v1162_v46 = vsel %vm3211_vm7, %v1160_v51, %v1161_v49  ;;  %v1210_v18 = vunpack.c.l.b16 %v1159_v54 }
 0x11e   : > { %v1211_v28 = vunpack.c.l.b16 %v1162_v46  ;;  %v1165_v51 = vrot.slane %v2811_v11, 5  ;;  %v2812_v46 = vld [vmem:[%s2881_s30 + $0xa4] sm:$0x1] }
 0x11f   : > { %v1309_v39 = vpop.f32.mrf.mxu2  ;;  %v3543_v61 = vadd.f32 %v1596_v60, %v1513_v24  ;;  %v4105_v60 = vld [vmem:[#allocation3_spill] sm:$0xff] }
 0x120   : > { %v1380_v34 = vadd.f32 %v1309_v39, %v989_v2  ;;  %v3557_v49 = vpack.c.b16 %v1211_v28, %v1210_v18 }
 0x121   : > { %4104 = vst [vmem:[#allocation33_spill] sm:$0xff] %v3543_v61  ;;  %2675 = vmatmul.msk.bf16.gmra.mxu3 %vm691_vm4, %v3539_v38 }
 0x122   : > { %4107 = vst [vmem:[#allocation35_spill] sm:$0xff] %v3557_v49 }
 0x123   : > { %v1599_v30 = vpop.f32.mrf.mxu0 }
 0x124   : > { %v1443_v7 = vpop.f32.mrf.mxu3  ;;  %v993_v5 = vpop.f32.mrf.mxu1 }
 0x125   : > { %v1514_v15 = vadd.f32 %v1443_v7, %v1380_v34  ;;  %v1168_v7 = vrot.slane %v2812_v46, 5 }
 0x126   : > { %2692 = vmatmul.msk.bf16.gmra.mxu0 %vm691_vm4, %v4105_v60  ;;  %v3564_v60 = vld [vmem:[%s2881_s30 + $0x9c] sm:$0xff] }
 0x127   : > { %v1311_v2 = vpop.f32.mrf.mxu2  ;;  %2622 = vmatmul.msk.bf16.gmra.mxu1 %vm691_vm4, %v3539_v38  ;;  %v3555_v47 = vadd.f32 %v1599_v30, %v1514_v15  ;;  %4108 = vst [vmem:[#allocation36_spill] sm:$0xff] %v3564_v60  ;;  %v2639_v38 = vrot.slane %v2813_v31, 9  ;;  %v1167_v15 = vrot.slane %v1165_v51, 4 }
 0x128   : > { %v1381_v24 = vadd.f32 %v1311_v2, %v991_v58  ;;  %v994_v58 = vadd.f32 %v993_v5, %v3294_v22  ;;  %v4110_v5 = vld [vmem:[#allocation4_spill] sm:$0xff] }
 0x129   : > { %4106 = vst [vmem:[#allocation34_spill] sm:$0xff] %v3555_v47  ;;  %v1166_v2 = vsel %vm3211_vm7, %v2639_v38, %v1165_v51 }
 0x12a   : > { %v1212_v31 = vunpack.c.l.b16 %v1166_v2 }
 0x12b   : > { %v1601_v39 = vpop.f32.mrf.mxu0 }
 0x12c   : > { %v1445_v54 = vpop.f32.mrf.mxu3  ;;  %2655 = vmatmul.msk.bf16.gmra.mxu2 %vm691_vm4, %v3557_v49  ;;  %v995_v34 = vpop.f32.mrf.mxu1 }
 0x12d   : > { %v1515_v61 = vadd.f32 %v1445_v54, %v1381_v24  ;;  %v1169_v24 = vsel %vm3211_vm7, %v1167_v15, %v1168_v7  ;;  %v4113_v15 = vld [vmem:[#allocation6_spill] sm:$0xff] }
 0x12e   : > { %v1213_v47 = vunpack.c.l.b16 %v1169_v24  ;;  %v4114_v24 = vld [vmem:[#allocation7_spill] sm:$0xff] }
 0x12f   : > { %v1314_v30 = vpop.f32.mrf.mxu2  ;;  %v3568_v18 = vadd.f32 %v1601_v39, %v1515_v61  ;;  %v996_v61 = vadd.f32 %v995_v34, %v3309_v43  ;;  %v3590_v34 = vld [vmem:[%s2881_s30 + $0xa8] sm:$0xff] }
 0x130   : > { %v1382_v28 = vadd.f32 %v1314_v30, %v994_v58  ;;  %v3583_v7 = vpack.c.b16 %v1213_v47, %v1212_v31  ;;  %v1172_v58 = vrot.slane %v4113_v15, 5  ;;  %4115 = vst [vmem:[#allocation6_spill] sm:$0xff] %v3590_v34 }
 0x131   : > { %4109 = vst [vmem:[#allocation37_spill] sm:$0xff] %v3568_v18  ;;  %2676 = vmatmul.msk.bf16.gmra.mxu3 %vm691_vm4, %v3564_v60  ;;  %v4116_v18 = vld [vmem:[#allocation5_spill] sm:$0xff] }
 0x132   : > { %4112 = vst [vmem:[#allocation39_spill] sm:$0xff] %v3583_v7 }
 0x133   : > { %v1604_v11 = vpop.f32.mrf.mxu0 }
 0x134   : > { %v1448_v54 = vpop.f32.mrf.mxu3  ;;  %v998_v46 = vpop.f32.mrf.mxu1 }
 0x135   : > { %v1516_v22 = vadd.f32 %v1448_v54, %v1382_v28  ;;  %v1175_v54 = vrot.slane %v4114_v24, 5 }
 0x136   : > { %2693 = vmatmul.msk.bf16.gmra.mxu0 %vm691_vm4, %v4110_v5  ;;  %v2640_v5 = vrot.slane %v4116_v18, 9 }
 0x137   : > { %v1316_v39 = vpop.f32.mrf.mxu2  ;;  %2623 = vmatmul.msk.bf16.gmra.mxu1 %vm691_vm4, %v3564_v60  ;;  %v3581_v38 = vadd.f32 %v1604_v11, %v1516_v22  ;;  %v1174_v11 = vrot.slane %v1172_v58, 4  ;;  %v999_v22 = vadd.f32 %v998_v46, %v3329_v9 }
 0x138   : > { %v1383_v51 = vadd.f32 %v1316_v39, %v996_v61  ;;  %v1173_v39 = vsel %vm3211_vm7, %v2640_v5, %v1172_v58  ;;  %v3608_v5 = vld [vmem:[%s2881_s30 + $0xc0] sm:$0xf] }
 0x139   : > { %4111 = vst [vmem:[#allocation38_spill] sm:$0xff] %v3581_v38  ;;  %v1214_v24 = vunpack.c.l.b16 %v1173_v39  ;;  %v4118_v38 = vld [vmem:[#allocation10_spill] sm:$0xff]  ;;  %v1541_v39 = vshrl.u32 %v3608_v5, 16 }
 0x13a   : > { %4119 = vst [vmem:[#allocation5_spill] sm:$0xff] %v3608_v5 }
 0x13b   : > { %v1606_v30 = vpop.f32.mrf.mxu0 }
 0x13c   : > { %v1450_v2 = vpop.f32.mrf.mxu3  ;;  %2656 = vmatmul.msk.bf16.gmra.mxu2 %vm691_vm4, %v3583_v7  ;;  %v1000_v28 = vpop.f32.mrf.mxu1 }
 0x13d   : > { %v1517_v43 = vadd.f32 %v1450_v2, %v1383_v51  ;;  %v1176_v51 = vsel %vm3211_vm7, %v1174_v11, %v1175_v54 }
 0x13e   : > { %v1215_v9 = vunpack.c.l.b16 %v1176_v51 }
 0x13f   : > { %v1319_v47 = vpop.f32.mrf.mxu2  ;;  %v3594_v31 = vadd.f32 %v1606_v30, %v1517_v43  ;;  %v1001_v30 = vadd.f32 %v1000_v28, %v3347_v29  ;;  %v1544_v29 = vshll.u32 %v3608_v5, 16 }
 0x140   : > { %v1384_v61 = vadd.f32 %v1319_v47, %v999_v22  ;;  %v3612_v11 = vpack.c.b16 %v1215_v9, %v1214_v24  ;;  %v3615_v22 = vld [vmem:[%s2881_s30 + $0xc4] sm:$0xf]  ;;  %v4123_v47 = vld [vmem:[#allocation12_spill] sm:$0xff]  ;;  %v4124_v24 = vld [vmem:[#allocation13_spill] sm:$0xff] }
 0x141   : > { %4117 = vst [vmem:[#allocation7_spill] sm:$0xff] %v3594_v31  ;;  %2677 = vmatmul.msk.bf16.gmra.mxu3 %vm691_vm4, %v3590_v34  ;;  %v1550_v28 = vshll.u32 %v3615_v22, 16  ;;  %v1182_v9 = vrot.slane %v4124_v24, 5  ;;  %v1546_v7 = vrot.slane %v1544_v29, 5 }
 0x142   : > { %4121 = vst [vmem:[#allocation41_spill] sm:$0xff] %v3612_v11 }
 0x143   : > { %v1609_v15 = vpop.f32.mrf.mxu0  ;;  %4122 = vst [vmem:[#allocation42_spill] sm:$0xff] %v3615_v22 }
 0x144   : > { %v1453_v18 = vpop.f32.mrf.mxu3  ;;  %v1003_v2 = vpop.f32.mrf.mxu1 }
 0x145   : > { %v1518_v46 = vadd.f32 %v1453_v18, %v1384_v61  ;;  %v1179_v61 = vrot.slane %v4123_v47, 5  ;;  %v1554_v18 = vshrl.u32 %v3615_v22, 16  ;;  %v1004_v5 = vadd.f32 %v1003_v2, %v3367_v48 }
 0x146   : > { %2694 = vmatmul.msk.bf16.gmra.mxu0 %vm691_vm4, %v4118_v38  ;;  %v1543_v38 = vrot.slane %v1541_v39, 4  ;;  %v1552_v22 = vrot.slane %v1550_v28, 5 }
 0x147   : > { %v1321_v43 = vpop.f32.mrf.mxu2  ;;  %2624 = vmatmul.msk.bf16.gmra.mxu1 %vm691_vm4, %v3590_v34  ;;  %v3610_v58 = vadd.f32 %v1609_v15, %v1518_v46  ;;  %v1556_v60 = vrot.slane %v1554_v18, 4 }
 0x148   : > { %v1385_v54 = vadd.f32 %v1321_v43, %v1001_v30  ;;  %v3626_v30 = vld [vmem:[%s2881_s30 + $0xb4] sm:$0xff]  ;;  %v4125_v43 = vld [vmem:[#allocation11_spill] sm:$0xff]  ;;  %v1547_v2 = vor.u32 %v1546_v7, %v1543_v38 }
 0x149   : > { %4120 = vst [vmem:[#allocation40_spill] sm:$0xff] %v3610_v58  ;;  %v2641_v47 = vrot.slane %v4125_v43, 9  ;;  %v1181_v58 = vrot.slane %v1179_v61, 4  ;;  %v1557_v39 = vor.u32 %v1556_v60, %v1552_v22 }
 0x14b   : > { %v1611_v51 = vpop.f32.mrf.mxu0  ;;  %v1558_v38 = vrot.slane %v1557_v39, 4 }
 0x14c   : > { %v1455_v31 = vpop.f32.mrf.mxu3  ;;  %2657 = vmatmul.msk.bf16.gmra.mxu2 %vm691_vm4, %v3612_v11  ;;  %v1005_v15 = vpop.f32.mrf.mxu1  ;;  %v3633_v11 = vld [vmem:[%s2881_s30 + $0xc8] sm:$0x1] }
 0x14d   : > { %v1519_v46 = vadd.f32 %v1455_v31, %v1385_v54  ;;  %v1180_v31 = vsel %vm3211_vm7, %v2641_v47, %v1179_v61  ;;  %v1183_v54 = vsel %vm3211_vm7, %v1181_v58, %v1182_v9  ;;  %v1560_v29 = vshll.u32 %v3633_v11, 16 }
 0x14e   : > { %v1216_v18 = vunpack.c.l.b16 %v1180_v31  ;;  %v1006_v24 = vadd.f32 %v1005_v15, %v3388_v63  ;;  %v1548_v58 = vrot.slane %v1547_v2, 4 }
 0x14f   : > { %v1324_v34 = vpop.f32.mrf.mxu2  ;;  %v3630_v49 = vadd.f32 %v1611_v51, %v1519_v46  ;;  %v1562_v60 = vrot.slane %v1560_v29, 5 }
 0x150   : > { %v1386_v17 = vadd.f32 %v1324_v34, %v1004_v5  ;;  %v1217_v34 = vunpack.c.l.b16 %v1183_v54  ;;  %v3658_v54 = vld [vmem:[%s2881_s30 + $0xc0] sm:$0xff] }
 0x151   : > { %2678 = vmatmul.msk.bf16.gmra.mxu3 %vm691_vm4, %v3626_v30  ;;  %v1563_v63 = vsel %vm2908_vm3, %v1558_v38, %v1562_v60 }
 0x152   : > { %v3649_v46 = vpack.c.b16 %v1217_v34, %v1216_v18  ;;  %v1567_v39 = vunpack.c.l.b16 %v1563_v63 }
 0x153   : > { %v1614_v48 = vpop.f32.mrf.mxu0 }
 0x154   : > { %v1458_v28 = vpop.f32.mrf.mxu3  ;;  %v1008_v51 = vpop.f32.mrf.mxu1 }
 0x155   : > { %v1520_v5 = vadd.f32 %v1458_v28, %v1386_v17  ;;  %v1553_v17 = vsel %vm2908_vm3, %v1548_v58, %v1552_v22 }
 0x156   : > { %2695 = vmatmul.msk.bf16.gmra.mxu0 %vm691_vm4, %v3220_v53  ;;  %v1566_v2 = vunpack.c.l.b16 %v1553_v17 }
 0x157   : > { %v1326_v61 = vpop.f32.mrf.mxu2  ;;  %2625 = vmatmul.msk.bf16.gmra.mxu1 %vm691_vm4, %v3626_v30  ;;  %v3647_v7 = vadd.f32 %v1614_v48, %v1520_v5  ;;  %v1009_v48 = vadd.f32 %v1008_v51, %v3409_v26 }
 0x158   : > { %v1387_v9 = vadd.f32 %v1326_v61, %v1006_v24  ;;  %v3665_v22 = vpack.c.b16 %v1567_v39, %v1566_v2 }
 0x15b   : > { %v1616_v43 = vpop.f32.mrf.mxu0 }
 0x15c   : > { %v1460_v15 = vpop.f32.mrf.mxu3  ;;  %2658 = vmatmul.msk.bf16.gmra.mxu2 %vm691_vm4, %v3649_v46  ;;  %v1010_v47 = vpop.f32.mrf.mxu1 }
 0x15d   : > { %v1521_v31 = vadd.f32 %v1460_v15, %v1387_v9  ;;  %v1011_v26 = vadd.f32 %v1010_v47, %v3426_v0 }
 0x15f   : > { %v1329_v29 = vpop.f32.mrf.mxu2  ;;  %v3661_v28 = vadd.f32 %v1616_v43, %v1521_v31 }
 0x160   : > { %v1388_v18 = vadd.f32 %v1329_v29, %v1009_v48 }
 0x161   : > { %2679 = vmatmul.msk.bf16.gmra.mxu3 %vm691_vm4, %v3658_v54 }
 0x163   : > { %v1619_v34 = vpop.f32.mrf.mxu0 }
 0x164   : > { %v1463_v5 = vpop.f32.mrf.mxu3  ;;  %v1013_v24 = vpop.f32.mrf.mxu1 }
 0x165   : > { %v1522_v61 = vadd.f32 %v1463_v5, %v1388_v18  ;;  %v1014_v63 = vadd.f32 %v1013_v24, %v3311_v16 }
 0x166   : > { %2696 = vmatmul.msk.bf16.gmra.mxu0 %vm691_vm4, %v3665_v22 }
 0x167   : > { %v1331_v51 = vpop.f32.mrf.mxu2  ;;  %2699 = vmatmul.msk.bf16.vlgmr.msra.gmra.mxu1 %vm691_vm4, %v3245_v55  ;;  %v3672_v58 = vadd.f32 %v1619_v34, %v1522_v61 }
 0x168   : > { %v1389_v38 = vadd.f32 %v1331_v51, %v1011_v26 }
 0x16b   : > { %v1621_v60 = vpop.f32.mrf.mxu0 }
 0x16c   : > { %v1465_v9 = vpop.f32.mrf.mxu3  ;;  %2720 = vmatmul.msk.bf16.vlgmr.msra.gmra.mxu2 %vm691_vm4, %v3257_v6  ;;  %v1015_v43 = vpop.f32.mrf.mxu1 }
 0x16d   : > { %v1523_v17 = vadd.f32 %v1465_v9, %v1389_v38  ;;  %v1016_v6 = vadd.f32 %v1015_v43, %v3333_v57 }
 0x16f   : > { %v1334_v15 = vpop.f32.mrf.mxu2  ;;  %v3677_v31 = vadd.f32 %v1621_v60, %v1523_v17 }
 0x170   : > { %v1390_v0 = vadd.f32 %v1334_v15, %v1014_v63 }
 0x171   : > { %2737 = vmatmul.msk.bf16.vlgmr.msra.gmra.mxu3 %vm691_vm4, %v3148_v45 }
 0x173   : > { %v1624_v55 = vpop.f32.mrf.mxu0 }
 0x174   : > { %v1468_v47 = vpop.f32.mrf.mxu3  ;;  %v1018_v48 = vpop.f32.mrf.mxu1 }
 0x175   : > { %v1524_v2 = vadd.f32 %v1468_v47, %v1390_v0  ;;  %v1019_v24 = vadd.f32 %v1018_v48, %v3353_v59 }
 0x176   : > { %2755 = vmatmul.msk.bf16.vlgmr.msra.gmra.mxu0 %vm691_vm4, %v3271_v52 }
 0x177   : > { %v1336_v39 = vpop.f32.mrf.mxu2  ;;  %2700 = vmatmul.msk.bf16.gmra.mxu1 %vm691_vm4, %v3271_v52  ;;  %v3686_v16 = vadd.f32 %v1624_v55, %v1524_v2 }
 0x178   : > { %v1391_v29 = vadd.f32 %v1336_v39, %v1016_v6 }
 0x17b   : > { %v1626_v18 = vpop.f32.mrf.mxu0 }
 0x17c   : > { %v1470_v34 = vpop.f32.mrf.mxu3  ;;  %2721 = vmatmul.msk.bf16.gmra.mxu2 %vm691_vm4, %v3277_v41  ;;  %v1020_v45 = vpop.f32.mrf.mxu1 }
 0x17d   : > { %v1525_v5 = vadd.f32 %v1470_v34, %v1391_v29  ;;  %v1021_v41 = vadd.f32 %v1020_v45, %v3371_v3 }
 0x17f   : > { %v1339_v61 = vpop.f32.mrf.mxu2  ;;  %v3691_v26 = vadd.f32 %v1626_v18, %v1525_v5 }
 0x180   : > { %v1392_v57 = vadd.f32 %v1339_v61, %v1019_v24 }
 0x181   : > { %2738 = vmatmul.msk.bf16.gmra.mxu3 %vm691_vm4, %v3238_v20 }
 0x183   : > { %v1629_v52 = vpop.f32.mrf.mxu0 }
 0x184   : > { %v1473_v51 = vpop.f32.mrf.mxu3  ;;  %v1023_v38 = vpop.f32.mrf.mxu1 }
 0x185   : > { %v1526_v60 = vadd.f32 %v1473_v51, %v1392_v57  ;;  %v1024_v0 = vadd.f32 %v1023_v38, %v3390_v23 }
 0x186   : > { %2756 = vmatmul.msk.bf16.gmra.mxu0 %vm691_vm4, %v3291_v40 }
 0x187   : > { %v1341_v9 = vpop.f32.mrf.mxu2  ;;  %2701 = vmatmul.msk.bf16.gmra.mxu1 %vm691_vm4, %v3291_v40  ;;  %v3700_v59 = vadd.f32 %v1629_v52, %v1526_v60 }
 0x188   : > { %v1393_v43 = vadd.f32 %v1341_v9, %v1021_v41 }
 0x18b   : > { %v1631_v17 = vpop.f32.mrf.mxu0 }
 0x18c   : > { %v1475_v63 = vpop.f32.mrf.mxu3  ;;  %2722 = vmatmul.msk.bf16.gmra.mxu2 %vm691_vm4, %v3299_v8  ;;  %v1025_v20 = vpop.f32.mrf.mxu1 }
 0x18d   : > { %v1527_v15 = vadd.f32 %v1475_v63, %v1393_v43  ;;  %v1026_v8 = vadd.f32 %v1025_v20, %v3411_v1  ;;  %v4126_v43 = vld [vmem:[#allocation18_spill] sm:$0xff]  ;;  %v4127_v63 = vld [vmem:[#allocation16_spill] sm:$0xff] }
 0x18f   : > { %v1344_v55 = vpop.f32.mrf.mxu2  ;;  %v3705_v47 = vadd.f32 %v1631_v17, %v1527_v15 }
 0x190   : > { %v1394_v3 = vadd.f32 %v1344_v55, %v1024_v0  ;;  %v4128_v55 = vld [vmem:[#allocation8_spill] sm:$0xff] }
 0x191   : > { %2739 = vmatmul.msk.bf16.gmra.mxu3 %vm691_vm4, %v2920_v62 }
 0x193   : > { %v1634_v40 = vpop.f32.mrf.mxu0 }
 0x194   : > { %v1478_v48 = vpop.f32.mrf.mxu3  ;;  %v1028_v2 = vpop.f32.mrf.mxu1 }
 0x195   : > { %v1528_v6 = vadd.f32 %v1478_v48, %v1394_v3  ;;  %v1029_v5 = vadd.f32 %v1028_v2, %v3433_v56  ;;  %v4129_v2 = vld [vmem:[#allocation21_spill] sm:$0xff] }
 0x196   : > { %2757 = vmatmul.msk.bf16.gmra.mxu0 %vm691_vm4, %v3319_v12 }
 0x197   : > { %v1346_v39 = vpop.f32.mrf.mxu2  ;;  %2702 = vmatmul.msk.bf16.gmra.mxu1 %vm691_vm4, %v3319_v12  ;;  %v3714_v23 = vadd.f32 %v1634_v40, %v1528_v6  ;;  %v4130_v6 = vld [vmem:[#allocation17_spill] sm:$0xff] }
 0x198   : > { %v1395_v29 = vadd.f32 %v1346_v39, %v1026_v8 }
 0x19b   : > { %v1636_v18 = vpop.f32.mrf.mxu0 }
 0x19c   : > { %v1480_v34 = vpop.f32.mrf.mxu3  ;;  %2723 = vmatmul.msk.bf16.gmra.mxu2 %vm691_vm4, %v3327_v27  ;;  %v1030_v62 = vpop.f32.mrf.mxu1 }
 0x19d   : > { %v1529_v45 = vadd.f32 %v1480_v34, %v1395_v29  ;;  %v1031_v27 = vadd.f32 %v1030_v62, %v3448_v44 }
 0x19f   : > { %v1349_v24 = vpop.f32.mrf.mxu2  ;;  %v3719_v61 = vadd.f32 %v1636_v18, %v1529_v45  ;;  %v4131_v45 = vld [vmem:[#allocation22_spill] sm:$0xff] }
 0x1a0   : > { %v1396_v1 = vadd.f32 %v1349_v24, %v1029_v5 }
 0x1a1   : > { %2740 = vmatmul.msk.bf16.gmra.mxu3 %vm691_vm4, %v2994_v37 }
 0x1a3   : > { %v1639_v12 = vpop.f32.mrf.mxu0 }
 0x1a4   : > { %v1483_v57 = vpop.f32.mrf.mxu3  ;;  %v1033_v52 = vpop.f32.mrf.mxu1 }
 0x1a5   : > { %v1530_v51 = vadd.f32 %v1483_v57, %v1396_v1  ;;  %v1034_v20 = vadd.f32 %v1033_v52, %v4127_v63  ;;  %v4132_v1 = vld [vmem:[#allocation19_spill] sm:$0xff] }
 0x1a6   : > { %2758 = vmatmul.msk.bf16.gmra.mxu0 %vm691_vm4, %v3351_v33 }
 0x1a7   : > { %v1351_v38 = vpop.f32.mrf.mxu2  ;;  %2703 = vmatmul.msk.bf16.gmra.mxu1 %vm691_vm4, %v3351_v33  ;;  %v3728_v56 = vadd.f32 %v1639_v12, %v1530_v51 }
 0x1a8   : > { %v1397_v60 = vadd.f32 %v1351_v38, %v1031_v27  ;;  %v4133_v27 = vld [vmem:[#allocation14_spill] sm:$0xff] }
 0x1ab   : > { %v1641_v41 = vpop.f32.mrf.mxu0 }
 0x1ac   : > { %v1485_v9 = vpop.f32.mrf.mxu3  ;;  %2724 = vmatmul.msk.bf16.gmra.mxu2 %vm691_vm4, %v4126_v43  ;;  %v1035_v37 = vpop.f32.mrf.mxu1  ;;  %v4134_v43 = vld [vmem:[#allocation24_spill] sm:$0xff] }
 0x1ad   : > { %v1531_v17 = vadd.f32 %v1485_v9, %v1397_v60  ;;  %v1036_v8 = vadd.f32 %v1035_v37, %v4130_v6  ;;  %v4135_v37 = vld [vmem:[#allocation20_spill] sm:$0xff] }
 0x1af   : > { %v1354_v15 = vpop.f32.mrf.mxu2  ;;  %v3733_v0 = vadd.f32 %v1641_v41, %v1531_v17 }
 0x1b0   : > { %v1398_v44 = vadd.f32 %v1354_v15, %v1034_v20 }
 0x1b1   : > { %2741 = vmatmul.msk.bf16.gmra.mxu3 %vm691_vm4, %v4128_v55 }
 0x1b3   : > { %v1644_v33 = vpop.f32.mrf.mxu0 }
 0x1b4   : > { %v1488_v3 = vpop.f32.mrf.mxu3  ;;  %v1038_v40 = vpop.f32.mrf.mxu1 }
 0x1b5   : > { %v1532_v48 = vadd.f32 %v1488_v3, %v1398_v44  ;;  %v1039_v12 = vadd.f32 %v1038_v40, %v4132_v1  ;;  %v4140_v1 = vld [vmem:[#allocation25_spill] sm:$0xff] }
 0x1b6   : > { %2759 = vmatmul.msk.bf16.gmra.mxu0 %vm691_vm4, %v4129_v2 }
 0x1b7   : > { %v1356_v39 = vpop.f32.mrf.mxu2  ;;  %2704 = vmatmul.msk.bf16.gmra.mxu1 %vm691_vm4, %v4129_v2  ;;  %v3742_v29 = vadd.f32 %v1644_v33, %v1532_v48  ;;  %v4136_v33 = vld [vmem:[#allocation26_spill] sm:$0xff]  ;;  %v4137_v48 = vld [vmem:[#allocation23_spill] sm:$0xff] }
 0x1b8   : > { %v1399_v18 = vadd.f32 %v1356_v39, %v1036_v8 }
 0x1bb   : > { %v1646_v34 = vpop.f32.mrf.mxu0 }
 0x1bc   : > { %v1490_v62 = vpop.f32.mrf.mxu3  ;;  %2725 = vmatmul.msk.bf16.gmra.mxu2 %vm691_vm4, %v4131_v45  ;;  %v1040_v5 = vpop.f32.mrf.mxu1 }
 0x1bd   : > { %v1533_v24 = vadd.f32 %v1490_v62, %v1399_v18  ;;  %v1041_v17 = vadd.f32 %v1040_v5, %v4135_v37  ;;  %v4138_v18 = vld [vmem:[#allocation2_spill] sm:$0xff] }
 0x1bf   : > { %v1359_v57 = vpop.f32.mrf.mxu2  ;;  %v3747_v52 = vadd.f32 %v1646_v34, %v1533_v24  ;;  %v4139_v24 = vld [vmem:[#allocation28_spill] sm:$0xff] }
 0x1c0   : > { %v1400_v51 = vadd.f32 %v1359_v57, %v1039_v12 }
 0x1c1   : > { %2742 = vmatmul.msk.bf16.gmra.mxu3 %vm691_vm4, %v4133_v27 }
 0x1c3   : > { %v1649_v38 = vpop.f32.mrf.mxu0 }
 0x1c4   : > { %v1493_v60 = vpop.f32.mrf.mxu3  ;;  %v1043_v41 = vpop.f32.mrf.mxu1 }
 0x1c5   : > { %v1534_v9 = vadd.f32 %v1493_v60, %v1400_v51  ;;  %v1044_v2 = vadd.f32 %v1043_v41, %v4137_v48 }
 0x1c6   : > { %2760 = vmatmul.msk.bf16.gmra.mxu0 %vm691_vm4, %v4134_v43 }
 0x1c7   : > { %v1361_v63 = vpop.f32.mrf.mxu2  ;;  %2705 = vmatmul.msk.bf16.gmra.mxu1 %vm691_vm4, %v4134_v43  ;;  %v3756_v20 = vadd.f32 %v1649_v38, %v1534_v9  ;;  %v4141_v43 = vld [vmem:[#allocation27_spill] sm:$0xff] }
 0x1c8   : > { %v1401_v15 = vadd.f32 %v1361_v63, %v1041_v17 }
 0x1cb   : > { %v1651_v44 = vpop.f32.mrf.mxu0 }
 0x1cc   : > { %v1495_v55 = vpop.f32.mrf.mxu3  ;;  %2726 = vmatmul.msk.bf16.gmra.mxu2 %vm691_vm4, %v4136_v33  ;;  %v1045_v3 = vpop.f32.mrf.mxu1 }
 0x1cd   : > { %v1535_v40 = vadd.f32 %v1495_v55, %v1401_v15  ;;  %v1046_v12 = vadd.f32 %v1045_v3, %v4140_v1 }
 0x1cf   : > { %v1364_v6 = vpop.f32.mrf.mxu2  ;;  %v3761_v8 = vadd.f32 %v1651_v44, %v1535_v40  ;;  %v4142_v40 = vld [vmem:[#allocation29_spill] sm:$0xff] }
 0x1d0   : > { %v1402_v39 = vadd.f32 %v1364_v6, %v1044_v2 }
 0x1d1   : > { %2743 = vmatmul.msk.bf16.gmra.mxu3 %vm691_vm4, %v4138_v18 }
 0x1d3   : > { %v1654_v34 = vpop.f32.mrf.mxu0 }
 0x1d4   : > { %v1498_v62 = vpop.f32.mrf.mxu3  ;;  %v1048_v45 = vpop.f32.mrf.mxu1 }
 0x1d5   : > { %v1536_v5 = vadd.f32 %v1498_v62, %v1402_v39  ;;  %v1049_v37 = vadd.f32 %v1048_v45, %v4141_v43 }
 0x1d6   : > { %2761 = vmatmul.msk.bf16.gmra.mxu0 %vm691_vm4, %v4139_v24 }
 0x1d7   : > { %v1366_v57 = vpop.f32.mrf.mxu2  ;;  %2706 = vmatmul.msk.bf16.gmra.mxu1 %vm691_vm4, %v4139_v24  ;;  %v3770_v51 = vadd.f32 %v1654_v34, %v1536_v5 }
 0x1d8   : > { %v1403_v27 = vadd.f32 %v1366_v57, %v1046_v12 }
 0x1db   : > { %v1656_v38 = vpop.f32.mrf.mxu0 }
 0x1dc   : > { %v1500_v60 = vpop.f32.mrf.mxu3  ;;  %2727 = vmatmul.msk.bf16.gmra.mxu2 %vm691_vm4, %v3463_v19  ;;  %v1050_v41 = vpop.f32.mrf.mxu1 }
 0x1dd   : > { %v1537_v9 = vadd.f32 %v1500_v60, %v1403_v27  ;;  %v1051_v19 = vadd.f32 %v1050_v41, %v4142_v40  ;;  %v3803_v27 = vld [vmem:[%s4024_s3] ss:$0 sm:$0xff]  ;;  %v4143_v40 = vld [vmem:[#allocation15_spill] sm:$0xff] }
 0x1df   : > { %v1369_v17 = vpop.f32.mrf.mxu2  ;;  %v3775_v63 = vadd.f32 %v1656_v38, %v1537_v9 }
 0x1e0   : > { %v1404_v15 = vadd.f32 %v1369_v17, %v1049_v37 }
 0x1e1   : > { %2744 = vmatmul.msk.bf16.gmra.mxu3 %vm691_vm4, %v3019_v4 }
 0x1e3   : > { %v1659_v44 = vpop.f32.mrf.mxu0 }
 0x1e4   : > { %v1503_v55 = vpop.f32.mrf.mxu3  ;;  %v1724_v33 = vpop.f32.mrf.mxu1 }
 0x1e5   : > { %v1538_v3 = vadd.f32 %v1503_v55, %v1404_v15  ;;  %v1804_v62 = vadd.f32 %v1724_v33, %v3478_v32 }
 0x1e6   : > { %2762 = vmatmul.msk.bf16.gmra.mxu0 %vm691_vm4, %v3480_v10 }
 0x1e7   : > { %v1371_v48 = vpop.f32.mrf.mxu2  ;;  %2707 = vmatmul.msk.bf16.gmra.mxu1 %vm691_vm4, %v3480_v10  ;;  %v3784_v2 = vadd.f32 %v1659_v44, %v1538_v3 }
 0x1e8   : > { %v1405_v6 = vadd.f32 %v1371_v48, %v1051_v19 }
 0x1eb   : > { %v1661_v39 = vpop.f32.mrf.mxu0 }
 0x1ec   : > { %v1505_v18 = vpop.f32.mrf.mxu3  ;;  %2728 = vmatmul.msk.bf16.gmra.mxu2 %vm691_vm4, %v3487_v42  ;;  %v1726_v4 = vpop.f32.mrf.mxu1  ;;  %v3796_v42 = vld [vmem:[%s4023_s2] ss:$0 sm:$0xff] }
 0x1ed   : > { %v1539_v34 = vadd.f32 %v1505_v18, %v1405_v6 }
 0x1ef   : > { %v1858_v45 = vpop.f32.mrf.mxu2  ;;  %v3789_v5 = vadd.f32 %v1661_v39, %v1539_v34  ;;  %v4144_v34 = vld [vmem:[#allocation31_spill] sm:$0xff] }
 0x1f0   : > { %v1938_v10 = vadd.f32 %v1858_v45, %v1804_v62  ;;  %v4145_v45 = vld [vmem:[#allocation9_spill] sm:$0xff] }
 0x1f1   : > { %2745 = vmatmul.msk.bf16.gmra.mxu3 %vm691_vm4, %v3104_v25  ;;  %v1805_v25 = vadd.f32 %v1726_v4, %v3491_v35 }
 0x1f3   : > { %v2154_v24 = vpop.f32.mrf.mxu0 }
 0x1f4   : > { %v2014_v1 = vpop.f32.mrf.mxu3  ;;  %v1729_v12 = vpop.f32.mrf.mxu1 }
 0x1f5   : > { %v2094_v57 = vadd.f32 %v2014_v1, %v1938_v10  ;;  %v1806_v55 = vadd.f32 %v1729_v12, %v3504_v21 }
 0x1f6   : > { %2763 = vmatmul.msk.bf16.gmra.mxu0 %vm691_vm4, %v3506_v13 }
 0x1f7   : > { %v2234_v32 = vadd.f32 %v2154_v24, %v2094_v57  ;;  %v1860_v38 = vpop.f32.mrf.mxu2  ;;  %2708 = vmatmul.msk.bf16.gmra.mxu1 %vm691_vm4, %v3506_v13 }
 0x1f8   : > { %v1939_v41 = vadd.f32 %v1860_v38, %v1805_v25  ;;  %v4146_v38 = vld [vmem:[#allocation32_spill] sm:$0xff] }
 0x1f9   : > { %v2270_v60 = vmul.f32 %v3796_v42, %v2234_v32 }
 0x1fb   : > { %v2306_v9 = vadd.f32 %v3803_v27, %v2270_v60  ;;  %v2156_v43 = vpop.f32.mrf.mxu0 }
 0x1fc   : > { %v2016_v37 = vpop.f32.mrf.mxu3  ;;  %2729 = vmatmul.msk.bf16.gmra.mxu2 %vm691_vm4, %v3513_v50  ;;  %v1731_v17 = vpop.f32.mrf.mxu1 }
 0x1fd   : > { %vm2338_vm8 = vcmp.gt.f32.partialorder %v2306_v9, 0.0  ;;  %v2370_v35 = vmul.f32 0.01, %v2306_v9  ;;  %v2095_v13 = vadd.f32 %v2016_v37, %v1939_v41  ;;  %v1807_v10 = vadd.f32 %v1731_v17, %v4145_v45  ;;  %v4147_v17 = vld [vmem:[#allocation30_spill] sm:$0xff] }
 0x1ff   : > { %v2402_v15 = vsel %vm2338_vm8, %v2306_v9, %v2370_v35  ;;  %v2235_v44 = vadd.f32 %v2156_v43, %v2095_v13  ;;  %v1863_v33 = vpop.f32.mrf.mxu2 }
 0x200   : > { %2434 = vst [vmem:[%s3816_s22] sm:$0xff] %v2402_v15  ;;  %v1940_v50 = vadd.f32 %v1863_v33, %v1806_v55 }
 0x201   : > { %v2271_v3 = vmul.f32 %v3796_v42, %v2235_v44  ;;  %2746 = vmatmul.msk.bf16.gmra.mxu3 %vm691_vm4, %v4143_v40  ;;  %v4148_v44 = vld [vmem:[#allocation3_spill] sm:$0xff] }
 0x203   : > { %v2307_v19 = vadd.f32 %v3803_v27, %v2271_v3  ;;  %v2159_v48 = vpop.f32.mrf.mxu0 }
 0x204   : > { %v2019_v6 = vpop.f32.mrf.mxu3  ;;  %v1734_v39 = vpop.f32.mrf.mxu1 }
 0x205   : > { %vm2339_vm9 = vcmp.gt.f32.partialorder %v2307_v19, 0.0  ;;  %v2371_v18 = vmul.f32 0.01, %v2307_v19  ;;  %v2096_v4 = vadd.f32 %v2019_v6, %v1940_v50  ;;  %v1808_v35 = vadd.f32 %v1734_v39, %v4147_v17  ;;  %v4149_v6 = vld [vmem:[#allocation35_spill] sm:$0xff]  ;;  %v4153_v17 = vld [vmem:[#allocation4_spill] sm:$0xff] }
 0x206   : > { %2764 = vmatmul.msk.bf16.gmra.mxu0 %vm691_vm4, %v4144_v34 }
 0x207   : > { %v2403_v21 = vsel %vm2339_vm9, %v2307_v19, %v2371_v18  ;;  %v2236_v62 = vadd.f32 %v2159_v48, %v2096_v4  ;;  %v1865_v24 = vpop.f32.mrf.mxu2  ;;  %2709 = vmatmul.msk.bf16.gmra.mxu1 %vm691_vm4, %v4144_v34  ;;  %v4150_v4 = vld [vmem:[#allocation33_spill] sm:$0xff] }
 0x208   : > { %2435 = vst [vmem:[%s3816_s22 + $0x8] sm:$0xff] %v2403_v21  ;;  %v1941_v12 = vadd.f32 %v1865_v24, %v1807_v10 }
 0x209   : > { %v2272_v1 = vmul.f32 %v3796_v42, %v2236_v62 }
 0x20b   : > { %v2308_v57 = vadd.f32 %v3803_v27, %v2272_v1  ;;  %v2161_v32 = vpop.f32.mrf.mxu0 }
 0x20c   : > { %v2021_v25 = vpop.f32.mrf.mxu3  ;;  %2730 = vmatmul.msk.bf16.gmra.mxu2 %vm691_vm4, %v4146_v38  ;;  %v1736_v60 = vpop.f32.mrf.mxu1 }
 0x20d   : > { %vm2340_vm10 = vcmp.gt.f32.partialorder %v2308_v57, 0.0  ;;  %v2372_v41 = vmul.f32 0.01, %v2308_v57  ;;  %v2097_v9 = vadd.f32 %v2021_v25, %v1941_v12  ;;  %v1809_v34 = vadd.f32 %v1736_v60, %v4150_v4  ;;  %v4151_v12 = vld [vmem:[#allocation36_spill] sm:$0xff] }
 0x20f   : > { %v2404_v43 = vsel %vm2340_vm10, %v2308_v57, %v2372_v41  ;;  %v2237_v37 = vadd.f32 %v2161_v32, %v2097_v9  ;;  %v1868_v13 = vpop.f32.mrf.mxu2  ;;  %v4152_v41 = vld [vmem:[#allocation34_spill] sm:$0xff] }
 0x210   : > { %2436 = vst [vmem:[%s3816_s22 + $0x10] sm:$0xff] %v2404_v43  ;;  %v1942_v55 = vadd.f32 %v1868_v13, %v1808_v35 }
 0x211   : > { %v2273_v15 = vmul.f32 %v3796_v42, %v2237_v37  ;;  %2747 = vmatmul.msk.bf16.gmra.mxu3 %vm691_vm4, %v4148_v44 }
 0x213   : > { %v2309_v33 = vadd.f32 %v3803_v27, %v2273_v15  ;;  %v2164_v3 = vpop.f32.mrf.mxu0 }
 0x214   : > { %v2024_v40 = vpop.f32.mrf.mxu3  ;;  %v1739_v50 = vpop.f32.mrf.mxu1 }
 0x215   : > { %vm2341_vm11 = vcmp.gt.f32.partialorder %v2309_v33, 0.0  ;;  %v2373_v19 = vmul.f32 0.01, %v2309_v33  ;;  %v2098_v48 = vadd.f32 %v2024_v40, %v1942_v55  ;;  %v1810_v9 = vadd.f32 %v1739_v50, %v4152_v41  ;;  %v4154_v40 = vld [vmem:[#allocation39_spill] sm:$0xff]  ;;  %v4158_v41 = vld [vmem:[#allocation10_spill] sm:$0xff] }
 0x216   : > { %2765 = vmatmul.msk.bf16.gmra.mxu0 %vm691_vm4, %v4149_v6 }
 0x217   : > { %v2405_v39 = vsel %vm2341_vm11, %v2309_v33, %v2373_v19  ;;  %v2238_v18 = vadd.f32 %v2164_v3, %v2098_v48  ;;  %v1870_v21 = vpop.f32.mrf.mxu2  ;;  %2710 = vmatmul.msk.bf16.gmra.mxu1 %vm691_vm4, %v4149_v6  ;;  %v4155_v48 = vld [vmem:[#allocation37_spill] sm:$0xff] }
 0x218   : > { %2437 = vst [vmem:[%s3816_s22 + $0x18] sm:$0xff] %v2405_v39  ;;  %v1943_v45 = vadd.f32 %v1870_v21, %v1809_v34 }
 0x219   : > { %v2274_v62 = vmul.f32 %v3796_v42, %v2238_v18 }
 0x21b   : > { %v2310_v10 = vadd.f32 %v3803_v27, %v2274_v62  ;;  %v2166_v24 = vpop.f32.mrf.mxu0 }
 0x21c   : > { %v2026_v1 = vpop.f32.mrf.mxu3  ;;  %2731 = vmatmul.msk.bf16.gmra.mxu2 %vm691_vm4, %v4151_v12  ;;  %v1741_v57 = vpop.f32.mrf.mxu1 }
 0x21d   : > { %vm2342_vm12 = vcmp.gt.f32.partialorder %v2310_v10, 0.0  ;;  %v2374_v32 = vmul.f32 0.01, %v2310_v10  ;;  %v2099_v25 = vadd.f32 %v2026_v1, %v1943_v45  ;;  %v1811_v6 = vadd.f32 %v1741_v57, %v4155_v48  ;;  %v4156_v45 = vld [vmem:[#allocation6_spill] sm:$0xff] }
 0x21f   : > { %v2406_v38 = vsel %vm2342_vm12, %v2310_v10, %v2374_v32  ;;  %v2239_v60 = vadd.f32 %v2166_v24, %v2099_v25  ;;  %v1873_v43 = vpop.f32.mrf.mxu2  ;;  %v4157_v32 = vld [vmem:[#allocation38_spill] sm:$0xff] }
 0x220   : > { %2438 = vst [vmem:[%s3816_s22 + $0x20] sm:$0xff] %v2406_v38  ;;  %v1944_v35 = vadd.f32 %v1873_v43, %v1810_v9 }
 0x221   : > { %v2275_v37 = vmul.f32 %v3796_v42, %v2239_v60  ;;  %2748 = vmatmul.msk.bf16.gmra.mxu3 %vm691_vm4, %v4153_v17 }
 0x223   : > { %v2311_v13 = vadd.f32 %v3803_v27, %v2275_v37  ;;  %v2169_v15 = vpop.f32.mrf.mxu0 }
 0x224   : > { %v2029_v44 = vpop.f32.mrf.mxu3  ;;  %v1744_v55 = vpop.f32.mrf.mxu1 }
 0x225   : > { %vm2343_vm13 = vcmp.gt.f32.partialorder %v2311_v13, 0.0  ;;  %v2375_v33 = vmul.f32 0.01, %v2311_v13  ;;  %v2100_v3 = vadd.f32 %v2029_v44, %v1944_v35  ;;  %v1812_v25 = vadd.f32 %v1744_v55, %v4157_v32  ;;  %v4159_v44 = vld [vmem:[#allocation41_spill] sm:$0xff] }
 0x226   : > { %2766 = vmatmul.msk.bf16.gmra.mxu0 %vm691_vm4, %v4154_v40 }
 0x227   : > { %v2407_v50 = vsel %vm2343_vm13, %v2311_v13, %v2375_v33  ;;  %v2240_v19 = vadd.f32 %v2169_v15, %v2100_v3  ;;  %v1875_v39 = vpop.f32.mrf.mxu2  ;;  %2711 = vmatmul.msk.bf16.gmra.mxu1 %vm691_vm4, %v4154_v40  ;;  %v4160_v3 = vld [vmem:[#allocation7_spill] sm:$0xff] }
 0x228   : > { %2439 = vst [vmem:[%s3816_s22 + $0x28] sm:$0xff] %v2407_v50  ;;  %v1945_v4 = vadd.f32 %v1875_v39, %v1811_v6 }
 0x229   : > { %v2276_v18 = vmul.f32 %v3796_v42, %v2240_v19 }
 0x22b   : > { %v2312_v34 = vadd.f32 %v3803_v27, %v2276_v18  ;;  %v2171_v21 = vpop.f32.mrf.mxu0 }
 0x22c   : > { %v2031_v62 = vpop.f32.mrf.mxu3  ;;  %2732 = vmatmul.msk.bf16.gmra.mxu2 %vm691_vm4, %v4156_v45  ;;  %v1746_v10 = vpop.f32.mrf.mxu1 }
 0x22d   : > { %vm2344_vm14 = vcmp.gt.f32.partialorder %v2312_v34, 0.0  ;;  %v2376_v24 = vmul.f32 0.01, %v2312_v34  ;;  %v2101_v1 = vadd.f32 %v2031_v62, %v1945_v4  ;;  %v1813_v40 = vadd.f32 %v1746_v10, %v4160_v3  ;;  %v4161_v10 = vld [vmem:[#allocation40_spill] sm:$0xff] }
 0x22f   : > { %v2408_v12 = vsel %vm2344_vm14, %v2312_v34, %v2376_v24  ;;  %v2241_v57 = vadd.f32 %v2171_v21, %v2101_v1  ;;  %v1878_v38 = vpop.f32.mrf.mxu2 }
 0x230   : > { %2440 = vst [vmem:[%s3816_s22 + $0x30] sm:$0xff] %v2408_v12  ;;  %v1946_v9 = vadd.f32 %v1878_v38, %v1812_v25  ;;  %v4162_v25 = vld [vmem:[#allocation42_spill] sm:$0xff] }
 0x231   : > { %v2277_v60 = vmul.f32 %v3796_v42, %v2241_v57  ;;  %2749 = vmatmul.msk.bf16.gmra.mxu3 %vm691_vm4, %v4158_v41  ;;  %v1699_v38 = vrot.slane %v4162_v25, 5  ;;  %v3893_v41 = vld [vmem:[%s2881_s30 + $0xd0] sm:$0xf] }
 0x233   : > { %v2313_v43 = vadd.f32 %v3803_v27, %v2277_v60  ;;  %v2174_v37 = vpop.f32.mrf.mxu0  ;;  %v3890_v60 = vld [vmem:[%s2881_s30 + $0xcc] sm:$0xf] }
 0x234   : > { %v2034_v17 = vpop.f32.mrf.mxu3  ;;  %v1749_v35 = vpop.f32.mrf.mxu1 }
 0x235   : > { %vm2345_vm15 = vcmp.gt.f32.partialorder %v2313_v43, 0.0  ;;  %v2377_v13 = vmul.f32 0.01, %v2313_v43  ;;  %v2102_v15 = vadd.f32 %v2034_v17, %v1946_v9  ;;  %v1814_v24 = vadd.f32 %v1749_v35, %v4161_v10 }
 0x236   : > { %2767 = vmatmul.msk.bf16.gmra.mxu0 %vm691_vm4, %v4159_v44 }
 0x237   : > { %v2409_v55 = vsel %vm2345_vm15, %v2313_v43, %v2377_v13  ;;  %v2242_v33 = vadd.f32 %v2174_v37, %v2102_v15  ;;  %v1880_v50 = vpop.f32.mrf.mxu2  ;;  %2712 = vmatmul.msk.bf16.gmra.mxu1 %vm691_vm4, %v4159_v44  ;;  %v4163_v37 = vld [vmem:[#allocation5_spill] sm:$0xff]  ;;  %v1971_v15 = vshrl.u32 %v3890_v60, 16  ;;  %v1974_v44 = vshll.u32 %v3890_v60, 16 }
 0x238   : > { %2441 = vst [vmem:[%s3816_s22 + $0x38] sm:$0xff] %v2409_v55  ;;  %v1947_v48 = vadd.f32 %v1880_v50, %v1813_v40  ;;  %v2697_v17 = vrot.slane %v4163_v37, 9  ;;  %v1980_v55 = vshll.u32 %v3893_v41, 16 }
 0x239   : > { %v2278_v19 = vmul.f32 %v3796_v42, %v2242_v33  ;;  %v1984_v33 = vshrl.u32 %v3893_v41, 16 }
 0x23b   : > { %v2314_v6 = vadd.f32 %v3803_v27, %v2278_v19  ;;  %v2176_v39 = vpop.f32.mrf.mxu0 }
 0x23c   : > { %v2036_v18 = vpop.f32.mrf.mxu3  ;;  %2733 = vmatmul.msk.bf16.gmra.mxu2 %vm691_vm4, %v3626_v30  ;;  %v1751_v4 = vpop.f32.mrf.mxu1 }
 0x23d   : > { %vm2346_vm0 = vcmp.gt.f32.partialorder %v2314_v6, 0.0  ;;  %v2378_v34 = vmul.f32 0.01, %v2314_v6  ;;  %v2103_v21 = vadd.f32 %v2036_v18, %v1947_v48  ;;  %v1815_v50 = vadd.f32 %v1751_v4, %v3630_v49  ;;  %v252_v4 = vld [vmem:[%s2881_s30 + $0xd4] sm:$0x1] }
 0x23e   : > { %v1973_v18 = vrot.slane %v1971_v15, 4 }
 0x23f   : > { %v2410_v62 = vsel %vm2346_vm0, %v2314_v6, %v2378_v34  ;;  %v2243_v45 = vadd.f32 %v2176_v39, %v2103_v21  ;;  %v1883_v1 = vpop.f32.mrf.mxu2  ;;  %v1700_v39 = vsel %vm3211_vm7, %v2697_v17, %v1699_v38  ;;  %v1976_v34 = vrot.slane %v1974_v44, 5 }
 0x240   : > { %2442 = vst [vmem:[%s3816_s22 + $0x40] sm:$0xff] %v2410_v62  ;;  %v1948_v57 = vadd.f32 %v1883_v1, %v1814_v24  ;;  %v1982_v21 = vrot.slane %v1980_v55, 5  ;;  %v1986_v62 = vrot.slane %v1984_v33, 4 }
 0x241   : > { %v2279_v12 = vmul.f32 %v3796_v42, %v2243_v45  ;;  %2750 = vmatmul.msk.bf16.gmra.mxu3 %vm691_vm4, %v3220_v53  ;;  %v1702_v53 = vrot.slane %v3633_v11, 5  ;;  %v1701_v11 = vrot.slane %v1699_v38, 4  ;;  %v1990_v38 = vshll.u32 %v252_v4, 16 }
 0x242   : > { %v1987_v25 = vor.u32 %v1986_v62, %v1982_v21 }
 0x243   : > { %v2315_v30 = vadd.f32 %v3803_v27, %v2279_v12  ;;  %v2179_v32 = vpop.f32.mrf.mxu0  ;;  %v1703_v49 = vsel %vm3211_vm7, %v1701_v11, %v1702_v53  ;;  %v1992_v55 = vrot.slane %v1990_v38, 5 }
 0x244   : > { %v2039_v9 = vpop.f32.mrf.mxu3  ;;  %v1754_v43 = vpop.f32.mrf.mxu1  ;;  %v1988_v44 = vrot.slane %v1987_v25, 4 }
 0x245   : > { %vm2347_vm1 = vcmp.gt.f32.partialorder %v2315_v30, 0.0  ;;  %v2379_v35 = vmul.f32 0.01, %v2315_v30  ;;  %v2104_v13 = vadd.f32 %v2039_v9, %v1948_v57  ;;  %v1706_v57 = vunpack.c.l.b16 %v1700_v39 }
 0x246   : > { %2768 = vmatmul.msk.bf16.gmra.mxu0 %vm691_vm4, %v3649_v46  ;;  %v1816_v17 = vadd.f32 %v1754_v43, %v3647_v7  ;;  %v1993_v11 = vsel %vm2908_vm3, %v1988_v44, %v1992_v55 }
 0x247   : > { %v2411_v3 = vsel %vm2347_vm1, %v2315_v30, %v2379_v35  ;;  %v2244_v40 = vadd.f32 %v2179_v32, %v2104_v13  ;;  %v1885_v19 = vpop.f32.mrf.mxu2  ;;  %2713 = vmatmul.msk.bf16.gmra.mxu1 %vm691_vm4, %v3649_v46  ;;  %v1707_v30 = vunpack.c.l.b16 %v1703_v49  ;;  %v1977_v32 = vor.u32 %v1976_v34, %v1973_v18 }
 0x248   : > { %2443 = vst [vmem:[%s3816_s22 + $0x48] sm:$0xff] %v2411_v3  ;;  %v1949_v6 = vadd.f32 %v1885_v19, %v1815_v50 }
 0x249   : > { %v2280_v48 = vmul.f32 %v3796_v42, %v2244_v40  ;;  %v1708_v53 = vpack.c.b16 %v1707_v30, %v1706_v57  ;;  %v1978_v15 = vrot.slane %v1977_v32, 4  ;;  %v2129_v40 = vrot.slane %v3893_v41, 5 }
 0x24b   : > { %v2316_v45 = vadd.f32 %v3803_v27, %v2280_v48  ;;  %v2181_v10 = vpop.f32.mrf.mxu0  ;;  %v2753_v48 = vrot.slane %v3890_v60, 9  ;;  %v2131_v62 = vrot.slane %v2129_v40, 4 }
 0x24c   : > { %v2041_v46 = vpop.f32.mrf.mxu3  ;;  %2734 = vmatmul.msk.bf16.gmra.mxu2 %vm691_vm4, %v3658_v54  ;;  %v1756_v24 = vpop.f32.mrf.mxu1 }
 0x24d   : > { %vm2348_vm2 = vcmp.gt.f32.partialorder %v2316_v45, 0.0  ;;  %v2380_v1 = vmul.f32 0.01, %v2316_v45  ;;  %v2105_v12 = vadd.f32 %v2041_v46, %v1949_v6  ;;  %v2132_v6 = vrot.slane %v252_v4, 5 }
 0x24e   : > { %v1817_v18 = vadd.f32 %v1756_v24, %v3661_v28  ;;  %v1997_v46 = vunpack.c.l.b16 %v1993_v11  ;;  %v2130_v60 = vsel %vm3211_vm7, %v2753_v48, %v2129_v40 }
 0x24f   : > { %v2412_v9 = vsel %vm2348_vm2, %v2316_v45, %v2380_v1  ;;  %v2245_v37 = vadd.f32 %v2181_v10, %v2105_v12  ;;  %v1888_v35 = vpop.f32.mrf.mxu2  ;;  %v2791_v45 = vld [vmem:[%s2881_s30 + $0xcc] sm:$0xff]  ;;  %v2133_v28 = vsel %vm3211_vm7, %v2131_v62, %v2132_v6  ;;  %v2136_v32 = vunpack.c.l.b16 %v2130_v60 }
 0x250   : > { %2444 = vst [vmem:[%s3816_s22 + $0x50] sm:$0xff] %v2412_v9  ;;  %v1950_v54 = vadd.f32 %v1888_v35, %v1816_v17  ;;  %v2137_v25 = vunpack.c.l.b16 %v2133_v28 }
 0x251   : > { %v2281_v13 = vmul.f32 %v3796_v42, %v2245_v37  ;;  %2751 = vmatmul.msk.bf16.gmra.mxu3 %vm691_vm4, %v3665_v22  ;;  %v1983_v22 = vsel %vm2908_vm3, %v1978_v15, %v1982_v21 }
 0x252   : > { %v1996_v21 = vunpack.c.l.b16 %v1983_v22 }
 0x253   : > { %v2317_v33 = vadd.f32 %v3803_v27, %v2281_v13  ;;  %v2184_v3 = vpop.f32.mrf.mxu0  ;;  %v2138_v13 = vpack.c.b16 %v2137_v25, %v2136_v32 }
 0x254   : > { %v2044_v50 = vpop.f32.mrf.mxu3  ;;  %v1759_v7 = vpop.f32.mrf.mxu1  ;;  %v1998_v30 = vpack.c.b16 %v1997_v46, %v1996_v21 }
 0x255   : > { %vm2349_vm5 = vcmp.gt.f32.partialorder %v2317_v33, 0.0  ;;  %v2381_v43 = vmul.f32 0.01, %v2317_v33  ;;  %v2106_v19 = vadd.f32 %v2044_v50, %v1950_v54  ;;  %v1818_v37 = vadd.f32 %v1759_v7, %v3672_v58 }
 0x256   : > { %2769 = vmatmul.msk.bf16.gmra.mxu0 %vm691_vm4, %v1708_v53 }
 0x257   : > { %v2413_v39 = vsel %vm2349_vm5, %v2317_v33, %v2381_v43  ;;  %v2246_v41 = vadd.f32 %v2184_v3, %v2106_v19  ;;  %v1890_v34 = vpop.f32.mrf.mxu2  ;;  %2714 = vmatmul.msk.bf16.gmra.mxu1 %vm691_vm4, %v1708_v53 }
 0x258   : > { %2445 = vst [vmem:[%s3816_s22 + $0x58] sm:$0xff] %v2413_v39  ;;  %v1951_v49 = vadd.f32 %v1890_v34, %v1817_v18 }
 0x259   : > { %v2282_v10 = vmul.f32 %v3796_v42, %v2246_v41 }
 0x25b   : > { %v2318_v36 = vadd.f32 %v3803_v27, %v2282_v10  ;;  %v2186_v1 = vpop.f32.mrf.mxu0 }
 0x25c   : > { %v2046_v4 = vpop.f32.mrf.mxu3  ;;  %2735 = vmatmul.msk.bf16.gmra.mxu2 %vm691_vm4, %v2791_v45  ;;  %v1761_v24 = vpop.f32.mrf.mxu1 }
 0x25d   : > { %vm2350_vm3 = vcmp.gt.f32.partialorder %v2318_v36, 0.0  ;;  %v2382_v12 = vmul.f32 0.01, %v2318_v36  ;;  %v2107_v57 = vadd.f32 %v2046_v4, %v1951_v49  ;;  %v1819_v40 = vadd.f32 %v1761_v24, %v3677_v31 }
 0x25f   : > { %v2414_v38 = vsel %vm2350_vm3, %v2318_v36, %v2382_v12  ;;  %v2247_v9 = vadd.f32 %v2186_v1, %v2107_v57  ;;  %v1893_v17 = vpop.f32.mrf.mxu2 }
 0x260   : > { %2446 = vst [vmem:[%s3816_s22 + $0x60] sm:$0xff] %v2414_v38  ;;  %v1952_v14 = vadd.f32 %v1893_v17, %v1818_v37 }
 0x261   : > { %v2283_v35 = vmul.f32 %v3796_v42, %v2247_v9  ;;  %2752 = vmatmul.msk.bf16.gmra.mxu3 %vm691_vm4, %v1998_v30 }
 0x263   : > { %v2319_v54 = vadd.f32 %v3803_v27, %v2283_v35  ;;  %v2189_v53 = vpop.f32.mrf.mxu0 }
 0x264   : > { %v2049_v15 = vpop.f32.mrf.mxu3  ;;  %v1764_v44 = vpop.f32.mrf.mxu1 }
 0x265   : > { %vm2351_vm6 = vcmp.gt.f32.partialorder %v2319_v54, 0.0  ;;  %v2383_v55 = vmul.f32 0.01, %v2319_v54  ;;  %v2108_v33 = vadd.f32 %v2049_v15, %v1952_v14  ;;  %v1820_v34 = vadd.f32 %v1764_v44, %v3686_v16 }
 0x266   : > { %2770 = vmatmul.msk.bf16.gmra.mxu0 %vm691_vm4, %v2138_v13 }
 0x267   : > { %v2415_v58 = vsel %vm2351_vm6, %v2319_v54, %v2383_v55  ;;  %v2248_v3 = vadd.f32 %v2189_v53, %v2108_v33  ;;  %v1895_v50 = vpop.f32.mrf.mxu2 }
 0x268   : > { %2447 = vst [vmem:[%s3816_s22 + $0x68] sm:$0xff] %v2415_v58  ;;  %v1953_v43 = vadd.f32 %v1895_v50, %v1819_v40 }
 0x269   : > { %v2284_v7 = vmul.f32 %v3796_v42, %v2248_v3 }
 0x26b   : > { %v2320_v19 = vadd.f32 %v3803_v27, %v2284_v7  ;;  %v2191_v22 = vpop.f32.mrf.mxu0 }
 0x26c   : > { %v2051_v11 = vpop.f32.mrf.mxu3  ;;  %v1766_v48 = vpop.f32.mrf.mxu1 }
 0x26d   : > { %vm2352_vm7 = vcmp.gt.f32.partialorder %v2320_v19, 0.0  ;;  %v2384_v6 = vmul.f32 0.01, %v2320_v19  ;;  %v2109_v39 = vadd.f32 %v2051_v11, %v1953_v43  ;;  %v1821_v4 = vadd.f32 %v1766_v48, %v3691_v26 }
 0x26f   : > { %v2416_v41 = vsel %vm2352_vm7, %v2320_v19, %v2384_v6  ;;  %v2249_v18 = vadd.f32 %v2191_v22, %v2109_v39  ;;  %v1898_v31 = vpop.f32.mrf.mxu2 }
 0x270   : > { %2448 = vst [vmem:[%s3816_s22 + $0x70] sm:$0xff] %v2416_v41  ;;  %v1954_v45 = vadd.f32 %v1898_v31, %v1820_v34 }
 0x271   : > { %v2285_v62 = vmul.f32 %v3796_v42, %v2249_v18 }
 0x273   : > { %v2321_v10 = vadd.f32 %v3803_v27, %v2285_v62  ;;  %v2194_v49 = vpop.f32.mrf.mxu0 }
 0x274   : > { %v2054_v21 = vpop.f32.mrf.mxu3  ;;  %v1769_v46 = vpop.f32.mrf.mxu1 }
 0x275   : > { %vm2353_vm4 = vcmp.gt.f32.partialorder %v2321_v10, 0.0  ;;  %v2385_v36 = vmul.f32 0.01, %v2321_v10  ;;  %v2110_v1 = vadd.f32 %v2054_v21, %v1954_v45  ;;  %v1822_v35 = vadd.f32 %v1769_v46, %v3700_v59 }
 0x277   : > { %v2417_v60 = vsel %vm2353_vm4, %v2321_v10, %v2385_v36  ;;  %v2250_v28 = vadd.f32 %v2194_v49, %v2110_v1  ;;  %v1900_v16 = vpop.f32.mrf.mxu2 }
 0x278   : > { %2449 = vst [vmem:[%s3816_s22 + $0x78] sm:$0xff] %v2417_v60  ;;  %v1955_v12 = vadd.f32 %v1900_v16, %v1821_v4 }
 0x279   : > { %v2286_v24 = vmul.f32 %v3796_v42, %v2250_v28 }
 0x27b   : > { %v2322_v57 = vadd.f32 %v3803_v27, %v2286_v24  ;;  %v2196_v30 = vpop.f32.mrf.mxu0 }
 0x27c   : > { %v2056_v32 = vpop.f32.mrf.mxu3  ;;  %v1771_v25 = vpop.f32.mrf.mxu1 }
 0x27d   : > { %vm2354_vm8 = vcmp.gt.f32.partialorder %v2322_v57, 0.0  ;;  %v2386_v38 = vmul.f32 0.01, %v2322_v57  ;;  %v2111_v9 = vadd.f32 %v2056_v32, %v1955_v12  ;;  %v1823_v40 = vadd.f32 %v1771_v25, %v3705_v47 }
 0x27f   : > { %v2418_v37 = vsel %vm2354_vm8, %v2322_v57, %v2386_v38  ;;  %v2251_v17 = vadd.f32 %v2196_v30, %v2111_v9  ;;  %v1903_v26 = vpop.f32.mrf.mxu2 }
 0x280   : > { %2450 = vst [vmem:[%s3816_s22 + $0x80] sm:$0xff] %v2418_v37  ;;  %v1956_v13 = vadd.f32 %v1903_v26, %v1822_v35 }
 0x281   : > { %v2287_v14 = vmul.f32 %v3796_v42, %v2251_v17 }
 0x283   : > { %v2323_v54 = vadd.f32 %v3803_v27, %v2287_v14  ;;  %v2199_v53 = vpop.f32.mrf.mxu0 }
 0x284   : > { %v2059_v15 = vpop.f32.mrf.mxu3  ;;  %v1774_v44 = vpop.f32.mrf.mxu1 }
 0x285   : > { %vm2355_vm9 = vcmp.gt.f32.partialorder %v2323_v54, 0.0  ;;  %v2387_v55 = vmul.f32 0.01, %v2323_v54  ;;  %v2112_v33 = vadd.f32 %v2059_v15, %v1956_v13  ;;  %v1824_v18 = vadd.f32 %v1774_v44, %v3714_v23 }
 0x287   : > { %v2419_v58 = vsel %vm2355_vm9, %v2323_v54, %v2387_v55  ;;  %v2252_v3 = vadd.f32 %v2199_v53, %v2112_v33  ;;  %v1905_v59 = vpop.f32.mrf.mxu2 }
 0x288   : > { %2451 = vst [vmem:[%s3816_s22 + $0x88] sm:$0xff] %v2419_v58  ;;  %v1957_v7 = vadd.f32 %v1905_v59, %v1823_v40 }
 0x289   : > { %v2288_v50 = vmul.f32 %v3796_v42, %v2252_v3 }
 0x28b   : > { %v2324_v43 = vadd.f32 %v3803_v27, %v2288_v50  ;;  %v2201_v19 = vpop.f32.mrf.mxu0 }
 0x28c   : > { %v2061_v22 = vpop.f32.mrf.mxu3  ;;  %v1776_v11 = vpop.f32.mrf.mxu1 }
 0x28d   : > { %vm2356_vm10 = vcmp.gt.f32.partialorder %v2324_v43, 0.0  ;;  %v2388_v48 = vmul.f32 0.01, %v2324_v43  ;;  %v2113_v6 = vadd.f32 %v2061_v22, %v1957_v7  ;;  %v1825_v60 = vadd.f32 %v1776_v11, %v3719_v61 }
 0x28f   : > { %v2420_v39 = vsel %vm2356_vm10, %v2324_v43, %v2388_v48  ;;  %v2253_v41 = vadd.f32 %v2201_v19, %v2113_v6  ;;  %v1908_v47 = vpop.f32.mrf.mxu2 }
 0x290   : > { %2452 = vst [vmem:[%s3816_s22 + $0x90] sm:$0xff] %v2420_v39  ;;  %v1958_v31 = vadd.f32 %v1908_v47, %v1824_v18 }
 0x291   : > { %v2289_v34 = vmul.f32 %v3796_v42, %v2253_v41 }
 0x293   : > { %v2325_v62 = vadd.f32 %v3803_v27, %v2289_v34  ;;  %v2204_v45 = vpop.f32.mrf.mxu0 }
 0x294   : > { %v2064_v10 = vpop.f32.mrf.mxu3  ;;  %v1779_v49 = vpop.f32.mrf.mxu1 }
 0x295   : > { %vm2357_vm11 = vcmp.gt.f32.partialorder %v2325_v62, 0.0  ;;  %v2389_v21 = vmul.f32 0.01, %v2325_v62  ;;  %v2114_v46 = vadd.f32 %v2064_v10, %v1958_v31  ;;  %v1826_v9 = vadd.f32 %v1779_v49, %v3728_v56 }
 0x297   : > { %v2421_v36 = vsel %vm2357_vm11, %v2325_v62, %v2389_v21  ;;  %v2254_v1 = vadd.f32 %v2204_v45, %v2114_v46  ;;  %v1910_v23 = vpop.f32.mrf.mxu2 }
 0x298   : > { %2453 = vst [vmem:[%s3816_s22 + $0x98] sm:$0xff] %v2421_v36  ;;  %v1959_v4 = vadd.f32 %v1910_v23, %v1825_v60 }
 0x299   : > { %v2290_v28 = vmul.f32 %v3796_v42, %v2254_v1 }
 0x29b   : > { %v2326_v16 = vadd.f32 %v3803_v27, %v2290_v28  ;;  %v2206_v24 = vpop.f32.mrf.mxu0 }
 0x29c   : > { %v2066_v12 = vpop.f32.mrf.mxu3  ;;  %v1781_v57 = vpop.f32.mrf.mxu1 }
 0x29d   : > { %vm2358_vm12 = vcmp.gt.f32.partialorder %v2326_v16, 0.0  ;;  %v2390_v30 = vmul.f32 0.01, %v2326_v16  ;;  %v2115_v32 = vadd.f32 %v2066_v12, %v1959_v4  ;;  %v1827_v55 = vadd.f32 %v1781_v57, %v3733_v0 }
 0x29f   : > { %v2422_v25 = vsel %vm2358_vm12, %v2326_v16, %v2390_v30  ;;  %v2255_v38 = vadd.f32 %v2206_v24, %v2115_v32  ;;  %v1913_v61 = vpop.f32.mrf.mxu2 }
 0x2a0   : > { %2454 = vst [vmem:[%s3816_s22 + $0xa0] sm:$0xff] %v2422_v25  ;;  %v1960_v17 = vadd.f32 %v1913_v61, %v1826_v9 }
 0x2a1   : > { %v2291_v37 = vmul.f32 %v3796_v42, %v2255_v38 }
 0x2a3   : > { %v2327_v35 = vadd.f32 %v3803_v27, %v2291_v37  ;;  %v2209_v26 = vpop.f32.mrf.mxu0 }
 0x2a4   : > { %v2069_v14 = vpop.f32.mrf.mxu3  ;;  %v1784_v13 = vpop.f32.mrf.mxu1 }
 0x2a5   : > { %vm2359_vm13 = vcmp.gt.f32.partialorder %v2327_v35, 0.0  ;;  %v2391_v54 = vmul.f32 0.01, %v2327_v35  ;;  %v2116_v53 = vadd.f32 %v2069_v14, %v1960_v17  ;;  %v1828_v11 = vadd.f32 %v1784_v13, %v3742_v29 }
 0x2a7   : > { %v2423_v15 = vsel %vm2359_vm13, %v2327_v35, %v2391_v54  ;;  %v2256_v44 = vadd.f32 %v2209_v26, %v2116_v53  ;;  %v1915_v56 = vpop.f32.mrf.mxu2 }
 0x2a8   : > { %2455 = vst [vmem:[%s3816_s22 + $0xa8] sm:$0xff] %v2423_v15  ;;  %v1961_v58 = vadd.f32 %v1915_v56, %v1827_v55 }
 0x2a9   : > { %v2292_v33 = vmul.f32 %v3796_v42, %v2256_v44 }
 0x2ab   : > { %v2328_v3 = vadd.f32 %v3803_v27, %v2292_v33  ;;  %v2211_v40 = vpop.f32.mrf.mxu0 }
 0x2ac   : > { %v2071_v59 = vpop.f32.mrf.mxu3  ;;  %v1786_v50 = vpop.f32.mrf.mxu1 }
 0x2ad   : > { %vm2360_vm14 = vcmp.gt.f32.partialorder %v2328_v3, 0.0  ;;  %v2392_v7 = vmul.f32 0.01, %v2328_v3  ;;  %v2117_v43 = vadd.f32 %v2071_v59, %v1961_v58  ;;  %v1829_v10 = vadd.f32 %v1786_v50, %v3747_v52 }
 0x2af   : > { %v2424_v19 = vsel %vm2360_vm14, %v2328_v3, %v2392_v7  ;;  %v2257_v22 = vadd.f32 %v2211_v40, %v2117_v43  ;;  %v1918_v0 = vpop.f32.mrf.mxu2 }
 0x2b0   : > { %2456 = vst [vmem:[%s3816_s22 + $0xb0] sm:$0xff] %v2424_v19  ;;  %v1962_v6 = vadd.f32 %v1918_v0, %v1828_v11 }
 0x2b1   : > { %v2293_v48 = vmul.f32 %v3796_v42, %v2257_v22 }
 0x2b3   : > { %v2329_v39 = vadd.f32 %v3803_v27, %v2293_v48  ;;  %v2214_v41 = vpop.f32.mrf.mxu0 }
 0x2b4   : > { %v2074_v18 = vpop.f32.mrf.mxu3  ;;  %v1789_v47 = vpop.f32.mrf.mxu1 }
 0x2b5   : > { %vm2361_vm15 = vcmp.gt.f32.partialorder %v2329_v39, 0.0  ;;  %v2393_v34 = vmul.f32 0.01, %v2329_v39  ;;  %v2118_v31 = vadd.f32 %v2074_v18, %v1962_v6  ;;  %v1830_v24 = vadd.f32 %v1789_v47, %v3756_v20 }
 0x2b7   : > { %v2425_v62 = vsel %vm2361_vm15, %v2329_v39, %v2393_v34  ;;  %v2258_v45 = vadd.f32 %v2214_v41, %v2118_v31  ;;  %v1920_v29 = vpop.f32.mrf.mxu2 }
 0x2b8   : > { %2457 = vst [vmem:[%s3816_s22 + $0xb8] sm:$0xff] %v2425_v62  ;;  %v1963_v21 = vadd.f32 %v1920_v29, %v1829_v10 }
 0x2b9   : > { %v2294_v49 = vmul.f32 %v3796_v42, %v2258_v45 }
 0x2bb   : > { %v2330_v46 = vadd.f32 %v3803_v27, %v2294_v49  ;;  %v2216_v36 = vpop.f32.mrf.mxu0 }
 0x2bc   : > { %v2076_v1 = vpop.f32.mrf.mxu3  ;;  %v1791_v60 = vpop.f32.mrf.mxu1 }
 0x2bd   : > { %vm2362_vm0 = vcmp.gt.f32.partialorder %v2330_v46, 0.0  ;;  %v2394_v23 = vmul.f32 0.01, %v2330_v46  ;;  %v2119_v28 = vadd.f32 %v2076_v1, %v1963_v21  ;;  %v1831_v35 = vadd.f32 %v1791_v60, %v3761_v8 }
 0x2bf   : > { %v2426_v4 = vsel %vm2362_vm0, %v2330_v46, %v2394_v23  ;;  %v2259_v16 = vadd.f32 %v2216_v36, %v2119_v28  ;;  %v1923_v52 = vpop.f32.mrf.mxu2 }
 0x2c0   : > { %2458 = vst [vmem:[%s3816_s22 + $0xc0] sm:$0xff] %v2426_v4  ;;  %v1964_v57 = vadd.f32 %v1923_v52, %v1830_v24 }
 0x2c1   : > { %v2295_v12 = vmul.f32 %v3796_v42, %v2259_v16 }
 0x2c3   : > { %v2331_v30 = vadd.f32 %v3803_v27, %v2295_v12  ;;  %v2219_v32 = vpop.f32.mrf.mxu0 }
 0x2c4   : > { %v2079_v25 = vpop.f32.mrf.mxu3  ;;  %v1794_v61 = vpop.f32.mrf.mxu1 }
 0x2c5   : > { %vm2363_vm1 = vcmp.gt.f32.partialorder %v2331_v30, 0.0  ;;  %v2395_v38 = vmul.f32 0.01, %v2331_v30  ;;  %v2120_v9 = vadd.f32 %v2079_v25, %v1964_v57  ;;  %v1832_v33 = vadd.f32 %v1794_v61, %v3770_v51 }
 0x2c7   : > { %v2427_v37 = vsel %vm2363_vm1, %v2331_v30, %v2395_v38  ;;  %v2260_v17 = vadd.f32 %v2219_v32, %v2120_v9  ;;  %v1925_v20 = vpop.f32.mrf.mxu2 }
 0x2c8   : > { %2459 = vst [vmem:[%s3816_s22 + $0xc8] sm:$0xff] %v2427_v37  ;;  %v1965_v14 = vadd.f32 %v1925_v20, %v1831_v35 }
 0x2c9   : > { %v2296_v26 = vmul.f32 %v3796_v42, %v2260_v17 }
 0x2cb   : > { %v2332_v13 = vadd.f32 %v3803_v27, %v2296_v26  ;;  %v2221_v54 = vpop.f32.mrf.mxu0 }
 0x2cc   : > { %v2081_v53 = vpop.f32.mrf.mxu3  ;;  %v1796_v8 = vpop.f32.mrf.mxu1 }
 0x2cd   : > { %vm2364_vm2 = vcmp.gt.f32.partialorder %v2332_v13, 0.0  ;;  %v2396_v15 = vmul.f32 0.01, %v2332_v13  ;;  %v2121_v44 = vadd.f32 %v2081_v53, %v1965_v14  ;;  %v1833_v0 = vadd.f32 %v1796_v8, %v3775_v63 }
 0x2cf   : > { %v2428_v55 = vsel %vm2364_vm2, %v2332_v13, %v2396_v15  ;;  %v2261_v56 = vadd.f32 %v2221_v54, %v2121_v44  ;;  %v1928_v58 = vpop.f32.mrf.mxu2 }
 0x2d0   : > { %2460 = vst [vmem:[%s3816_s22 + $0xd0] sm:$0xff] %v2428_v55  ;;  %v1966_v40 = vadd.f32 %v1928_v58, %v1832_v33 }
 0x2d1   : > { %v2297_v3 = vmul.f32 %v3796_v42, %v2261_v56 }
 0x2d3   : > { %v2333_v59 = vadd.f32 %v3803_v27, %v2297_v3  ;;  %v2224_v50 = vpop.f32.mrf.mxu0 }
 0x2d4   : > { %v2084_v7 = vpop.f32.mrf.mxu3  ;;  %v1799_v39 = vpop.f32.mrf.mxu1 }
 0x2d5   : > { %vm2365_vm5 = vcmp.gt.f32.partialorder %v2333_v59, 0.0  ;;  %v2397_v43 = vmul.f32 0.01, %v2333_v59  ;;  %v2122_v19 = vadd.f32 %v2084_v7, %v1966_v40  ;;  %v1834_v10 = vadd.f32 %v1799_v39, %v3784_v2 }
 0x2d7   : > { %v2429_v22 = vsel %vm2365_vm5, %v2333_v59, %v2397_v43  ;;  %v2262_v11 = vadd.f32 %v2224_v50, %v2122_v19  ;;  %v1930_v51 = vpop.f32.mrf.mxu2 }
 0x2d8   : > { %2461 = vst [vmem:[%s3816_s22 + $0xd8] sm:$0xff] %v2429_v22  ;;  %v1967_v6 = vadd.f32 %v1930_v51, %v1833_v0 }
 0x2d9   : > { %v2298_v48 = vmul.f32 %v3796_v42, %v2262_v11 }
 0x2db   : > { %v2334_v41 = vadd.f32 %v3803_v27, %v2298_v48  ;;  %v2226_v18 = vpop.f32.mrf.mxu0 }
 0x2dc   : > { %v2086_v47 = vpop.f32.mrf.mxu3  ;;  %v1801_v46 = vpop.f32.mrf.mxu1 }
 0x2dd   : > { %vm2366_vm3 = vcmp.gt.f32.partialorder %v2334_v41, 0.0  ;;  %v2398_v34 = vmul.f32 0.01, %v2334_v41  ;;  %v2123_v31 = vadd.f32 %v2086_v47, %v1967_v6  ;;  %v1835_v16 = vadd.f32 %v1801_v46, %v3789_v5 }
 0x2df   : > { %v2430_v62 = vsel %vm2366_vm3, %v2334_v41, %v2398_v34  ;;  %v2263_v45 = vadd.f32 %v2226_v18, %v2123_v31  ;;  %v1933_v63 = vpop.f32.mrf.mxu2 }
 0x2e0   : > { %2462 = vst [vmem:[%s3816_s22 + $0xe0] sm:$0xff] %v2430_v62  ;;  %v1968_v49 = vadd.f32 %v1933_v63, %v1834_v10 }
 0x2e1   : > { %v2299_v29 = vmul.f32 %v3796_v42, %v2263_v45 }
 0x2e3   : > { %v2335_v21 = vadd.f32 %v3803_v27, %v2299_v29  ;;  %v2229_v36 = vpop.f32.mrf.mxu0 }
 0x2e4   : > { %v2089_v1 = vpop.f32.mrf.mxu3 }
 0x2e5   : > { %vm2367_vm6 = vcmp.gt.f32.partialorder %v2335_v21, 0.0  ;;  %v2399_v60 = vmul.f32 0.01, %v2335_v21  ;;  %v2124_v23 = vadd.f32 %v2089_v1, %v1968_v49 }
 0x2e7   : > { %v2431_v28 = vsel %vm2367_vm6, %v2335_v21, %v2399_v60  ;;  %v2264_v4 = vadd.f32 %v2229_v36, %v2124_v23  ;;  %v1935_v2 = vpop.f32.mrf.mxu2 }
 0x2e8   : > { %2463 = vst [vmem:[%s3816_s22 + $0xe8] sm:$0xff] %v2431_v28  ;;  %v1969_v52 = vadd.f32 %v1935_v2, %v1835_v16 }
 0x2e9   : > { %v2300_v24 = vmul.f32 %v3796_v42, %v2264_v4 }
 0x2eb   : > { %v2336_v12 = vadd.f32 %v3803_v27, %v2300_v24  ;;  %v2231_v25 = vpop.f32.mrf.mxu0 }
 0x2ec   : > { %v2091_v57 = vpop.f32.mrf.mxu3 }
 0x2ed   : > { %vm2368_vm7 = vcmp.gt.f32.partialorder %v2336_v12, 0.0  ;;  %v2400_v30 = vmul.f32 0.01, %v2336_v12  ;;  %v2125_v32 = vadd.f32 %v2091_v57, %v1969_v52 }
 0x2ef   : > { %v2432_v38 = vsel %vm2368_vm7, %v2336_v12, %v2400_v30  ;;  %v2265_v9 = vadd.f32 %v2231_v25, %v2125_v32 }
 0x2f0   : > { %2464 = vst [vmem:[%s3816_s22 + $0xf0] sm:$0xff] %v2432_v38 }
 0x2f1   : > { %v2301_v61 = vmul.f32 %v3796_v42, %v2265_v9 }
 0x2f3   : > { %v2337_v5 = vadd.f32 %v3803_v27, %v2301_v61 }
 0x2f5   : > { %vm2369_vm4 = vcmp.gt.f32.partialorder %v2337_v5, 0.0  ;;  %v2401_v37 = vmul.f32 0.01, %v2337_v5 }
 0x2f7   : > { %v2433_v17 = vsel %vm2369_vm4, %v2337_v5, %v2401_v37 }
 0x2f8   : > { %2465 = vst [vmem:[%s3816_s22 + $0xf8] sm:$0xff] %v2433_v17 }
 0x2f9 PF: > { %s14_s15 = sadd.s32 1, %s2820_s15  }
 0x2fa   : > { %p11_p4 = scmp.ge.s32.totalorder %s14_s15, 4  }
 0x2fc   :  { %13 = sbr.rel (!%p11_p4) target bundleno = 1 (0x1), region = 74 }

// kernel: conv_bn_relu.2
= control target key start
LH: loop header
LB: loop body
LE: loop exit
PB: predicated region body
PF: predicated region fallthrough
CT: control target
= control target key end

     0   :  { %s2693_s12 = smov 0   ;;  %s3766_s0 = inlined_call_operand.vmem [shape: bf16[2,18,18,4], index: 0, kind: input, shape index: {}]   ;;  %s3767_s1 = inlined_call_operand.vmem [shape: bf16[9,4,128], index: 1, kind: input, shape index: {}]   ;;  %s3768_s2 = inlined_call_operand.vmem [shape: f32[1,128], index: 2, kind: output, shape index: {0}]   ;;  %s3769_s3 = inlined_call_operand.vmem [shape: f32[1,128], index: 3, kind: output, shape index: {1}]  }
   0x1 LB: > { %s2374_s13 = sadd.s32 4294967295, %s2670_s12   ;;  %p2377_p0 = scmp.ge.s32.totalorder %s2670_s12, 1  ;;  %s2670_s12 = sphi %s2693_s12, %s14_s12  }
   0x2   : > { %p130_p1 = scmp.lt.s32.totalorder %s2670_s12, 3 }
   0x4   : > { %p131_p2 = pnand %p2377_p0, %p130_p1 }
   0x6   : > { %134 = sbr.rel (%p131_p2) target bundleno = 779 (0x30b), region = 28 }
   0xb   : > { %p149_p3 = scmp.lt.s32.totalorder %s2374_s13, 1  ;;  %p2379_p4 = scmp.ne.s32.totalorder %s2374_s13, 0 }
   0xd   : > { %s150_s14 = scalar_select %p149_p3, %s2374_s13, 1 }
   0xe   : > { %158 = sbr.rel (%p2379_p4) target bundleno = 22 (0x16), region = 32 }
   0xf   : > { %s2645_s15 = smul.u32 216, %s150_s14 }
  0x11   : > { %s2704_s18 = scalar_lea.vmem %s3766_s0, %s2645_s15 }
  0x13   : > { %v2672_v0 = vmov 0.0  }
  0x14   : > { %159 = vst [vmem:[%s3768_s2] sm:$0x1] %v2672_v0 }
  0x15   : > { %160 = vst [vmem:[%s3769_s3] sm:$0x1] %v2672_v0 }
  0x16 PF: > { %v2380_v1 = vld [vmem:[%s3767_s1 + $0x2] sm:$0x3]  ;;  %vm702_vm0 = vcmask 1041408   ;;  %v2716_v2 = vld [vmem:[%s2704_s18 + $0x30] sm:$0xf]  ;;  %vm653_vm3 = vcmask 31744  }
  0x17   : > { %v704_v3 = vsel %vm702_vm0, %v2380_v1, 0  ;;  %v2720_v4 = vld [vmem:[%s2704_s18 + $0x34] sm:$0xf]  ;;  %v2723_v5 = vld [vmem:[%s2704_s18 + $0x38] sm:$0x1]  ;;  %v316_v6 = vshrl.u32 %v2716_v2, 16 }
  0x18   : > { %2642 = vmatpush.bf16.msra.mxu1 %v704_v3  ;;  %2643 = vmatpush.bf16.msra.mxu2 %v704_v3  ;;  %vm216_vm1 = vsmask.f32 3328  ;;  %vm217_vm2 = vsmask.f32 7440  ;;  %v319_v7 = vshll.u32 %v2716_v2, 16  ;;  %v325_v8 = vshll.u32 %v2720_v4, 16 }
  0x19   : > { %2644 = vmatpush.bf16.msra.mxu3 %v704_v3  ;;  %713 = vmatpush.bf16.msra.mxu0 %v704_v3  ;;  %v318_v9 = vrot.slane %v316_v6, 4  ;;  %v329_v10 = vshrl.u32 %v2720_v4, 16  ;;  %v335_v11 = vshll.u32 %v2723_v5, 16  ;;  %v185_v12 = vld [vmem:[%s2704_s18 + $0x60] sm:$0xf]  ;;  %vm2736_vm4 = vmor %vm216_vm1, %vm217_vm2  ;;  %vm1031_vm5 = vcmask 1042432  }
  0x1a   : > { %v321_v13 = vrot.slane %v319_v7, 5  ;;  %v327_v14 = vrot.slane %v325_v8, 5  ;;  %v186_v15 = vld [vmem:[%s2704_s18 + $0x64] sm:$0xf]  ;;  %v187_v16 = vld [vmem:[%s2704_s18 + $0x68] sm:$0x1] }
  0x1b   : > { %v331_v17 = vrot.slane %v329_v10, 4  ;;  %v412_v18 = vshrl.u32 %v185_v12, 16  ;;  %v415_v19 = vshll.u32 %v185_v12, 16  ;;  %v421_v21 = vshll.u32 %v186_v15, 16  ;;  %v197_v24 = vld [vmem:[%s2704_s18 + $0x90] sm:$0xf] }
  0x1c   : > { %v322_v20 = vor.u32 %v321_v13, %v318_v9  ;;  %v425_v22 = vshrl.u32 %v186_v15, 16  ;;  %v431_v23 = vshll.u32 %v187_v16, 16  ;;  %v337_v27 = vrot.slane %v335_v11, 5  ;;  %v198_v30 = vld [vmem:[%s2704_s18 + $0x94] sm:$0xf] }
  0x1d   : > { %v332_v26 = vor.u32 %v331_v17, %v327_v14  ;;  %v414_v28 = vrot.slane %v412_v18, 4  ;;  %v417_v29 = vrot.slane %v415_v19, 5  ;;  %v423_v32 = vrot.slane %v421_v21, 5  ;;  %v199_v41 = vld [vmem:[%s2704_s18 + $0x98] sm:$0x1] }
  0x1e   : > { %v323_v31 = vrot.slane %v322_v20, 4  ;;  %v427_v33 = vrot.slane %v425_v22, 4  ;;  %v433_v34 = vrot.slane %v431_v23, 5  ;;  %v508_v37 = vshrl.u32 %v197_v24, 16  ;;  %v2493_v52 = vld [vmem:[%s3767_s1 + $0x4] sm:$0x3] }
  0x1f   : > { %v333_v35 = vrot.slane %v332_v26, 4  ;;  %v418_v36 = vor.u32 %v417_v29, %v414_v28  ;;  %v511_v38 = vshll.u32 %v197_v24, 16  ;;  %v517_v42 = vshll.u32 %v198_v30, 16  ;;  %v2752_v56 = vld [vmem:[%s2704_s18] sm:$0xf] }
  0x20   : > { %v328_v39 = vsel %vm2736_vm4, %v323_v31, %v327_v14  ;;  %v428_v40 = vor.u32 %v427_v33, %v423_v32  ;;  %v521_v43 = vshrl.u32 %v198_v30, 16  ;;  %v510_v47 = vrot.slane %v508_v37, 4  ;;  %v2755_v57 = vld [vmem:[%s2704_s18 + $0x4] sm:$0xf]  ;;  %v2762_v62 = vld [vmem:[%s2704_s18 + $0x8] sm:$0x1] }
  0x21   : > { %v338_v44 = vsel %vm2736_vm4, %v333_v35, %v337_v27  ;;  %v613_v45 = vunpack.c.l.b16 %v328_v39  ;;  %v419_v46 = vrot.slane %v418_v36, 4  ;;  %v513_v50 = vrot.slane %v511_v38, 5  ;;  %v2510_v6 = vld [vmem:[%s3767_s1 + $0x6] sm:$0x3]  ;;  %v215_v11 = vld [vmem:[%s3767_s1] sm:$0x3] }
  0x22   : > { %v614_v48 = vunpack.c.l.b16 %v338_v44  ;;  %v429_v49 = vrot.slane %v428_v40, 4  ;;  %v519_v51 = vrot.slane %v517_v42, 5  ;;  %v523_v54 = vrot.slane %v521_v43, 4  ;;  %v2531_v16 = vld [vmem:[%s3767_s1 + $0x8] sm:$0x3] }
  0x23   : > { %v424_v53 = vsel %vm2736_vm4, %v419_v46, %v423_v32  ;;  %v527_v55 = vshll.u32 %v199_v41, 16  ;;  %v514_v61 = vor.u32 %v513_v50, %v510_v47  ;;  %v1245_v3 = vsel %vm702_vm0, %v2493_v52, 0  ;;  %v2786_v21 = vld [vmem:[%s2704_s18 + $0x3c] sm:$0xf]  ;;  %v2793_v26 = vld [vmem:[%s2704_s18 + $0x40] sm:$0xf] }
  0x24   : > { %v2757_v58 = vpack.c.b16 %v614_v48, %v613_v45  ;;  %v434_v59 = vsel %vm2736_vm4, %v429_v49, %v433_v34  ;;  %v621_v60 = vunpack.c.l.b16 %v424_v53  ;;  %v524_v0 = vor.u32 %v523_v54, %v519_v51  ;;  %1254 = vmatpush.bf16.msrb.mxu2 %v1245_v3  ;;  %v2797_v31 = vld [vmem:[%s2704_s18 + $0x44] sm:$0x1]  ;;  %v2803_v36 = vld [vmem:[%s2704_s18 + $0x6c] sm:$0xf]  ;;  %v2812_v45 = vld [vmem:[%s2704_s18 + $0x70] sm:$0xf] }
  0x25   : > { %v622_v63 = vunpack.c.l.b16 %v434_v59  ;;  %v529_v1 = vrot.slane %v527_v55, 5  ;;  %v515_v7 = vrot.slane %v514_v61, 4  ;;  %v220_v8 = vshrl.u32 %v2752_v56, 16  ;;  %v2819_v49 = vld [vmem:[%s2704_s18 + $0x74] sm:$0x1] }
  0x26   : > { %2385 = vmatmul.msk.bf16.vlgmr.msra.gmra.mxu1 %vm653_vm3, %v2757_v58  ;;  %v223_v9 = vshll.u32 %v2752_v56, 16  ;;  %v229_v10 = vshll.u32 %v2755_v57, 16  ;;  %v525_v13 = vrot.slane %v524_v0, 4  ;;  %v233_v14 = vshrl.u32 %v2755_v57, 16 }
  0x27   : > { %v2776_v12 = vpack.c.b16 %v622_v63, %v621_v60  ;;  %v239_v15 = vshll.u32 %v2762_v62, 16  ;;  %v520_v17 = vsel %vm2736_vm4, %v515_v7, %v519_v51  ;;  %v222_v18 = vrot.slane %v220_v8, 4 }
  0x28   : > { %v225_v19 = vrot.slane %v223_v9, 5  ;;  %v231_v20 = vrot.slane %v229_v10, 5  ;;  %v530_v22 = vsel %vm2736_vm4, %v525_v13, %v529_v1  ;;  %v629_v23 = vunpack.c.l.b16 %v520_v17  ;;  %v201_v10 = vld [vmem:[%s2704_s18 + $0xa0] sm:$0xf] }
  0x29   : > { %3811 = vst [vmem:[#allocation2_spill] sm:$0xff] %v2776_v12  ;;  %2389 = vmatmul.msk.bf16.vlgmr.msra.gmra.mxu2 %vm653_vm3, %v2776_v12  ;;  %v235_v24 = vrot.slane %v233_v14, 4  ;;  %v630_v27 = vunpack.c.l.b16 %v530_v22  ;;  %v241_v29 = vrot.slane %v239_v15, 5  ;;  %v1379_v30 = vsel %vm702_vm0, %v2510_v6, 0  ;;  %v200_v6 = vld [vmem:[%s2704_s18 + $0x9c] sm:$0xf] }
  0x2a   : > { %v226_v28 = vor.u32 %v225_v19, %v222_v18  ;;  %1388 = vmatpush.bf16.msrb.mxu3 %v1379_v30  ;;  %v924_v33 = vsel %vm702_vm0, %v215_v11, 0  ;;  %v1535_v34 = vsel %vm702_vm0, %v2531_v16, 0  ;;  %v340_v35 = vshrl.u32 %v2786_v21, 16  ;;  %v202_v18 = vld [vmem:[%s2704_s18 + $0xa4] sm:$0x1] }
  0x2b   : > { %v236_v32 = vor.u32 %v235_v24, %v231_v20  ;;  %v2805_v37 = vpack.c.b16 %v630_v27, %v629_v23  ;;  %933 = vmatpush.bf16.msrb.mxu1 %v924_v33  ;;  %1544 = vmatpush.bf16.msrb.mxu0 %v1535_v34  ;;  %v343_v39 = vshll.u32 %v2786_v21, 16  ;;  %v349_v40 = vshll.u32 %v2793_v26, 16 }
  0x2c   : > { %v227_v38 = vrot.slane %v226_v28, 4  ;;  %v342_v42 = vrot.slane %v340_v35, 4  ;;  %v353_v43 = vshrl.u32 %v2793_v26, 16  ;;  %v359_v44 = vshll.u32 %v2797_v31, 16 }
  0x2d   : > { %3812 = vst [vmem:[#allocation3_spill] sm:$0xff] %v2805_v37  ;;  %v237_v41 = vrot.slane %v236_v32, 4  ;;  %2393 = vmatmul.msk.bf16.vlgmr.msra.gmra.mxu3 %vm653_vm3, %v2805_v37  ;;  %v345_v47 = vrot.slane %v343_v39, 5  ;;  %v351_v48 = vrot.slane %v349_v40, 5  ;;  %v436_v50 = vshrl.u32 %v2803_v36, 16 }
  0x2e   : > { %v232_v46 = vsel %vm2736_vm4, %v227_v38, %v231_v20  ;;  %v355_v53 = vrot.slane %v353_v43, 4  ;;  %v361_v54 = vrot.slane %v359_v44, 5  ;;  %v439_v61 = vshll.u32 %v2803_v36, 16  ;;  %v2837_v39 = vld [vmem:[%s2704_s18 + $0xc] sm:$0xf] }
  0x2f   : > { %v242_v51 = vsel %vm2736_vm4, %v237_v41, %v241_v29  ;;  %v605_v52 = vunpack.c.l.b16 %v232_v46  ;;  %v346_v59 = vor.u32 %v345_v47, %v342_v42  ;;  %v438_v60 = vrot.slane %v436_v50, 4  ;;  %v2844_v43 = vld [vmem:[%s2704_s18 + $0x10] sm:$0xf]  ;;  %v2847_v44 = vld [vmem:[%s2704_s18 + $0x14] sm:$0x1] }
  0x30   : > { %v606_v55 = vunpack.c.l.b16 %v242_v51  ;;  %v356_v63 = vor.u32 %v355_v53, %v351_v48  ;;  %v445_v0 = vshll.u32 %v2812_v45, 16  ;;  %v449_v1 = vshrl.u32 %v2812_v45, 16 }
  0x31   : > { %v455_v3 = vshll.u32 %v2819_v49, 16  ;;  %v347_v8 = vrot.slane %v346_v59, 4  ;;  %v441_v9 = vrot.slane %v439_v61, 5  ;;  %v532_v19 = vshrl.u32 %v200_v6, 16 }
  0x32   : > { %v637_v7 = vpack.c.b16 %v606_v55, %v605_v52  ;;  %v357_v11 = vrot.slane %v356_v63, 4  ;;  %v447_v13 = vrot.slane %v445_v0, 5  ;;  %v451_v14 = vrot.slane %v449_v1, 4  ;;  %v2859_v63 = vld [vmem:[%s2704_s18 + $0x48] sm:$0xf] }
  0x33   : > { %v457_v15 = vrot.slane %v455_v3, 5  ;;  %v352_v16 = vsel %vm2736_vm4, %v347_v8, %v351_v48  ;;  %v442_v17 = vor.u32 %v441_v9, %v438_v60  ;;  %v535_v20 = vshll.u32 %v200_v6, 16 }
  0x34   : > { %2381 = vmatmul.msk.bf16.vlgmr.msra.gmra.mxu0 %vm653_vm3, %v637_v7  ;;  %v362_v22 = vsel %vm2736_vm4, %v357_v11, %v361_v54  ;;  %v615_v23 = vunpack.c.l.b16 %v352_v16  ;;  %v452_v24 = vor.u32 %v451_v14, %v447_v13  ;;  %v541_v27 = vshll.u32 %v201_v10, 16  ;;  %v2866_v7 = vld [vmem:[%s2704_s18 + $0x4c] sm:$0xf] }
  0x35   : > { %v616_v28 = vunpack.c.l.b16 %v362_v22  ;;  %v443_v29 = vrot.slane %v442_v17, 4  ;;  %v534_v30 = vrot.slane %v532_v19, 4  ;;  %v537_v32 = vrot.slane %v535_v20, 5 }
  0x36   : > { %v453_v33 = vrot.slane %v452_v24, 4  ;;  %v543_v34 = vrot.slane %v541_v27, 5  ;;  %v545_v35 = vshrl.u32 %v201_v10, 16  ;;  %v551_v38 = vshll.u32 %v202_v18, 16 }
  0x37   : > { %v2839_v40 = vpack.c.b16 %v616_v28, %v615_v23  ;;  %v448_v41 = vsel %vm2736_vm4, %v443_v29, %v447_v13  ;;  %v538_v42 = vor.u32 %v537_v32, %v534_v30  ;;  %v244_v53 = vshrl.u32 %v2837_v39, 16  ;;  %v2880_v23 = vld [vmem:[%s2704_s18 + $0x78] sm:$0xf] }
  0x38   : > { %v458_v46 = vsel %vm2736_vm4, %v453_v33, %v457_v15  ;;  %v623_v47 = vunpack.c.l.b16 %v448_v41  ;;  %v547_v48 = vrot.slane %v545_v35, 4  ;;  %v553_v50 = vrot.slane %v551_v38, 5  ;;  %v2871_v15 = vld [vmem:[%s2704_s18 + $0x50] sm:$0x1] }
  0x39   : > { %2386 = vmatmul.msk.bf16.gmra.mxu1 %vm653_vm3, %v2839_v40  ;;  %v624_v51 = vunpack.c.l.b16 %v458_v46  ;;  %v539_v52 = vrot.slane %v538_v42, 4  ;;  %v247_v54 = vshll.u32 %v2837_v39, 16  ;;  %v253_v59 = vshll.u32 %v2844_v43, 16  ;;  %v2888_v42 = vld [vmem:[%s2704_s18 + $0x7c] sm:$0xf] }
  0x3a   : > { %v548_v55 = vor.u32 %v547_v48, %v543_v34  ;;  %v257_v60 = vshrl.u32 %v2844_v43, 16  ;;  %v263_v61 = vshll.u32 %v2847_v44, 16  ;;  %v246_v3 = vrot.slane %v244_v53, 4  ;;  %v2891_v46 = vld [vmem:[%s2704_s18 + $0x80] sm:$0x1] }
  0x3b   : > { %v2861_v0 = vpack.c.b16 %v624_v51, %v623_v47  ;;  %v544_v1 = vsel %vm2736_vm4, %v539_v52, %v543_v34  ;;  %v249_v6 = vrot.slane %v247_v54, 5  ;;  %v255_v10 = vrot.slane %v253_v59, 5 }
  0x3c   : > { %v549_v8 = vrot.slane %v548_v55, 4  ;;  %v631_v9 = vunpack.c.l.b16 %v544_v1  ;;  %v259_v11 = vrot.slane %v257_v60, 4  ;;  %v265_v14 = vrot.slane %v263_v61, 5 }
  0x3d   : > { %2390 = vmatmul.msk.bf16.gmra.mxu2 %vm653_vm3, %v2861_v0  ;;  %v250_v13 = vor.u32 %v249_v6, %v246_v3  ;;  %v364_v16 = vshrl.u32 %v2859_v63, 16  ;;  %v367_v17 = vshll.u32 %v2859_v63, 16  ;;  %v373_v20 = vshll.u32 %v2866_v7, 16  ;;  %v2903_v6 = vld [vmem:[%s2704_s18 + $0xa8] sm:$0xf] }
  0x3e   : > { %v554_v18 = vsel %vm2736_vm4, %v549_v8, %v553_v50  ;;  %v260_v19 = vor.u32 %v259_v11, %v255_v10  ;;  %v377_v22 = vshrl.u32 %v2866_v7, 16  ;;  %v383_v34 = vshll.u32 %v2871_v15, 16  ;;  %3814 = vst [vmem:[#allocation5_spill] sm:$0xff] %v2903_v6  ;;  %v2910_v11 = vld [vmem:[%s2704_s18 + $0xac] sm:$0xf] }
  0x3f   : > { %v632_v24 = vunpack.c.l.b16 %v554_v18  ;;  %v251_v27 = vrot.slane %v250_v13, 4  ;;  %v366_v28 = vrot.slane %v364_v16, 4  ;;  %v369_v29 = vrot.slane %v367_v17, 5  ;;  %3815 = vst [vmem:[#allocation6_spill] sm:$0xff] %v2910_v11  ;;  %v2915_v18 = vld [vmem:[%s2704_s18 + $0xb0] sm:$0x1] }
  0x40   : > { %v261_v30 = vrot.slane %v260_v19, 4  ;;  %v375_v32 = vrot.slane %v373_v20, 5  ;;  %v379_v33 = vrot.slane %v377_v22, 4  ;;  %v460_v47 = vshrl.u32 %v2880_v23, 16  ;;  %3816 = vst [vmem:[#allocation7_spill] sm:$0xff] %v2915_v18 }
  0x41   : > { %v2883_v35 = vpack.c.b16 %v632_v24, %v631_v9  ;;  %v256_v38 = vsel %vm2736_vm4, %v251_v27, %v255_v10  ;;  %v370_v41 = vor.u32 %v369_v29, %v366_v28  ;;  %v385_v52 = vrot.slane %v383_v34, 5 }
  0x42   : > { %v266_v48 = vsel %vm2736_vm4, %v261_v30, %v265_v14  ;;  %v607_v50 = vunpack.c.l.b16 %v256_v38  ;;  %v380_v51 = vor.u32 %v379_v33, %v375_v32  ;;  %v462_v55 = vrot.slane %v460_v47, 4 }
  0x43   : > { %3813 = vst [vmem:[#allocation4_spill] sm:$0xff] %v2883_v35  ;;  %2394 = vmatmul.msk.bf16.gmra.mxu3 %vm653_vm3, %v2883_v35  ;;  %v608_v53 = vunpack.c.l.b16 %v266_v48  ;;  %v371_v54 = vrot.slane %v370_v41, 4  ;;  %v463_v59 = vshll.u32 %v2880_v23, 16  ;;  %v469_v61 = vshll.u32 %v2888_v42, 16 }
  0x44   : > { %v381_v60 = vrot.slane %v380_v51, 4  ;;  %v473_v1 = vshrl.u32 %v2888_v42, 16  ;;  %v479_v3 = vshll.u32 %v2891_v46, 16  ;;  %v556_v24 = vshrl.u32 %v2903_v6, 16 }
  0x45   : > { %v2905_v8 = vpack.c.b16 %v608_v53, %v607_v50  ;;  %v376_v9 = vsel %vm2736_vm4, %v371_v54, %v375_v32  ;;  %v465_v10 = vrot.slane %v463_v59, 5  ;;  %v471_v16 = vrot.slane %v469_v61, 5  ;;  %v2924_v32 = vld [vmem:[%s2704_s18 + $0x18] sm:$0xf] }
  0x46   : > { %v386_v13 = vsel %vm2736_vm4, %v381_v60, %v385_v52  ;;  %v617_v14 = vunpack.c.l.b16 %v376_v9  ;;  %v475_v17 = vrot.slane %v473_v1, 4  ;;  %v481_v22 = vrot.slane %v479_v3, 5  ;;  %v2930_v52 = vld [vmem:[%s2704_s18 + $0x1c] sm:$0xf]  ;;  %v2943_v9 = vld [vmem:[%s2704_s18 + $0x54] sm:$0xf] }
  0x47   : > { %2382 = vmatmul.msk.bf16.gmra.mxu0 %vm653_vm3, %v2905_v8  ;;  %v618_v19 = vunpack.c.l.b16 %v386_v13  ;;  %v466_v20 = vor.u32 %v465_v10, %v462_v55  ;;  %v559_v28 = vshll.u32 %v2903_v6, 16  ;;  %v565_v29 = vshll.u32 %v2910_v11, 16  ;;  %v2937_v55 = vld [vmem:[%s2704_s18 + $0x20] sm:$0x1] }
  0x48   : > { %v476_v27 = vor.u32 %v475_v17, %v471_v16  ;;  %v569_v30 = vshrl.u32 %v2910_v11, 16  ;;  %v558_v38 = vrot.slane %v556_v24, 4  ;;  %v575_v41 = vshll.u32 %v2915_v18, 16  ;;  %v3023_v11 = vld [vmem:[%s2704_s18 + $0x2c] sm:$0x1] }
  0x49   : > { %v2926_v33 = vpack.c.b16 %v618_v19, %v617_v14  ;;  %v467_v34 = vrot.slane %v466_v20, 4  ;;  %v561_v48 = vrot.slane %v559_v28, 5  ;;  %v567_v50 = vrot.slane %v565_v29, 5  ;;  %v2952_v29 = vld [vmem:[%s2704_s18 + $0x58] sm:$0xf] }
  0x4a   : > { %v477_v47 = vrot.slane %v476_v27, 4  ;;  %v571_v51 = vrot.slane %v569_v30, 4  ;;  %v577_v54 = vrot.slane %v575_v41, 5  ;;  %v268_v59 = vshrl.u32 %v2924_v32, 16 }
  0x4b   : > { %3817 = vst [vmem:[#allocation8_spill] sm:$0xff] %v2926_v33  ;;  %2387 = vmatmul.msk.bf16.gmra.mxu1 %vm653_vm3, %v2926_v33  ;;  %v472_v53 = vsel %vm2736_vm4, %v467_v34, %v471_v16  ;;  %v562_v1 = vor.u32 %v561_v48, %v558_v38  ;;  %v271_v14 = vshll.u32 %v2924_v32, 16  ;;  %v277_v16 = vshll.u32 %v2930_v52, 16  ;;  %v2960_v48 = vld [vmem:[%s2704_s18 + $0x5c] sm:$0x1] }
  0x4c   : > { %v482_v60 = vsel %vm2736_vm4, %v477_v47, %v481_v22  ;;  %v625_v61 = vunpack.c.l.b16 %v472_v53  ;;  %v572_v3 = vor.u32 %v571_v51, %v567_v50  ;;  %v270_v13 = vrot.slane %v268_v59, 4  ;;  %v2963_v51 = vld [vmem:[%s2704_s18 + $0x84] sm:$0xf] }
  0x4d   : > { %v626_v10 = vunpack.c.l.b16 %v482_v60  ;;  %v563_v17 = vrot.slane %v562_v1, 4  ;;  %v281_v20 = vshrl.u32 %v2930_v52, 16  ;;  %v287_v22 = vshll.u32 %v2937_v55, 16  ;;  %3818 = vst [vmem:[#allocation9_spill] sm:$0xff] %v2963_v51 }
  0x4e   : > { %v573_v19 = vrot.slane %v572_v3, 4  ;;  %v273_v27 = vrot.slane %v271_v14, 5  ;;  %v279_v28 = vrot.slane %v277_v16, 5  ;;  %v388_v30 = vshrl.u32 %v2943_v9, 16 }
  0x4f   : > { %v2949_v24 = vpack.c.b16 %v626_v10, %v625_v61  ;;  %v568_v34 = vsel %vm2736_vm4, %v563_v17, %v567_v50  ;;  %v283_v41 = vrot.slane %v281_v20, 4  ;;  %v289_v47 = vrot.slane %v287_v22, 5 }
  0x50   : > { %v578_v38 = vsel %vm2736_vm4, %v573_v19, %v577_v54  ;;  %v633_v53 = vunpack.c.l.b16 %v568_v34  ;;  %v274_v60 = vor.u32 %v273_v27, %v270_v13  ;;  %v390_v61 = vrot.slane %v388_v30, 4  ;;  %v2975_v27 = vld [vmem:[%s2704_s18 + $0x88] sm:$0xf] }
  0x51   : > { %2391 = vmatmul.msk.bf16.gmra.mxu2 %vm653_vm3, %v2949_v24  ;;  %v634_v59 = vunpack.c.l.b16 %v578_v38  ;;  %v284_v1 = vor.u32 %v283_v41, %v279_v28  ;;  %v391_v50 = vshll.u32 %v2943_v9, 16  ;;  %v397_v54 = vshll.u32 %v2952_v29, 16  ;;  %v2982_v38 = vld [vmem:[%s2704_s18 + $0x8c] sm:$0x1] }
  0x52   : > { %v401_v3 = vshrl.u32 %v2952_v29, 16  ;;  %v275_v14 = vrot.slane %v274_v60, 4  ;;  %v407_v16 = vshll.u32 %v2960_v48, 16  ;;  %v484_v17 = vshrl.u32 %v2963_v51, 16 }
  0x53   : > { %v2970_v10 = vpack.c.b16 %v634_v59, %v633_v53  ;;  %v285_v19 = vrot.slane %v284_v1, 4  ;;  %v393_v20 = vrot.slane %v391_v50, 5  ;;  %v399_v22 = vrot.slane %v397_v54, 5 }
  0x54   : > { %v403_v13 = vrot.slane %v401_v3, 4  ;;  %v280_v30 = vsel %vm2736_vm4, %v275_v14, %v279_v28  ;;  %v409_v34 = vrot.slane %v407_v16, 5  ;;  %v486_v41 = vrot.slane %v484_v17, 4  ;;  %v2990_v14 = vld [vmem:[%s2704_s18 + $0xb4] sm:$0xf] }
  0x55   : > { %3819 = vst [vmem:[#allocation10_spill] sm:$0xff] %v2970_v10  ;;  %2395 = vmatmul.msk.bf16.gmra.mxu3 %vm653_vm3, %v2970_v10  ;;  %v487_v53 = vshll.u32 %v2963_v51, 16  ;;  %v290_v59 = vsel %vm2736_vm4, %v285_v19, %v289_v47  ;;  %v609_v60 = vunpack.c.l.b16 %v280_v30  ;;  %v394_v1 = vor.u32 %v393_v20, %v390_v61  ;;  %v2996_v61 = vld [vmem:[%s2704_s18 + $0xb8] sm:$0xf] }
  0x56   : > { %v404_v50 = vor.u32 %v403_v13, %v399_v22  ;;  %v610_v54 = vunpack.c.l.b16 %v290_v59  ;;  %v493_v10 = vshll.u32 %v2975_v27, 16  ;;  %v497_v28 = vshrl.u32 %v2975_v27, 16  ;;  %3820 = vst [vmem:[#allocation11_spill] sm:$0xff] %v2990_v14  ;;  %v3003_v59 = vld [vmem:[%s2704_s18 + $0xbc] sm:$0x1] }
  0x57   : > { %v489_v3 = vrot.slane %v487_v53, 5  ;;  %v395_v16 = vrot.slane %v394_v1, 4  ;;  %v503_v6 = vshll.u32 %v2982_v38, 16  ;;  %3821 = vst [vmem:[#allocation12_spill] sm:$0xff] %v2996_v61  ;;  %v580_v1 = vshrl.u32 %v2990_v14, 16 }
  0x58   : > { %v405_v17 = vrot.slane %v404_v50, 4  ;;  %v2993_v18 = vpack.c.b16 %v610_v54, %v609_v60  ;;  %v495_v19 = vrot.slane %v493_v10, 5  ;;  %v499_v30 = vrot.slane %v497_v28, 4  ;;  %3822 = vst [vmem:[#allocation13_spill] sm:$0xff] %v3003_v59 }
  0x59   : > { %v490_v47 = vor.u32 %v489_v3, %v486_v41  ;;  %v400_v20 = vsel %vm2736_vm4, %v395_v16, %v399_v22  ;;  %v505_v53 = vrot.slane %v503_v6, 5  ;;  %v582_v54 = vrot.slane %v580_v1, 4 }
  0x5a   : > { %v410_v13 = vsel %vm2736_vm4, %v405_v17, %v409_v34  ;;  %2383 = vmatmul.msk.bf16.gmra.mxu0 %vm653_vm3, %v2993_v18  ;;  %v619_v10 = vunpack.c.l.b16 %v400_v20  ;;  %v500_v50 = vor.u32 %v499_v30, %v495_v19  ;;  %v583_v22 = vshll.u32 %v2990_v14, 16  ;;  %v3012_v34 = vld [vmem:[%s2704_s18 + $0x24] sm:$0xf] }
  0x5b   : > { %v620_v41 = vunpack.c.l.b16 %v410_v13  ;;  %v491_v60 = vrot.slane %v490_v47, 4  ;;  %v589_v3 = vshll.u32 %v2996_v61, 16  ;;  %v593_v6 = vshrl.u32 %v2996_v61, 16  ;;  %v3020_v47 = vld [vmem:[%s2704_s18 + $0x28] sm:$0xf] }
  0x5c   : > { %v501_v17 = vrot.slane %v500_v50, 4  ;;  %v599_v20 = vshll.u32 %v3003_v59, 16  ;;  %v585_v13 = vrot.slane %v583_v22, 5  ;;  %v1039_v61 = vrot.slane %v2762_v62, 5 }
  0x5d   : > { %v3014_v28 = vpack.c.b16 %v620_v41, %v619_v10  ;;  %v496_v16 = vsel %vm2736_vm4, %v491_v60, %v495_v19  ;;  %v591_v1 = vrot.slane %v589_v3, 5  ;;  %v595_v14 = vrot.slane %v593_v6, 4 }
  0x5e   : > { %v627_v30 = vunpack.c.l.b16 %v496_v16  ;;  %v506_v10 = vsel %vm2736_vm4, %v501_v17, %v505_v53  ;;  %v601_v19 = vrot.slane %v599_v20, 5  ;;  %v292_v41 = vshrl.u32 %v3012_v34, 16  ;;  %v2566_v17 = vld [vmem:[%s3767_s1 + $0xc] sm:$0x3] }
  0x5f   : > { %3823 = vst [vmem:[#allocation14_spill] sm:$0xff] %v3014_v28  ;;  %2388 = vmatmul.msk.bf16.gmra.mxu1 %vm653_vm3, %v3014_v28  ;;  %v628_v60 = vunpack.c.l.b16 %v506_v10  ;;  %v586_v50 = vor.u32 %v585_v13, %v582_v54  ;;  %v596_v59 = vor.u32 %v595_v14, %v591_v1  ;;  %v295_v22 = vshll.u32 %v3012_v34, 16  ;;  %v2587_v13 = vld [vmem:[%s3767_s1 + $0xe] sm:$0x3] }
  0x60   : > { %v294_v3 = vrot.slane %v292_v41, 4  ;;  %v301_v6 = vshll.u32 %v3020_v47, 16  ;;  %v305_v16 = vshrl.u32 %v3020_v47, 16  ;;  %v311_v62 = vshll.u32 %v3023_v11, 16  ;;  %v2549_v41 = vld [vmem:[%s3767_s1 + $0xa] sm:$0x3] }
  0x61   : > { %v3035_v35 = vpack.c.b16 %v628_v60, %v627_v30  ;;  %v587_v37 = vrot.slane %v586_v50, 4  ;;  %v597_v51 = vrot.slane %v596_v59, 4  ;;  %v297_v53 = vrot.slane %v295_v22, 5  ;;  %v2605_v60 = vld [vmem:[%s3767_s1 + $0x10] sm:$0x3] }
  0x62   : > { %v303_v54 = vrot.slane %v301_v6, 5  ;;  %v307_v14 = vrot.slane %v305_v16, 4  ;;  %v313_v20 = vrot.slane %v311_v62, 5  ;;  %vm1032_vm6 = vcmask 1046532  }
  0x63   : > { %3824 = vst [vmem:[#allocation15_spill] sm:$0xff] %v3035_v35  ;;  %2392 = vmatmul.msk.bf16.gmra.mxu2 %vm653_vm3, %v3035_v35  ;;  %v592_v30 = vsel %vm2736_vm4, %v587_v37, %v591_v1  ;;  %v602_v59 = vsel %vm2736_vm4, %v597_v51, %v601_v19  ;;  %v298_v10 = vor.u32 %v297_v53, %v294_v3  ;;  %vm3055_vm7 = vmor %vm1031_vm5, %vm1032_vm6  ;;  %v2477_v37 = vrot.slane %v2752_v56, 9 }
  0x64   : > { %v635_v50 = vunpack.c.l.b16 %v592_v30  ;;  %v636_v22 = vunpack.c.l.b16 %v602_v59  ;;  %v308_v6 = vor.u32 %v307_v14, %v303_v54  ;;  %v1036_v1 = vrot.slane %v2755_v57, 5 }
  0x65   : > { %v299_v51 = vrot.slane %v298_v10, 4  ;;  %v1809_v19 = vsel %vm702_vm0, %v2566_v17, 0  ;;  %v1965_v3 = vsel %vm702_vm0, %v2587_v13, 0  ;;  %v1675_v14 = vsel %vm702_vm0, %v2549_v41, 0 }
  0x66   : > { %v3063_v62 = vpack.c.b16 %v636_v22, %v635_v50  ;;  %v309_v53 = vrot.slane %v308_v6, 4  ;;  %1818 = vmatpush.bf16.msra.mxu2 %v1809_v19  ;;  %1974 = vmatpush.bf16.msra.mxu3 %v1965_v3  ;;  %v2105_v30 = vsel %vm702_vm0, %v2605_v60, 0  ;;  %v1037_v57 = vsel %vm3055_vm7, %v2477_v37, %v1036_v1  ;;  %v2624_v6 = vld [vmem:[%s2704_s18] sm:$0xff]  ;;  %v2625_v3 = vld [vmem:[%s2704_s18 + $0xc] sm:$0xff] }
  0x67   : > { %v304_v56 = vsel %vm2736_vm4, %v299_v51, %v303_v54  ;;  %v1038_v59 = vrot.slane %v1036_v1, 4  ;;  %1684 = vmatpush.bf16.msra.mxu1 %v1675_v14  ;;  %2114 = vmatpush.bf16.msra.mxu0 %v2105_v30  ;;  %v2478_v17 = vrot.slane %v2837_v39, 9  ;;  %v1148_v41 = vunpack.c.l.b16 %v1037_v57  ;;  %v3102_v14 = vld [vmem:[%s2704_s18 + $0x18] sm:$0xff] }
  0x68   : > { %2396 = vmatmul.msk.bf16.gmra.mxu3 %vm653_vm3, %v3063_v62  ;;  %v314_v13 = vsel %vm2736_vm4, %v309_v53, %v313_v20  ;;  %v611_v10 = vunpack.c.l.b16 %v304_v56  ;;  %v1043_v60 = vrot.slane %v2844_v43, 5  ;;  %v1046_v22 = vrot.slane %v2847_v44, 5 }
  0x69   : > { %v612_v50 = vunpack.c.l.b16 %v314_v13  ;;  %v1040_v54 = vsel %vm3055_vm7, %v1038_v59, %v1039_v61  ;;  %v1050_v53 = vrot.slane %v2930_v52, 5  ;;  %v2479_v30 = vrot.slane %v2924_v32, 9  ;;  %v3122_v13 = vld [vmem:[%s2704_s18 + $0x24] sm:$0xff] }
  0x6a   : > { %v1149_v37 = vunpack.c.l.b16 %v1040_v54  ;;  %v1044_v39 = vsel %vm3055_vm7, %v2478_v17, %v1043_v60  ;;  %v1045_v51 = vrot.slane %v1043_v60, 4  ;;  %v1053_v57 = vrot.slane %v2937_v55, 5 }
  0x6b   : > { %v3083_v1 = vpack.c.b16 %v612_v50, %v611_v10  ;;  %v1150_v20 = vunpack.c.l.b16 %v1044_v39  ;;  %v1052_v56 = vrot.slane %v1050_v53, 4  ;;  %v1057_v55 = vrot.slane %v3020_v47, 5 }
  0x6c   : > { %v1180_v19 = vpack.c.b16 %v1149_v37, %v1148_v41  ;;  %v1047_v43 = vsel %vm3055_vm7, %v1045_v51, %v1046_v22  ;;  %v2480_v10 = vrot.slane %v3012_v34, 9  ;;  %v1060_v60 = vrot.slane %v3023_v11, 5  ;;  %v3144_v37 = vld [vmem:[%s2704_s18 + $0x30] sm:$0xff] }
  0x6d   : > { %2384 = vmatmul.msk.bf16.gmra.mxu0 %vm653_vm3, %v3083_v1  ;;  %v1151_v61 = vunpack.c.l.b16 %v1047_v43  ;;  %v1054_v52 = vsel %vm3055_vm7, %v1052_v56, %v1053_v57  ;;  %v1059_v41 = vrot.slane %v1057_v55, 4  ;;  %v1064_v11 = vrot.slane %v2720_v4, 5  ;;  %v3172_v57 = vld [vmem:[%s2704_s18 + $0x3c] sm:$0xff] }
  0x6e   : > { %v1153_v17 = vunpack.c.l.b16 %v1054_v52  ;;  %v1058_v50 = vsel %vm3055_vm7, %v2480_v10, %v1057_v55  ;;  %v2481_v39 = vrot.slane %v2716_v2, 9 }
  0x6f   : > { %2461 = vmatmul.msk.bf16.vlgmr.msrb.gmra.mxu1 %vm653_vm3, %v2624_v6  ;;  %v3090_v44 = vpack.c.b16 %v1151_v61, %v1150_v20  ;;  %v1061_v47 = vsel %vm3055_vm7, %v1059_v41, %v1060_v60  ;;  %v1154_v54 = vunpack.c.l.b16 %v1058_v50  ;;  %v1066_v51 = vrot.slane %v1064_v11, 4 }
  0x70   : > { %v1155_v22 = vunpack.c.l.b16 %v1061_v47  ;;  %v1067_v20 = vrot.slane %v2723_v5, 5 }
  0x72   : > { %v3136_v34 = vpack.c.b16 %v1155_v22, %v1154_v54  ;;  %v1068_v4 = vsel %vm3055_vm7, %v1066_v51, %v1067_v20  ;;  %v1078_v22 = vrot.slane %v2866_v7, 5  ;;  %v2483_v51 = vrot.slane %v2859_v63, 9 }
  0x73   : > { %2494 = vmatmul.msk.bf16.vlgmr.msrb.gmra.mxu2 %vm653_vm3, %v1180_v19  ;;  %v1065_v19 = vsel %vm3055_vm7, %v2481_v39, %v1064_v11  ;;  %v1157_v61 = vunpack.c.l.b16 %v1068_v4  ;;  %v3206_v39 = vld [vmem:[%s2704_s18 + $0x48] sm:$0xff] }
  0x74   : > { %v1156_v43 = vunpack.c.l.b16 %v1065_v19  ;;  %3829 = vst [vmem:[#allocation18_spill] sm:$0xff] %v3206_v39  ;;  %v1080_v20 = vrot.slane %v1078_v22, 4  ;;  %v1081_v19 = vrot.slane %v2871_v15, 5  ;;  %v1079_v7 = vsel %vm3055_vm7, %v2483_v51, %v1078_v22 }
  0x75   : > { %v1160_v63 = vunpack.c.l.b16 %v1079_v7  ;;  %v2484_v22 = vrot.slane %v2943_v9, 9 }
  0x76   : > { %v3164_v5 = vpack.c.b16 %v1157_v61, %v1156_v43  ;;  %v1082_v61 = vsel %vm3055_vm7, %v1080_v20, %v1081_v19  ;;  %v1088_v20 = vrot.slane %v2960_v48, 5 }
  0x78   : > { %2515 = vmatmul.msk.bf16.vlgmr.msrb.gmra.mxu3 %vm653_vm3, %v2625_v3 }
  0x7d   : > { %2532 = vmatmul.msk.bf16.vlgmr.msrb.gmra.mxu0 %vm653_vm3, %v2905_v8  ;;  %v1051_v8 = vsel %vm3055_vm7, %v2479_v30, %v1050_v53  ;;  %v1071_v30 = vrot.slane %v2793_v26, 5 }
  0x7e   : > { %v1152_v59 = vunpack.c.l.b16 %v1051_v8  ;;  %v2482_v8 = vrot.slane %v2786_v21, 9 }
  0x7f   : > { %2462 = vmatmul.msk.bf16.gmra.mxu1 %vm653_vm3, %v2625_v3  ;;  %v1073_v52 = vrot.slane %v1071_v30, 4 }
  0x80   : > { %v3116_v32 = vpack.c.b16 %v1153_v17, %v1152_v59  ;;  %v1074_v59 = vrot.slane %v2797_v31, 5  ;;  %v1072_v26 = vsel %vm3055_vm7, %v2482_v8, %v1071_v30  ;;  %v1161_v8 = vunpack.c.l.b16 %v1082_v61 }
  0x81   : > { %v1158_v60 = vunpack.c.l.b16 %v1072_v26  ;;  %v1085_v26 = vrot.slane %v2952_v29, 5 }
  0x82   : > { %v1075_v10 = vsel %vm3055_vm7, %v1073_v52, %v1074_v59  ;;  %v3230_v59 = vpack.c.b16 %v1161_v8, %v1160_v63 }
  0x83   : > { %2495 = vmatmul.msk.bf16.gmra.mxu2 %vm653_vm3, %v3090_v44  ;;  %v1159_v31 = vunpack.c.l.b16 %v1075_v10  ;;  %v1087_v51 = vrot.slane %v1085_v26, 4  ;;  %v1086_v29 = vsel %vm3055_vm7, %v2484_v22, %v1085_v26  ;;  %v2655_v22 = vld [vmem:[%s2704_s18 + $0x64] sm:$0xf] }
  0x84   : > { %3832 = vst [vmem:[#allocation21_spill] sm:$0xff] %v3230_v59  ;;  %v1162_v63 = vunpack.c.l.b16 %v1086_v29 }
  0x85   : > { %v3196_v47 = vpack.c.b16 %v1159_v31, %v1158_v60  ;;  %v3240_v31 = vld [vmem:[%s2704_s18 + $0x54] sm:$0xff]  ;;  %v1089_v61 = vsel %vm3055_vm7, %v1087_v51, %v1088_v20  ;;  %v1092_v51 = vrot.slane %v2655_v22, 5 }
  0x86   : > { %3833 = vst [vmem:[#allocation22_spill] sm:$0xff] %v3240_v31  ;;  %v1163_v48 = vunpack.c.l.b16 %v1089_v61  ;;  %v2656_v61 = vld [vmem:[%s2704_s18 + $0x68] sm:$0x1] }
  0x88   : > { %2516 = vmatmul.msk.bf16.gmra.mxu3 %vm653_vm3, %v3102_v14 }
  0x8d   : > { %2533 = vmatmul.msk.bf16.gmra.mxu0 %vm653_vm3, %v2993_v18 }
  0x8f   : > { %2463 = vmatmul.msk.bf16.gmra.mxu1 %vm653_vm3, %v3102_v14 }
  0x93   : > { %2496 = vmatmul.msk.bf16.gmra.mxu2 %vm653_vm3, %v3116_v32 }
  0x98   : > { %2517 = vmatmul.msk.bf16.gmra.mxu3 %vm653_vm3, %v3122_v13 }
  0x9d   : > { %2534 = vmatmul.msk.bf16.gmra.mxu0 %vm653_vm3, %v3083_v1 }
  0x9f   : > { %2464 = vmatmul.msk.bf16.gmra.mxu1 %vm653_vm3, %v3122_v13 }
  0xa3   : > { %v3139_v6 = vpop.f32.mrf.mxu1  ;;  %2497 = vmatmul.msk.bf16.gmra.mxu2 %vm653_vm3, %v3136_v34 }
  0xa8   : > { %2518 = vmatmul.msk.bf16.gmra.mxu3 %vm653_vm3, %v3144_v37 }
  0xab   : > { %v3156_v53 = vpop.f32.mrf.mxu1 }
  0xac   : > { %v3154_v3 = vpop.f32.mrf.mxu2 }
  0xad   : > { %2535 = vmatmul.msk.bf16.gmra.mxu0 %vm653_vm3, %v2757_v58 }
  0xaf   : > { %2465 = vmatmul.msk.bf16.gmra.mxu1 %vm653_vm3, %v3144_v37 }
  0xb0   : > { %v3167_v56 = vpop.f32.mrf.mxu3 }
  0xb1   : > { %v3162_v2 = vpop.f32.mrf.mxu0  ;;  %3827 = vst [vmem:[#allocation16_spill] sm:$0xff] %v3167_v56 }
  0xb3   : > { %2498 = vmatmul.msk.bf16.gmra.mxu2 %vm653_vm3, %v3164_v5 }
  0xb4   : > { %v3176_v17 = vpop.f32.mrf.mxu2 }
  0xb6   : > { %v3178_v55 = vpop.f32.mrf.mxu1 }
  0xb8   : > { %2519 = vmatmul.msk.bf16.gmra.mxu3 %vm653_vm3, %v3172_v57  ;;  %v3188_v21 = vpop.f32.mrf.mxu3 }
  0xb9   : > { %v3186_v41 = vpop.f32.mrf.mxu0  ;;  %3828 = vst [vmem:[#allocation17_spill] sm:$0xff] %v3188_v21 }
  0xbd   : > { %2536 = vmatmul.msk.bf16.gmra.mxu0 %vm653_vm3, %v2839_v40 }
  0xbe   : > { %v3192_v50 = vpop.f32.mrf.mxu1 }
  0xbf   : > { %2466 = vmatmul.msk.bf16.gmra.mxu1 %vm653_vm3, %v3172_v57 }
  0xc0   : > { %v3198_v54 = vpop.f32.mrf.mxu2 }
  0xc3   : > { %2499 = vmatmul.msk.bf16.gmra.mxu2 %vm653_vm3, %v3196_v47 }
  0xc4   : > { %v3201_v11 = vpop.f32.mrf.mxu0 }
  0xc6   : > { %v3210_v4 = vpop.f32.mrf.mxu3 }
  0xc7   : > { %3830 = vst [vmem:[#allocation19_spill] sm:$0xff] %v3210_v4  ;;  %v3275_v4 = vld [vmem:[%s2704_s18 + $0x60] sm:$0xff] }
  0xc8   : > { %v3212_v43 = vpop.f32.mrf.mxu1  ;;  %2520 = vmatmul.msk.bf16.gmra.mxu3 %vm653_vm3, %v3206_v39  ;;  %v3220_v30 = vpop.f32.mrf.mxu2  ;;  %3837 = vst [vmem:[#allocation26_spill] sm:$0xff] %v3275_v4 }
  0xcc   : > { %v3224_v15 = vpop.f32.mrf.mxu0 }
  0xcd   : > { %2537 = vmatmul.msk.bf16.gmra.mxu0 %vm653_vm3, %v2926_v33 }
  0xce   : > { %v3226_v52 = vpop.f32.mrf.mxu3 }
  0xcf   : > { %3831 = vst [vmem:[#allocation20_spill] sm:$0xff] %v3226_v52  ;;  %2467 = vmatmul.msk.bf16.gmra.mxu1 %vm653_vm3, %v3206_v39  ;;  %v1095_v52 = vrot.slane %v2656_v61, 5 }
  0xd0   : > { %v3233_v10 = vpop.f32.mrf.mxu1 }
  0xd3   : > { %2500 = vmatmul.msk.bf16.gmra.mxu2 %vm653_vm3, %v3230_v59 }
  0xd4   : > { %v3237_v60 = vpop.f32.mrf.mxu2 }
  0xd7   : > { %v3244_v19 = vpop.f32.mrf.mxu0 }
  0xd8   : > { %v3246_v7 = vpop.f32.mrf.mxu3  ;;  %2521 = vmatmul.msk.bf16.gmra.mxu3 %vm653_vm3, %v3240_v31 }
  0xd9   : > { %3834 = vst [vmem:[#allocation23_spill] sm:$0xff] %v3246_v7  ;;  %v3262_v7 = vpack.c.b16 %v1163_v48, %v1162_v63 }
  0xdb   : > { %3835 = vst [vmem:[#allocation24_spill] sm:$0xff] %v3262_v7 }
  0xdc   : > { %v3254_v9 = vpop.f32.mrf.mxu1  ;;  %v3256_v8 = vpop.f32.mrf.mxu2 }
  0xdd   : > { %2538 = vmatmul.msk.bf16.gmra.mxu0 %vm653_vm3, %v3014_v28  ;;  %v2657_v28 = vld [vmem:[%s2704_s18 + $0x60] sm:$0xf] }
  0xde   : > { %v2485_v21 = vrot.slane %v2657_v28, 9 }
  0xdf   : > { %2468 = vmatmul.msk.bf16.gmra.mxu1 %vm653_vm3, %v3240_v31  ;;  %v3264_v26 = vpop.f32.mrf.mxu0  ;;  %v1094_v31 = vrot.slane %v1092_v51, 4 }
  0xe0   : > { %v3267_v20 = vpop.f32.mrf.mxu3  ;;  %v1093_v48 = vsel %vm3055_vm7, %v2485_v21, %v1092_v51 }
  0xe1   : > { %3836 = vst [vmem:[#allocation25_spill] sm:$0xff] %v3267_v20  ;;  %v1096_v22 = vsel %vm3055_vm7, %v1094_v31, %v1095_v52  ;;  %v1164_v59 = vunpack.c.l.b16 %v1093_v48  ;;  %v1099_v52 = vrot.slane %v2812_v45, 5  ;;  %v3308_v48 = vld [vmem:[%s2704_s18 + $0x6c] sm:$0xff] }
  0xe2   : > { %v1165_v28 = vunpack.c.l.b16 %v1096_v22 }
  0xe3   : > { %2501 = vmatmul.msk.bf16.gmra.mxu2 %vm653_vm3, %v3262_v7 }
  0xe4   : > { %v3271_v29 = vpop.f32.mrf.mxu1  ;;  %v3297_v21 = vpack.c.b16 %v1165_v28, %v1164_v59  ;;  %v1101_v59 = vrot.slane %v1099_v52, 4 }
  0xe6   : > { %v3278_v63 = vpop.f32.mrf.mxu2  ;;  %3840 = vst [vmem:[#allocation29_spill] sm:$0xff] %v3297_v21 }
  0xe8   : > { %2522 = vmatmul.msk.bf16.gmra.mxu3 %vm653_vm3, %v3275_v4 }
  0xea   : > { %v3286_v20 = vpop.f32.mrf.mxu0 }
  0xeb   : > { %v3288_v61 = vpop.f32.mrf.mxu3 }
  0xec   : > { %3838 = vst [vmem:[#allocation27_spill] sm:$0xff] %v3288_v61  ;;  %v935_v7 = vpop.f32.mrf.mxu1  ;;  %v2486_v61 = vrot.slane %v2803_v36, 9 }
  0xed   : > { %v936_v33 = vadd.f32 %v935_v7, %v3162_v2  ;;  %2539 = vmatmul.msk.bf16.gmra.mxu0 %vm653_vm3, %v2776_v12  ;;  %v1102_v7 = vrot.slane %v2819_v49, 5 }
  0xee   : > { %v3293_v56 = vpop.f32.mrf.mxu2  ;;  %v1100_v45 = vsel %vm3055_vm7, %v2486_v61, %v1099_v52 }
  0xef   : > { %3839 = vst [vmem:[#allocation28_spill] sm:$0xff] %v3293_v56  ;;  %2469 = vmatmul.msk.bf16.gmra.mxu1 %vm653_vm3, %v3275_v4  ;;  %v1166_v39 = vunpack.c.l.b16 %v1100_v45 }
  0xf2   : > { %v3300_v31 = vpop.f32.mrf.mxu0 }
  0xf3   : > { %v3302_v51 = vpop.f32.mrf.mxu3  ;;  %2502 = vmatmul.msk.bf16.gmra.mxu2 %vm653_vm3, %v3297_v21 }
  0xf4   : > { %3841 = vst [vmem:[#allocation30_spill] sm:$0xff] %v3302_v51  ;;  %v937_v2 = vpop.f32.mrf.mxu1  ;;  %v1103_v51 = vsel %vm3055_vm7, %v1101_v59, %v1102_v7  ;;  %v1106_v7 = vrot.slane %v2888_v42, 5 }
  0xf5   : > { %v938_v22 = vadd.f32 %v937_v2, %v3186_v41  ;;  %v1167_v56 = vunpack.c.l.b16 %v1103_v51  ;;  %v1109_v51 = vrot.slane %v2891_v46, 5 }
  0xf6   : > { %v1256_v28 = vpop.f32.mrf.mxu2 }
  0xf7   : > { %v1336_v12 = vadd.f32 %v1256_v28, %v936_v33  ;;  %v3325_v2 = vpack.c.b16 %v1167_v56, %v1166_v39  ;;  %v3332_v28 = vld [vmem:[%s2704_s18 + $0x78] sm:$0xff] }
  0xf8   : > { %2523 = vmatmul.msk.bf16.gmra.mxu3 %vm653_vm3, %v3308_v48 }
  0xfa   : > { %v1546_v21 = vpop.f32.mrf.mxu0 }
  0xfb   : > { %v1390_v49 = vpop.f32.mrf.mxu3 }
  0xfc   : > { %v940_v4 = vpop.f32.mrf.mxu1  ;;  %v1470_v41 = vadd.f32 %v1390_v49, %v1336_v12 }
  0xfd   : > { %v941_v36 = vadd.f32 %v940_v4, %v3201_v11  ;;  %2540 = vmatmul.msk.bf16.gmra.mxu0 %vm653_vm3, %v2861_v0 }
  0xfe   : > { %v1258_v33 = vpop.f32.mrf.mxu2  ;;  %v3323_v61 = vadd.f32 %v1546_v21, %v1470_v41  ;;  %v2487_v21 = vrot.slane %v2880_v23, 9 }
  0xff   : > { %2470 = vmatmul.msk.bf16.gmra.mxu1 %vm653_vm3, %v3308_v48  ;;  %v1337_v52 = vadd.f32 %v1258_v33, %v938_v22  ;;  %v1108_v22 = vrot.slane %v1106_v7, 4 }
 0x100   : > { %v1107_v46 = vsel %vm3055_vm7, %v2487_v21, %v1106_v7 }
 0x101   : > { %v1110_v49 = vsel %vm3055_vm7, %v1108_v22, %v1109_v51  ;;  %v1116_v22 = vrot.slane %v2982_v38, 5 }
 0x102   : > { %v1548_v59 = vpop.f32.mrf.mxu0 }
 0x103   : > { %v1392_v12 = vpop.f32.mrf.mxu3  ;;  %2503 = vmatmul.msk.bf16.gmra.mxu2 %vm653_vm3, %v3325_v2 }
 0x104   : > { %v942_v11 = vpop.f32.mrf.mxu1  ;;  %v1471_v4 = vadd.f32 %v1392_v12, %v1337_v52  ;;  %v1169_v12 = vunpack.c.l.b16 %v1110_v49 }
 0x105   : > { %v943_v45 = vadd.f32 %v942_v11, %v3224_v15  ;;  %v1168_v15 = vunpack.c.l.b16 %v1107_v46  ;;  %v3358_v46 = vld [vmem:[%s2704_s18 + $0x84] sm:$0xff] }
 0x106   : > { %v1261_v56 = vpop.f32.mrf.mxu2  ;;  %v3336_v39 = vadd.f32 %v1548_v59, %v1471_v4  ;;  %v1113_v4 = vrot.slane %v2975_v27, 5 }
 0x107   : > { %v1338_v42 = vadd.f32 %v1261_v56, %v941_v36  ;;  %v3351_v51 = vpack.c.b16 %v1169_v12, %v1168_v15 }
 0x108   : > { %2524 = vmatmul.msk.bf16.gmra.mxu3 %vm653_vm3, %v3332_v28 }
 0x10a   : > { %v1551_v41 = vpop.f32.mrf.mxu0 }
 0x10b   : > { %v1395_v33 = vpop.f32.mrf.mxu3 }
 0x10c   : > { %v945_v52 = vpop.f32.mrf.mxu1  ;;  %v1472_v23 = vadd.f32 %v1395_v33, %v1338_v42 }
 0x10d   : > { %v946_v59 = vadd.f32 %v945_v52, %v3244_v19  ;;  %2541 = vmatmul.msk.bf16.gmra.mxu0 %vm653_vm3, %v2949_v24 }
 0x10e   : > { %v1263_v36 = vpop.f32.mrf.mxu2  ;;  %v3349_v7 = vadd.f32 %v1551_v41, %v1472_v23  ;;  %v3842_v41 = vld [vmem:[#allocation9_spill] sm:$0xff] }
 0x10f   : > { %2471 = vmatmul.msk.bf16.gmra.mxu1 %vm653_vm3, %v3332_v28  ;;  %v1339_v11 = vadd.f32 %v1263_v36, %v943_v45  ;;  %v2488_v33 = vrot.slane %v3842_v41, 9  ;;  %v1115_v45 = vrot.slane %v1113_v4, 4  ;;  %v2658_v41 = vld [vmem:[%s2704_s18 + $0x94] sm:$0xf] }
 0x111   : > { %v1114_v38 = vsel %vm3055_vm7, %v2488_v33, %v1113_v4  ;;  %v1117_v12 = vsel %vm3055_vm7, %v1115_v45, %v1116_v22  ;;  %v1120_v33 = vrot.slane %v2658_v41, 5 }
 0x112   : > { %v1553_v21 = vpop.f32.mrf.mxu0 }
 0x113   : > { %v1397_v56 = vpop.f32.mrf.mxu3  ;;  %2504 = vmatmul.msk.bf16.gmra.mxu2 %vm653_vm3, %v3351_v51 }
 0x114   : > { %v947_v19 = vpop.f32.mrf.mxu1  ;;  %v1473_v42 = vadd.f32 %v1397_v56, %v1339_v11  ;;  %v1170_v11 = vunpack.c.l.b16 %v1114_v38  ;;  %v1171_v56 = vunpack.c.l.b16 %v1117_v12 }
 0x115   : > { %v948_v49 = vadd.f32 %v947_v19, %v3264_v26 }
 0x116   : > { %v1266_v52 = vpop.f32.mrf.mxu2  ;;  %v3362_v15 = vadd.f32 %v1553_v21, %v1473_v42  ;;  %v3377_v42 = vpack.c.b16 %v1171_v56, %v1170_v11 }
 0x117   : > { %v1340_v27 = vadd.f32 %v1266_v52, %v946_v59  ;;  %v2659_v52 = vld [vmem:[%s2704_s18 + $0x98] sm:$0x1] }
 0x118   : > { %2525 = vmatmul.msk.bf16.gmra.mxu3 %vm653_vm3, %v3358_v46  ;;  %3844 = vst [vmem:[#allocation31_spill] sm:$0xff] %v3377_v42 }
 0x11a   : > { %v1556_v23 = vpop.f32.mrf.mxu0 }
 0x11b   : > { %v1400_v26 = vpop.f32.mrf.mxu3 }
 0x11c   : > { %v950_v36 = vpop.f32.mrf.mxu1  ;;  %v1474_v19 = vadd.f32 %v1400_v26, %v1340_v27  ;;  %v1123_v27 = vrot.slane %v2659_v52, 5  ;;  %v3384_v26 = vld [vmem:[%s2704_s18 + $0x90] sm:$0xff] }
 0x11d   : > { %v951_v21 = vadd.f32 %v950_v36, %v3286_v20  ;;  %2542 = vmatmul.msk.bf16.gmra.mxu0 %vm653_vm3, %v3035_v35  ;;  %3845 = vst [vmem:[#allocation32_spill] sm:$0xff] %v3384_v26 }
 0x11e   : > { %v1268_v59 = vpop.f32.mrf.mxu2  ;;  %v3375_v4 = vadd.f32 %v1556_v23, %v1474_v19  ;;  %v2660_v23 = vld [vmem:[%s2704_s18 + $0x90] sm:$0xf] }
 0x11f   : > { %2472 = vmatmul.msk.bf16.gmra.mxu1 %vm653_vm3, %v3358_v46  ;;  %v1341_v22 = vadd.f32 %v1268_v59, %v948_v49  ;;  %v2489_v19 = vrot.slane %v2660_v23, 9  ;;  %v1122_v49 = vrot.slane %v1120_v33, 4 }
 0x120   : > { %3843 = vst [vmem:[#allocation9_spill] sm:$0xff] %v3375_v4  ;;  %v2663_v4 = vld [vmem:[%s2704_s18 + $0x9c] sm:$0xf] }
 0x121   : > { %v1121_v41 = vsel %vm3055_vm7, %v2489_v19, %v1120_v33  ;;  %v2661_v19 = vld [vmem:[%s2704_s18 + $0xa0] sm:$0xf] }
 0x122   : > { %v1558_v45 = vpop.f32.mrf.mxu0 }
 0x123   : > { %v1402_v20 = vpop.f32.mrf.mxu3  ;;  %2505 = vmatmul.msk.bf16.gmra.mxu2 %vm653_vm3, %v3377_v42 }
 0x124   : > { %v952_v38 = vpop.f32.mrf.mxu1  ;;  %v1475_v12 = vadd.f32 %v1402_v20, %v1341_v22  ;;  %v1124_v22 = vsel %vm3055_vm7, %v1122_v49, %v1123_v27  ;;  %v1127_v49 = vrot.slane %v2661_v19, 5 }
 0x125   : > { %v953_v36 = vadd.f32 %v952_v38, %v3300_v31  ;;  %v1172_v38 = vunpack.c.l.b16 %v1121_v41  ;;  %v1173_v23 = vunpack.c.l.b16 %v1124_v22  ;;  %v2662_v22 = vld [vmem:[%s2704_s18 + $0xa4] sm:$0x1] }
 0x126   : > { %v1271_v11 = vpop.f32.mrf.mxu2  ;;  %v3388_v56 = vadd.f32 %v1558_v45, %v1475_v12  ;;  %v3847_v45 = vld [vmem:[#allocation3_spill] sm:$0xff] }
 0x127   : > { %v1342_v59 = vadd.f32 %v1271_v11, %v951_v21  ;;  %v3402_v27 = vpack.c.b16 %v1173_v23, %v1172_v38 }
 0x128   : > { %3846 = vst [vmem:[#allocation33_spill] sm:$0xff] %v3388_v56  ;;  %2526 = vmatmul.msk.bf16.gmra.mxu3 %vm653_vm3, %v3384_v26  ;;  %v3409_v56 = vld [vmem:[%s2704_s18 + $0x9c] sm:$0xff] }
 0x129   : > { %3849 = vst [vmem:[#allocation35_spill] sm:$0xff] %v3402_v27 }
 0x12a   : > { %v1561_v52 = vpop.f32.mrf.mxu0  ;;  %3850 = vst [vmem:[#allocation36_spill] sm:$0xff] %v3409_v56 }
 0x12b   : > { %v1405_v20 = vpop.f32.mrf.mxu3 }
 0x12c   : > { %v955_v31 = vpop.f32.mrf.mxu1  ;;  %v1476_v42 = vadd.f32 %v1405_v20, %v1342_v59  ;;  %v1130_v20 = vrot.slane %v2662_v22, 5 }
 0x12d   : > { %2543 = vmatmul.msk.bf16.gmra.mxu0 %vm653_vm3, %v3847_v45 }
 0x12e   : > { %v1273_v21 = vpop.f32.mrf.mxu2  ;;  %v3400_v33 = vadd.f32 %v1561_v52, %v1476_v42  ;;  %v1129_v42 = vrot.slane %v1127_v49, 4 }
 0x12f   : > { %2473 = vmatmul.msk.bf16.gmra.mxu1 %vm653_vm3, %v3384_v26  ;;  %v1343_v12 = vadd.f32 %v1273_v21, %v953_v36  ;;  %v2490_v26 = vrot.slane %v2663_v4, 9  ;;  %v956_v36 = vadd.f32 %v955_v31, %v3139_v6  ;;  %v3852_v31 = vld [vmem:[#allocation4_spill] sm:$0xff] }
 0x130   : > { %3848 = vst [vmem:[#allocation34_spill] sm:$0xff] %v3400_v33 }
 0x131   : > { %v1128_v21 = vsel %vm3055_vm7, %v2490_v26, %v1127_v49 }
 0x132   : > { %v1563_v11 = vpop.f32.mrf.mxu0  ;;  %v1174_v4 = vunpack.c.l.b16 %v1128_v21 }
 0x133   : > { %v1407_v41 = vpop.f32.mrf.mxu3  ;;  %2506 = vmatmul.msk.bf16.gmra.mxu2 %vm653_vm3, %v3402_v27 }
 0x134   : > { %v957_v59 = vpop.f32.mrf.mxu1  ;;  %v1477_v45 = vadd.f32 %v1407_v41, %v1343_v12  ;;  %v1131_v12 = vsel %vm3055_vm7, %v1129_v42, %v1130_v20  ;;  %v3855_v42 = vld [vmem:[#allocation6_spill] sm:$0xff] }
 0x135   : > { %v1175_v27 = vunpack.c.l.b16 %v1131_v12  ;;  %v3856_v12 = vld [vmem:[#allocation7_spill] sm:$0xff] }
 0x136   : > { %v1276_v52 = vpop.f32.mrf.mxu2  ;;  %v3413_v38 = vadd.f32 %v1563_v11, %v1477_v45  ;;  %v958_v45 = vadd.f32 %v957_v59, %v3156_v53  ;;  %v3435_v59 = vld [vmem:[%s2704_s18 + $0xa8] sm:$0xff] }
 0x137   : > { %v1344_v23 = vadd.f32 %v1276_v52, %v956_v36  ;;  %v3428_v20 = vpack.c.b16 %v1175_v27, %v1174_v4  ;;  %v1134_v36 = vrot.slane %v3855_v42, 5  ;;  %3857 = vst [vmem:[#allocation6_spill] sm:$0xff] %v3435_v59 }
 0x138   : > { %3851 = vst [vmem:[#allocation37_spill] sm:$0xff] %v3413_v38  ;;  %2527 = vmatmul.msk.bf16.gmra.mxu3 %vm653_vm3, %v3409_v56 }
 0x139   : > { %3854 = vst [vmem:[#allocation39_spill] sm:$0xff] %v3428_v20 }
 0x13a   : > { %v1566_v19 = vpop.f32.mrf.mxu0 }
 0x13b   : > { %v1410_v41 = vpop.f32.mrf.mxu3 }
 0x13c   : > { %v960_v22 = vpop.f32.mrf.mxu1  ;;  %v1478_v6 = vadd.f32 %v1410_v41, %v1344_v23  ;;  %v1137_v41 = vrot.slane %v3856_v12, 5 }
 0x13d   : > { %2544 = vmatmul.msk.bf16.gmra.mxu0 %vm653_vm3, %v3852_v31  ;;  %v3858_v31 = vld [vmem:[#allocation5_spill] sm:$0xff] }
 0x13e   : > { %v1278_v11 = vpop.f32.mrf.mxu2  ;;  %v3426_v26 = vadd.f32 %v1566_v19, %v1478_v6  ;;  %v2491_v38 = vrot.slane %v3858_v31, 9  ;;  %v1136_v19 = vrot.slane %v1134_v36, 4  ;;  %v961_v6 = vadd.f32 %v960_v22, %v3178_v55 }
 0x13f   : > { %2474 = vmatmul.msk.bf16.gmra.mxu1 %vm653_vm3, %v3409_v56  ;;  %v1345_v49 = vadd.f32 %v1278_v11, %v958_v45 }
 0x140   : > { %3853 = vst [vmem:[#allocation38_spill] sm:$0xff] %v3426_v26  ;;  %v1135_v11 = vsel %vm3055_vm7, %v2491_v38, %v1134_v36  ;;  %v3453_v38 = vld [vmem:[%s2704_s18 + $0xc0] sm:$0xf] }
 0x141   : > { %v1176_v12 = vunpack.c.l.b16 %v1135_v11  ;;  %3861 = vst [vmem:[#allocation5_spill] sm:$0xff] %v3453_v38  ;;  %v1503_v11 = vshrl.u32 %v3453_v38, 16 }
 0x142   : > { %v1568_v52 = vpop.f32.mrf.mxu0 }
 0x143   : > { %v1412_v21 = vpop.f32.mrf.mxu3  ;;  %2507 = vmatmul.msk.bf16.gmra.mxu2 %vm653_vm3, %v3428_v20  ;;  %v3860_v20 = vld [vmem:[#allocation10_spill] sm:$0xff] }
 0x144   : > { %v962_v23 = vpop.f32.mrf.mxu1  ;;  %v1479_v53 = vadd.f32 %v1412_v21, %v1345_v49  ;;  %v1138_v49 = vsel %vm3055_vm7, %v1136_v19, %v1137_v41 }
 0x145   : > { %v1177_v55 = vunpack.c.l.b16 %v1138_v49 }
 0x146   : > { %v1281_v27 = vpop.f32.mrf.mxu2  ;;  %v3439_v4 = vadd.f32 %v1568_v52, %v1479_v53  ;;  %v963_v52 = vadd.f32 %v962_v23, %v3192_v50  ;;  %v1506_v50 = vshll.u32 %v3453_v38, 16 }
 0x147   : > { %v1346_v45 = vadd.f32 %v1281_v27, %v961_v6  ;;  %v3457_v19 = vpack.c.b16 %v1177_v55, %v1176_v12  ;;  %v3460_v6 = vld [vmem:[%s2704_s18 + $0xc4] sm:$0xf]  ;;  %v3865_v27 = vld [vmem:[#allocation12_spill] sm:$0xff]  ;;  %v3866_v12 = vld [vmem:[#allocation13_spill] sm:$0xff] }
 0x148   : > { %3859 = vst [vmem:[#allocation7_spill] sm:$0xff] %v3439_v4  ;;  %2528 = vmatmul.msk.bf16.gmra.mxu3 %vm653_vm3, %v3435_v59  ;;  %v1512_v23 = vshll.u32 %v3460_v6, 16  ;;  %v1144_v55 = vrot.slane %v3866_v12, 5  ;;  %v1505_v4 = vrot.slane %v1503_v11, 4  ;;  %v1508_v26 = vrot.slane %v1506_v50, 5 }
 0x149   : > { %3863 = vst [vmem:[#allocation41_spill] sm:$0xff] %v3457_v19 }
 0x14a   : > { %v1571_v42 = vpop.f32.mrf.mxu0  ;;  %3864 = vst [vmem:[#allocation42_spill] sm:$0xff] %v3460_v6 }
 0x14b   : > { %v1415_v31 = vpop.f32.mrf.mxu3 }
 0x14c   : > { %v965_v21 = vpop.f32.mrf.mxu1  ;;  %v1480_v22 = vadd.f32 %v1415_v31, %v1346_v45  ;;  %v1141_v45 = vrot.slane %v3865_v27, 5  ;;  %v1516_v31 = vshrl.u32 %v3460_v6, 16  ;;  %v1514_v6 = vrot.slane %v1512_v23, 5 }
 0x14d   : > { %2545 = vmatmul.msk.bf16.gmra.mxu0 %vm653_vm3, %v3860_v20  ;;  %v966_v38 = vadd.f32 %v965_v21, %v3212_v43  ;;  %v1509_v21 = vor.u32 %v1508_v26, %v1505_v4 }
 0x14e   : > { %v1283_v53 = vpop.f32.mrf.mxu2  ;;  %v3455_v36 = vadd.f32 %v1571_v42, %v1480_v22  ;;  %v1518_v56 = vrot.slane %v1516_v31, 4 }
 0x14f   : > { %2475 = vmatmul.msk.bf16.gmra.mxu1 %vm653_vm3, %v3435_v59  ;;  %v1347_v41 = vadd.f32 %v1283_v53, %v963_v52  ;;  %v3471_v52 = vld [vmem:[%s2704_s18 + $0xb4] sm:$0xff]  ;;  %v3867_v53 = vld [vmem:[#allocation11_spill] sm:$0xff] }
 0x150   : > { %3862 = vst [vmem:[#allocation40_spill] sm:$0xff] %v3455_v36  ;;  %v2492_v27 = vrot.slane %v3867_v53, 9  ;;  %v1143_v36 = vrot.slane %v1141_v45, 4  ;;  %v1519_v11 = vor.u32 %v1518_v56, %v1514_v6 }
 0x152   : > { %v1573_v49 = vpop.f32.mrf.mxu0  ;;  %v1520_v26 = vrot.slane %v1519_v11, 4 }
 0x153   : > { %v1417_v20 = vpop.f32.mrf.mxu3  ;;  %2508 = vmatmul.msk.bf16.gmra.mxu2 %vm653_vm3, %v3457_v19  ;;  %v3478_v19 = vld [vmem:[%s2704_s18 + $0xc8] sm:$0x1] }
 0x154   : > { %v967_v42 = vpop.f32.mrf.mxu1  ;;  %v1481_v22 = vadd.f32 %v1417_v20, %v1347_v41  ;;  %v1142_v20 = vsel %vm3055_vm7, %v2492_v27, %v1141_v45  ;;  %v1145_v41 = vsel %vm3055_vm7, %v1143_v36, %v1144_v55  ;;  %v1522_v50 = vshll.u32 %v3478_v19, 16 }
 0x155   : > { %v1178_v31 = vunpack.c.l.b16 %v1142_v20  ;;  %v968_v12 = vadd.f32 %v967_v42, %v3233_v10  ;;  %v1510_v36 = vrot.slane %v1509_v21, 4 }
 0x156   : > { %v1286_v59 = vpop.f32.mrf.mxu2  ;;  %v3475_v33 = vadd.f32 %v1573_v49, %v1481_v22  ;;  %v1524_v56 = vrot.slane %v1522_v50, 5 }
 0x157   : > { %v1348_v35 = vadd.f32 %v1286_v59, %v966_v38  ;;  %v1179_v59 = vunpack.c.l.b16 %v1145_v41  ;;  %v3503_v41 = vld [vmem:[%s2704_s18 + $0xc0] sm:$0xff] }
 0x158   : > { %2529 = vmatmul.msk.bf16.gmra.mxu3 %vm653_vm3, %v3471_v52  ;;  %v1525_v10 = vsel %vm2736_vm4, %v1520_v26, %v1524_v56 }
 0x159   : > { %v3494_v22 = vpack.c.b16 %v1179_v59, %v1178_v31  ;;  %v1529_v11 = vunpack.c.l.b16 %v1525_v10 }
 0x15a   : > { %v1576_v43 = vpop.f32.mrf.mxu0 }
 0x15b   : > { %v1420_v23 = vpop.f32.mrf.mxu3 }
 0x15c   : > { %v970_v49 = vpop.f32.mrf.mxu1  ;;  %v1482_v38 = vadd.f32 %v1420_v23, %v1348_v35  ;;  %v1515_v35 = vsel %vm2736_vm4, %v1510_v36, %v1514_v6 }
 0x15d   : > { %2546 = vmatmul.msk.bf16.gmra.mxu0 %vm653_vm3, %v3063_v62  ;;  %v1528_v21 = vunpack.c.l.b16 %v1515_v35 }
 0x15e   : > { %v1288_v45 = vpop.f32.mrf.mxu2  ;;  %v3492_v4 = vadd.f32 %v1576_v43, %v1482_v38  ;;  %v971_v43 = vadd.f32 %v970_v49, %v3254_v9 }
 0x15f   : > { %2476 = vmatmul.msk.bf16.gmra.mxu1 %vm653_vm3, %v3471_v52  ;;  %v1349_v55 = vadd.f32 %v1288_v45, %v968_v12  ;;  %v3510_v6 = vpack.c.b16 %v1529_v11, %v1528_v21 }
 0x162   : > { %v1578_v53 = vpop.f32.mrf.mxu0 }
 0x163   : > { %v1422_v42 = vpop.f32.mrf.mxu3  ;;  %2509 = vmatmul.msk.bf16.gmra.mxu2 %vm653_vm3, %v3494_v22 }
 0x164   : > { %v972_v27 = vpop.f32.mrf.mxu1  ;;  %v1483_v20 = vadd.f32 %v1422_v42, %v1349_v55 }
 0x165   : > { %v973_v9 = vadd.f32 %v972_v27, %v3271_v29 }
 0x166   : > { %v1291_v50 = vpop.f32.mrf.mxu2  ;;  %v3506_v23 = vadd.f32 %v1578_v53, %v1483_v20 }
 0x167   : > { %v1350_v31 = vadd.f32 %v1291_v50, %v971_v43 }
 0x168   : > { %2530 = vmatmul.msk.bf16.gmra.mxu3 %vm653_vm3, %v3503_v41 }
 0x16a   : > { %v1581_v59 = vpop.f32.mrf.mxu0 }
 0x16b   : > { %v1425_v38 = vpop.f32.mrf.mxu3 }
 0x16c   : > { %v975_v12 = vpop.f32.mrf.mxu1  ;;  %v1484_v45 = vadd.f32 %v1425_v38, %v1350_v31 }
 0x16d   : > { %2547 = vmatmul.msk.bf16.gmra.mxu0 %vm653_vm3, %v3510_v6  ;;  %v976_v10 = vadd.f32 %v975_v12, %v3154_v3 }
 0x16e   : > { %v1293_v49 = vpop.f32.mrf.mxu2  ;;  %v3517_v36 = vadd.f32 %v1581_v59, %v1484_v45 }
 0x16f   : > { %2550 = vmatmul.msk.bf16.vlgmr.msra.gmra.mxu1 %vm653_vm3, %v3090_v44  ;;  %v1351_v26 = vadd.f32 %v1293_v49, %v973_v9 }
 0x172   : > { %v1583_v56 = vpop.f32.mrf.mxu0 }
 0x173   : > { %v1427_v55 = vpop.f32.mrf.mxu3  ;;  %2571 = vmatmul.msk.bf16.vlgmr.msra.gmra.mxu2 %vm653_vm3, %v3102_v14 }
 0x174   : > { %v977_v53 = vpop.f32.mrf.mxu1  ;;  %v1485_v35 = vadd.f32 %v1427_v55, %v1351_v26 }
 0x175   : > { %v978_v14 = vadd.f32 %v977_v53, %v3176_v17 }
 0x176   : > { %v1296_v42 = vpop.f32.mrf.mxu2  ;;  %v3522_v20 = vadd.f32 %v1583_v56, %v1485_v35 }
 0x177   : > { %v1352_v29 = vadd.f32 %v1296_v42, %v976_v10 }
 0x178   : > { %2588 = vmatmul.msk.bf16.vlgmr.msra.gmra.mxu3 %vm653_vm3, %v2993_v18 }
 0x17a   : > { %v1586_v44 = vpop.f32.mrf.mxu0 }
 0x17b   : > { %v1430_v27 = vpop.f32.mrf.mxu3 }
 0x17c   : > { %v980_v43 = vpop.f32.mrf.mxu1  ;;  %v1486_v21 = vadd.f32 %v1430_v27, %v1352_v29 }
 0x17d   : > { %2606 = vmatmul.msk.bf16.vlgmr.msra.gmra.mxu0 %vm653_vm3, %v3116_v32  ;;  %v981_v12 = vadd.f32 %v980_v43, %v3198_v54 }
 0x17e   : > { %v1298_v11 = vpop.f32.mrf.mxu2  ;;  %v3531_v3 = vadd.f32 %v1586_v44, %v1486_v21 }
 0x17f   : > { %2551 = vmatmul.msk.bf16.gmra.mxu1 %vm653_vm3, %v3116_v32  ;;  %v1353_v50 = vadd.f32 %v1298_v11, %v978_v14 }
 0x182   : > { %v1588_v31 = vpop.f32.mrf.mxu0 }
 0x183   : > { %v1432_v59 = vpop.f32.mrf.mxu3  ;;  %2572 = vmatmul.msk.bf16.gmra.mxu2 %vm653_vm3, %v3122_v13 }
 0x184   : > { %v982_v18 = vpop.f32.mrf.mxu1  ;;  %v1487_v38 = vadd.f32 %v1432_v59, %v1353_v50 }
 0x185   : > { %v983_v13 = vadd.f32 %v982_v18, %v3220_v30 }
 0x186   : > { %v1301_v45 = vpop.f32.mrf.mxu2  ;;  %v3536_v9 = vadd.f32 %v1588_v31, %v1487_v38 }
 0x187   : > { %v1354_v17 = vadd.f32 %v1301_v45, %v981_v12 }
 0x188   : > { %2589 = vmatmul.msk.bf16.gmra.mxu3 %vm653_vm3, %v3083_v1 }
 0x18a   : > { %v1591_v32 = vpop.f32.mrf.mxu0 }
 0x18b   : > { %v1435_v49 = vpop.f32.mrf.mxu3 }
 0x18c   : > { %v985_v26 = vpop.f32.mrf.mxu1  ;;  %v1488_v56 = vadd.f32 %v1435_v49, %v1354_v17 }
 0x18d   : > { %2607 = vmatmul.msk.bf16.gmra.mxu0 %vm653_vm3, %v3136_v34  ;;  %v986_v29 = vadd.f32 %v985_v26, %v3237_v60  ;;  %v3868_v26 = vld [vmem:[#allocation28_spill] sm:$0xff] }
 0x18e   : > { %v1303_v55 = vpop.f32.mrf.mxu2  ;;  %v3545_v54 = vadd.f32 %v1591_v32, %v1488_v56 }
 0x18f   : > { %2552 = vmatmul.msk.bf16.gmra.mxu1 %vm653_vm3, %v3136_v34  ;;  %v1355_v53 = vadd.f32 %v1303_v55, %v983_v13 }
 0x192   : > { %v1593_v35 = vpop.f32.mrf.mxu0 }
 0x193   : > { %v1437_v10 = vpop.f32.mrf.mxu3  ;;  %2573 = vmatmul.msk.bf16.gmra.mxu2 %vm653_vm3, %v3144_v37 }
 0x194   : > { %v987_v1 = vpop.f32.mrf.mxu1  ;;  %v1489_v42 = vadd.f32 %v1437_v10, %v1355_v53 }
 0x195   : > { %v988_v37 = vadd.f32 %v987_v1, %v3256_v8  ;;  %v3870_v1 = vld [vmem:[#allocation16_spill] sm:$0xff] }
 0x196   : > { %v1306_v44 = vpop.f32.mrf.mxu2  ;;  %v3550_v27 = vadd.f32 %v1593_v35, %v1489_v42  ;;  %v3869_v35 = vld [vmem:[#allocation18_spill] sm:$0xff] }
 0x197   : > { %v1356_v30 = vadd.f32 %v1306_v44, %v986_v29 }
 0x198   : > { %2590 = vmatmul.msk.bf16.gmra.mxu3 %vm653_vm3, %v2757_v58 }
 0x19a   : > { %v1596_v34 = vpop.f32.mrf.mxu0 }
 0x19b   : > { %v1440_v43 = vpop.f32.mrf.mxu3 }
 0x19c   : > { %v990_v21 = vpop.f32.mrf.mxu1  ;;  %v1490_v14 = vadd.f32 %v1440_v43, %v1356_v30 }
 0x19d   : > { %2608 = vmatmul.msk.bf16.gmra.mxu0 %vm653_vm3, %v3164_v5  ;;  %v991_v38 = vadd.f32 %v990_v21, %v3278_v63 }
 0x19e   : > { %v1308_v11 = vpop.f32.mrf.mxu2  ;;  %v3559_v60 = vadd.f32 %v1596_v34, %v1490_v14  ;;  %v3871_v34 = vld [vmem:[#allocation8_spill] sm:$0xff] }
 0x19f   : > { %2553 = vmatmul.msk.bf16.gmra.mxu1 %vm653_vm3, %v3164_v5  ;;  %v1357_v50 = vadd.f32 %v1308_v11, %v988_v37  ;;  %v3872_v37 = vld [vmem:[#allocation21_spill] sm:$0xff] }
 0x1a0   : > { %v3873_v11 = vld [vmem:[#allocation17_spill] sm:$0xff] }
 0x1a2   : > { %v1598_v31 = vpop.f32.mrf.mxu0 }
 0x1a3   : > { %v1442_v59 = vpop.f32.mrf.mxu3  ;;  %2574 = vmatmul.msk.bf16.gmra.mxu2 %vm653_vm3, %v3172_v57 }
 0x1a4   : > { %v992_v58 = vpop.f32.mrf.mxu1  ;;  %v1491_v18 = vadd.f32 %v1442_v59, %v1357_v50 }
 0x1a5   : > { %v993_v57 = vadd.f32 %v992_v58, %v3868_v26 }
 0x1a6   : > { %v1311_v12 = vpop.f32.mrf.mxu2  ;;  %v3564_v45 = vadd.f32 %v1598_v31, %v1491_v18 }
 0x1a7   : > { %v1358_v8 = vadd.f32 %v1311_v12, %v991_v38  ;;  %v3874_v12 = vld [vmem:[#allocation22_spill] sm:$0xff] }
 0x1a8   : > { %2591 = vmatmul.msk.bf16.gmra.mxu3 %vm653_vm3, %v2839_v40 }
 0x1aa   : > { %v1601_v5 = vpop.f32.mrf.mxu0 }
 0x1ab   : > { %v1445_v17 = vpop.f32.mrf.mxu3 }
 0x1ac   : > { %v995_v32 = vpop.f32.mrf.mxu1  ;;  %v1492_v49 = vadd.f32 %v1445_v17, %v1358_v8  ;;  %v3875_v17 = vld [vmem:[#allocation19_spill] sm:$0xff] }
 0x1ad   : > { %2609 = vmatmul.msk.bf16.gmra.mxu0 %vm653_vm3, %v3196_v47  ;;  %v996_v42 = vadd.f32 %v995_v32, %v3870_v1 }
 0x1ae   : > { %v1313_v56 = vpop.f32.mrf.mxu2  ;;  %v3573_v63 = vadd.f32 %v1601_v5, %v1492_v49 }
 0x1af   : > { %2554 = vmatmul.msk.bf16.gmra.mxu1 %vm653_vm3, %v3196_v47  ;;  %v1359_v13 = vadd.f32 %v1313_v56, %v993_v57  ;;  %v3876_v56 = vld [vmem:[#allocation14_spill] sm:$0xff] }
 0x1b2   : > { %v1603_v55 = vpop.f32.mrf.mxu0 }
 0x1b3   : > { %v1447_v53 = vpop.f32.mrf.mxu3  ;;  %2575 = vmatmul.msk.bf16.gmra.mxu2 %vm653_vm3, %v3869_v35 }
 0x1b4   : > { %v997_v40 = vpop.f32.mrf.mxu1  ;;  %v1493_v10 = vadd.f32 %v1447_v53, %v1359_v13 }
 0x1b5   : > { %v998_v50 = vadd.f32 %v997_v40, %v3873_v11  ;;  %v3877_v40 = vld [vmem:[#allocation24_spill] sm:$0xff] }
 0x1b6   : > { %v1316_v29 = vpop.f32.mrf.mxu2  ;;  %v3578_v44 = vadd.f32 %v1603_v55, %v1493_v10  ;;  %v3878_v10 = vld [vmem:[#allocation20_spill] sm:$0xff] }
 0x1b7   : > { %v1360_v30 = vadd.f32 %v1316_v29, %v996_v42 }
 0x1b8   : > { %2592 = vmatmul.msk.bf16.gmra.mxu3 %vm653_vm3, %v3871_v34 }
 0x1ba   : > { %v1606_v47 = vpop.f32.mrf.mxu0 }
 0x1bb   : > { %v1450_v43 = vpop.f32.mrf.mxu3 }
 0x1bc   : > { %v1000_v21 = vpop.f32.mrf.mxu1  ;;  %v1494_v14 = vadd.f32 %v1450_v43, %v1360_v30  ;;  %v3879_v43 = vld [vmem:[#allocation26_spill] sm:$0xff] }
 0x1bd   : > { %2610 = vmatmul.msk.bf16.gmra.mxu0 %vm653_vm3, %v3872_v37  ;;  %v1001_v32 = vadd.f32 %v1000_v21, %v3875_v17  ;;  %v3882_v17 = vld [vmem:[#allocation29_spill] sm:$0xff] }
 0x1be   : > { %v1318_v31 = vpop.f32.mrf.mxu2  ;;  %v3587_v59 = vadd.f32 %v1606_v47, %v1494_v14 }
 0x1bf   : > { %2555 = vmatmul.msk.bf16.gmra.mxu1 %vm653_vm3, %v3872_v37  ;;  %v1361_v58 = vadd.f32 %v1318_v31, %v998_v50  ;;  %v3880_v37 = vld [vmem:[#allocation23_spill] sm:$0xff] }
 0x1c2   : > { %v1608_v18 = vpop.f32.mrf.mxu0 }
 0x1c3   : > { %v1452_v38 = vpop.f32.mrf.mxu3  ;;  %2576 = vmatmul.msk.bf16.gmra.mxu2 %vm653_vm3, %v3874_v12 }
 0x1c4   : > { %v1002_v8 = vpop.f32.mrf.mxu1  ;;  %v1495_v5 = vadd.f32 %v1452_v38, %v1361_v58 }
 0x1c5   : > { %v1003_v1 = vadd.f32 %v1002_v8, %v3878_v10  ;;  %v3884_v10 = vld [vmem:[#allocation27_spill] sm:$0xff] }
 0x1c6   : > { %v1321_v49 = vpop.f32.mrf.mxu2  ;;  %v3592_v26 = vadd.f32 %v1608_v18, %v1495_v5  ;;  %v3881_v18 = vld [vmem:[#allocation2_spill] sm:$0xff] }
 0x1c7   : > { %v1362_v57 = vadd.f32 %v1321_v49, %v1001_v32  ;;  %v3883_v32 = vld [vmem:[#allocation25_spill] sm:$0xff] }
 0x1c8   : > { %2593 = vmatmul.msk.bf16.gmra.mxu3 %vm653_vm3, %v3876_v56 }
 0x1ca   : > { %v1611_v13 = vpop.f32.mrf.mxu0 }
 0x1cb   : > { %v1455_v55 = vpop.f32.mrf.mxu3 }
 0x1cc   : > { %v1005_v53 = vpop.f32.mrf.mxu1  ;;  %v1496_v35 = vadd.f32 %v1455_v55, %v1362_v57 }
 0x1cd   : > { %2611 = vmatmul.msk.bf16.gmra.mxu0 %vm653_vm3, %v3877_v40  ;;  %v1006_v11 = vadd.f32 %v1005_v53, %v3880_v37 }
 0x1ce   : > { %v1323_v42 = vpop.f32.mrf.mxu2  ;;  %v3601_v29 = vadd.f32 %v1611_v13, %v1496_v35 }
 0x1cf   : > { %2556 = vmatmul.msk.bf16.gmra.mxu1 %vm653_vm3, %v3877_v40  ;;  %v1363_v30 = vadd.f32 %v1323_v42, %v1003_v1 }
 0x1d2   : > { %v1613_v34 = vpop.f32.mrf.mxu0 }
 0x1d3   : > { %v1457_v47 = vpop.f32.mrf.mxu3  ;;  %2577 = vmatmul.msk.bf16.gmra.mxu2 %vm653_vm3, %v3879_v43 }
 0x1d4   : > { %v1007_v21 = vpop.f32.mrf.mxu1  ;;  %v1497_v14 = vadd.f32 %v1457_v47, %v1363_v30 }
 0x1d5   : > { %v1008_v49 = vadd.f32 %v1007_v21, %v3883_v32 }
 0x1d6   : > { %v1326_v50 = vpop.f32.mrf.mxu2  ;;  %v3606_v31 = vadd.f32 %v1613_v34, %v1497_v14 }
 0x1d7   : > { %v1364_v58 = vadd.f32 %v1326_v50, %v1006_v11 }
 0x1d8   : > { %2594 = vmatmul.msk.bf16.gmra.mxu3 %vm653_vm3, %v3881_v18 }
 0x1da   : > { %v1616_v38 = vpop.f32.mrf.mxu0 }
 0x1db   : > { %v1460_v12 = vpop.f32.mrf.mxu3 }
 0x1dc   : > { %v1010_v8 = vpop.f32.mrf.mxu1  ;;  %v1498_v5 = vadd.f32 %v1460_v12, %v1364_v58 }
 0x1dd   : > { %2612 = vmatmul.msk.bf16.gmra.mxu0 %vm653_vm3, %v3882_v17  ;;  %v1011_v1 = vadd.f32 %v1010_v8, %v3884_v10 }
 0x1de   : > { %v1328_v57 = vpop.f32.mrf.mxu2  ;;  %v3615_v56 = vadd.f32 %v1616_v38, %v1498_v5 }
 0x1df   : > { %2557 = vmatmul.msk.bf16.gmra.mxu1 %vm653_vm3, %v3882_v17  ;;  %v1365_v13 = vadd.f32 %v1328_v57, %v1008_v49 }
 0x1e2   : > { %v1618_v55 = vpop.f32.mrf.mxu0 }
 0x1e3   : > { %v1462_v53 = vpop.f32.mrf.mxu3  ;;  %2578 = vmatmul.msk.bf16.gmra.mxu2 %vm653_vm3, %v3308_v48  ;;  %v3885_v48 = vld [vmem:[#allocation30_spill] sm:$0xff] }
 0x1e4   : > { %v1012_v35 = vpop.f32.mrf.mxu1  ;;  %v1499_v40 = vadd.f32 %v1462_v53, %v1365_v13 }
 0x1e5   : > { %v1013_v11 = vadd.f32 %v1012_v35, %v3885_v48 }
 0x1e6   : > { %v1331_v42 = vpop.f32.mrf.mxu2  ;;  %v3620_v30 = vadd.f32 %v1618_v55, %v1499_v40 }
 0x1e7   : > { %v1366_v34 = vadd.f32 %v1331_v42, %v1011_v1 }
 0x1e8   : > { %2595 = vmatmul.msk.bf16.gmra.mxu3 %vm653_vm3, %v2861_v0 }
 0x1ea   : > { %v1621_v47 = vpop.f32.mrf.mxu0 }
 0x1eb   : > { %v1465_v43 = vpop.f32.mrf.mxu3 }
 0x1ec   : > { %v1686_v21 = vpop.f32.mrf.mxu1  ;;  %v1500_v14 = vadd.f32 %v1465_v43, %v1366_v34 }
 0x1ed   : > { %v1766_v37 = vadd.f32 %v1686_v21, %v3323_v61  ;;  %2613 = vmatmul.msk.bf16.gmra.mxu0 %vm653_vm3, %v3325_v2 }
 0x1ee   : > { %v1333_v50 = vpop.f32.mrf.mxu2  ;;  %v3630_v58 = vadd.f32 %v1621_v47, %v1500_v14  ;;  %v3886_v14 = vld [vmem:[#allocation15_spill] sm:$0xff] }
 0x1ef   : > { %2558 = vmatmul.msk.bf16.gmra.mxu1 %vm653_vm3, %v3325_v2  ;;  %v1367_v18 = vadd.f32 %v1333_v50, %v1013_v11 }
 0x1f2   : > { %v1623_v38 = vpop.f32.mrf.mxu0 }
 0x1f3   : > { %v1467_v0 = vpop.f32.mrf.mxu3  ;;  %2579 = vmatmul.msk.bf16.gmra.mxu2 %vm653_vm3, %v3332_v28 }
 0x1f4   : > { %v1688_v12 = vpop.f32.mrf.mxu1  ;;  %v1501_v8 = vadd.f32 %v1467_v0, %v1367_v18  ;;  %v3887_v18 = vld [vmem:[#allocation9_spill] sm:$0xff] }
 0x1f5   : > { %v1767_v61 = vadd.f32 %v1688_v12, %v3336_v39 }
 0x1f6   : > { %v1820_v5 = vpop.f32.mrf.mxu2  ;;  %v3635_v17 = vadd.f32 %v1623_v38, %v1501_v8  ;;  %v3888_v38 = vld [vmem:[#allocation31_spill] sm:$0xff] }
 0x1f7   : > { %v1900_v32 = vadd.f32 %v1820_v5, %v1766_v37 }
 0x1f8   : > { %2596 = vmatmul.msk.bf16.gmra.mxu3 %vm653_vm3, %v2949_v24 }
 0x1fa   : > { %v2116_v2 = vpop.f32.mrf.mxu0 }
 0x1fb   : > { %v1976_v49 = vpop.f32.mrf.mxu3 }
 0x1fc   : > { %v1691_v57 = vpop.f32.mrf.mxu1  ;;  %v2056_v13 = vadd.f32 %v1976_v49, %v1900_v32  ;;  %v3889_v49 = vld [vmem:[#allocation32_spill] sm:$0xff] }
 0x1fd   : > { %v1768_v55 = vadd.f32 %v1691_v57, %v3349_v7  ;;  %2614 = vmatmul.msk.bf16.gmra.mxu0 %vm653_vm3, %v3351_v51 }
 0x1fe   : > { %v2196_v28 = vadd.f32 %v2116_v2, %v2056_v13  ;;  %v1822_v53 = vpop.f32.mrf.mxu2 }
 0x1ff   : > { %2559 = vmatmul.msk.bf16.gmra.mxu1 %vm653_vm3, %v3351_v51  ;;  %v1901_v39 = vadd.f32 %v1822_v53, %v1767_v61 }
 0x200   : > { %v2269_v47 = vmul.f32 %v2196_v28, %v2196_v28 }
 0x202   : > { %v2118_v35 = vpop.f32.mrf.mxu0 }
 0x203   : > { %v1978_v40 = vpop.f32.mrf.mxu3  ;;  %2580 = vmatmul.msk.bf16.gmra.mxu2 %vm653_vm3, %v3358_v46 }
 0x204   : > { %v1693_v24 = vpop.f32.mrf.mxu1  ;;  %v2057_v10 = vadd.f32 %v1978_v40, %v1901_v39 }
 0x205   : > { %v1769_v1 = vadd.f32 %v1693_v24, %v3362_v15 }
 0x206   : > { %v2197_v42 = vadd.f32 %v2118_v35, %v2057_v10  ;;  %v1825_v7 = vpop.f32.mrf.mxu2  ;;  %v3891_v10 = vld [vmem:[#allocation3_spill] sm:$0xff] }
 0x207   : > { %v1902_v34 = vadd.f32 %v1825_v7, %v1768_v55  ;;  %v3890_v55 = vld [vmem:[#allocation33_spill] sm:$0xff] }
 0x208   : > { %v2229_v43 = vadd.f32 %v2197_v42, %v2196_v28  ;;  %v2270_v21 = vmul.f32 %v2197_v42, %v2197_v42  ;;  %2597 = vmatmul.msk.bf16.gmra.mxu3 %vm653_vm3, %v3886_v14  ;;  %v3893_v14 = vld [vmem:[#allocation35_spill] sm:$0xff] }
 0x20a   : > { %v2301_v51 = vadd.f32 %v2270_v21, %v2269_v47  ;;  %v2121_v37 = vpop.f32.mrf.mxu0 }
 0x20b   : > { %v1981_v48 = vpop.f32.mrf.mxu3 }
 0x20c   : > { %v1696_v11 = vpop.f32.mrf.mxu1  ;;  %v2058_v50 = vadd.f32 %v1981_v48, %v1902_v34 }
 0x20d   : > { %v1770_v46 = vadd.f32 %v1696_v11, %v3887_v18  ;;  %2615 = vmatmul.msk.bf16.gmra.mxu0 %vm653_vm3, %v3888_v38 }
 0x20e   : > { %v2198_v15 = vadd.f32 %v2121_v37, %v2058_v50  ;;  %v1827_v0 = vpop.f32.mrf.mxu2 }
 0x20f   : > { %2560 = vmatmul.msk.bf16.gmra.mxu1 %vm653_vm3, %v3888_v38  ;;  %v1903_v12 = vadd.f32 %v1827_v0, %v1769_v1 }
 0x210   : > { %v2230_v8 = vadd.f32 %v2229_v43, %v2198_v15  ;;  %v2271_v61 = vmul.f32 %v2198_v15, %v2198_v15  ;;  %v3892_v43 = vld [vmem:[#allocation34_spill] sm:$0xff]  ;;  %v3894_v15 = vld [vmem:[#allocation36_spill] sm:$0xff] }
 0x212   : > { %v2302_v5 = vadd.f32 %v2301_v51, %v2271_v61  ;;  %v2123_v32 = vpop.f32.mrf.mxu0 }
 0x213   : > { %v1983_v2 = vpop.f32.mrf.mxu3  ;;  %2581 = vmatmul.msk.bf16.gmra.mxu2 %vm653_vm3, %v3889_v49 }
 0x214   : > { %v1698_v57 = vpop.f32.mrf.mxu1  ;;  %v2059_v13 = vadd.f32 %v1983_v2, %v1903_v12 }
 0x215   : > { %v1771_v28 = vadd.f32 %v1698_v57, %v3890_v55 }
 0x216   : > { %v2199_v53 = vadd.f32 %v2123_v32, %v2059_v13  ;;  %v1830_v39 = vpop.f32.mrf.mxu2  ;;  %v3896_v13 = vld [vmem:[#allocation4_spill] sm:$0xff] }
 0x217   : > { %v1904_v35 = vadd.f32 %v1830_v39, %v1770_v46 }
 0x218   : > { %v2231_v40 = vadd.f32 %v2230_v8, %v2199_v53  ;;  %v2272_v24 = vmul.f32 %v2199_v53, %v2199_v53  ;;  %2598 = vmatmul.msk.bf16.gmra.mxu3 %vm653_vm3, %v3891_v10  ;;  %v3895_v8 = vld [vmem:[#allocation37_spill] sm:$0xff]  ;;  %v3898_v10 = vld [vmem:[#allocation39_spill] sm:$0xff] }
 0x21a   : > { %v2303_v1 = vadd.f32 %v2302_v5, %v2272_v24  ;;  %v2126_v42 = vpop.f32.mrf.mxu0 }
 0x21b   : > { %v1986_v7 = vpop.f32.mrf.mxu3 }
 0x21c   : > { %v1701_v34 = vpop.f32.mrf.mxu1  ;;  %v2060_v47 = vadd.f32 %v1986_v7, %v1904_v35 }
 0x21d   : > { %v1772_v21 = vadd.f32 %v1701_v34, %v3892_v43  ;;  %2616 = vmatmul.msk.bf16.gmra.mxu0 %vm653_vm3, %v3893_v14 }
 0x21e   : > { %v2200_v51 = vadd.f32 %v2126_v42, %v2060_v47  ;;  %v1832_v37 = vpop.f32.mrf.mxu2 }
 0x21f   : > { %2561 = vmatmul.msk.bf16.gmra.mxu1 %vm653_vm3, %v3893_v14  ;;  %v1905_v48 = vadd.f32 %v1832_v37, %v1771_v28 }
 0x220   : > { %v2232_v11 = vadd.f32 %v2231_v40, %v2200_v51  ;;  %v2273_v50 = vmul.f32 %v2200_v51, %v2200_v51  ;;  %v3897_v40 = vld [vmem:[#allocation38_spill] sm:$0xff] }
 0x221   : > { %v3899_v51 = vld [vmem:[#allocation6_spill] sm:$0xff] }
 0x222   : > { %v2304_v18 = vadd.f32 %v2303_v1, %v2273_v50  ;;  %v2128_v46 = vpop.f32.mrf.mxu0 }
 0x223   : > { %v1988_v38 = vpop.f32.mrf.mxu3  ;;  %2582 = vmatmul.msk.bf16.gmra.mxu2 %vm653_vm3, %v3894_v15 }
 0x224   : > { %v1703_v0 = vpop.f32.mrf.mxu1  ;;  %v2061_v12 = vadd.f32 %v1988_v38, %v1905_v48 }
 0x225   : > { %v1773_v61 = vadd.f32 %v1703_v0, %v3895_v8 }
 0x226   : > { %v2201_v5 = vadd.f32 %v2128_v46, %v2061_v12  ;;  %v1835_v32 = vpop.f32.mrf.mxu2  ;;  %v3901_v12 = vld [vmem:[#allocation10_spill] sm:$0xff] }
 0x227   : > { %v1906_v2 = vadd.f32 %v1835_v32, %v1772_v21 }
 0x228   : > { %v2233_v49 = vadd.f32 %v2232_v11, %v2201_v5  ;;  %v2274_v57 = vmul.f32 %v2201_v5, %v2201_v5  ;;  %2599 = vmatmul.msk.bf16.gmra.mxu3 %vm653_vm3, %v3896_v13  ;;  %v3900_v11 = vld [vmem:[#allocation7_spill] sm:$0xff]  ;;  %v3903_v13 = vld [vmem:[#allocation41_spill] sm:$0xff] }
 0x22a   : > { %v2305_v55 = vadd.f32 %v2304_v18, %v2274_v57  ;;  %v2131_v28 = vpop.f32.mrf.mxu0 }
 0x22b   : > { %v1991_v53 = vpop.f32.mrf.mxu3 }
 0x22c   : > { %v1706_v39 = vpop.f32.mrf.mxu1  ;;  %v2062_v35 = vadd.f32 %v1991_v53, %v1906_v2 }
 0x22d   : > { %v1774_v24 = vadd.f32 %v1706_v39, %v3897_v40  ;;  %2617 = vmatmul.msk.bf16.gmra.mxu0 %vm653_vm3, %v3898_v10 }
 0x22e   : > { %v2202_v1 = vadd.f32 %v2131_v28, %v2062_v35  ;;  %v1837_v42 = vpop.f32.mrf.mxu2 }
 0x22f   : > { %2562 = vmatmul.msk.bf16.gmra.mxu1 %vm653_vm3, %v3898_v10  ;;  %v1907_v7 = vadd.f32 %v1837_v42, %v1773_v61 }
 0x230   : > { %v2234_v34 = vadd.f32 %v2233_v49, %v2202_v1  ;;  %v2275_v47 = vmul.f32 %v2202_v1, %v2202_v1  ;;  %v3902_v49 = vld [vmem:[#allocation40_spill] sm:$0xff] }
 0x232   : > { %v2306_v43 = vadd.f32 %v2305_v55, %v2275_v47  ;;  %v2133_v21 = vpop.f32.mrf.mxu0 }
 0x233   : > { %v1993_v14 = vpop.f32.mrf.mxu3  ;;  %2583 = vmatmul.msk.bf16.gmra.mxu2 %vm653_vm3, %v3899_v51 }
 0x234   : > { %v1708_v37 = vpop.f32.mrf.mxu1  ;;  %v2063_v48 = vadd.f32 %v1993_v14, %v1907_v7 }
 0x235   : > { %v1775_v50 = vadd.f32 %v1708_v37, %v3900_v11 }
 0x236   : > { %v2203_v18 = vadd.f32 %v2133_v21, %v2063_v48  ;;  %v1840_v46 = vpop.f32.mrf.mxu2  ;;  %v3904_v48 = vld [vmem:[#allocation42_spill] sm:$0xff] }
 0x237   : > { %v1908_v38 = vadd.f32 %v1840_v46, %v1774_v24  ;;  %v1661_v11 = vrot.slane %v3904_v48, 5 }
 0x238   : > { %v2235_v15 = vadd.f32 %v2234_v34, %v2203_v18  ;;  %v2276_v0 = vmul.f32 %v2203_v18, %v2203_v18  ;;  %2600 = vmatmul.msk.bf16.gmra.mxu3 %vm653_vm3, %v3901_v12  ;;  %v3694_v18 = vld [vmem:[%s2704_s18 + $0xd0] sm:$0xf] }
 0x23a   : > { %v2307_v8 = vadd.f32 %v2306_v43, %v2276_v0  ;;  %v2136_v61 = vpop.f32.mrf.mxu0 }
 0x23b   : > { %v1996_v5 = vpop.f32.mrf.mxu3 }
 0x23c   : > { %v1711_v32 = vpop.f32.mrf.mxu1  ;;  %v2064_v2 = vadd.f32 %v1996_v5, %v1908_v38 }
 0x23d   : > { %v1776_v57 = vadd.f32 %v1711_v32, %v3902_v49  ;;  %2618 = vmatmul.msk.bf16.gmra.mxu0 %vm653_vm3, %v3903_v13 }
 0x23e   : > { %v2204_v55 = vadd.f32 %v2136_v61, %v2064_v2  ;;  %v1842_v28 = vpop.f32.mrf.mxu2  ;;  %v1946_v61 = vshrl.u32 %v3694_v18, 16  ;;  %v1664_v2 = vrot.slane %v3478_v19, 5 }
 0x23f   : > { %2563 = vmatmul.msk.bf16.gmra.mxu1 %vm653_vm3, %v3903_v13  ;;  %v1909_v53 = vadd.f32 %v1842_v28, %v1775_v50  ;;  %v3691_v50 = vld [vmem:[%s2704_s18 + $0xcc] sm:$0xf] }
 0x240   : > { %v2236_v39 = vadd.f32 %v2235_v15, %v2204_v55  ;;  %v2277_v35 = vmul.f32 %v2204_v55, %v2204_v55  ;;  %v3905_v15 = vld [vmem:[#allocation5_spill] sm:$0xff]  ;;  %v1936_v12 = vshll.u32 %v3691_v50, 16 }
 0x241   : > { %v2548_v0 = vrot.slane %v3905_v15, 9 }
 0x242   : > { %v2308_v40 = vadd.f32 %v2307_v8, %v2277_v35  ;;  %v2138_v24 = vpop.f32.mrf.mxu0  ;;  %v1942_v8 = vshll.u32 %v3694_v18, 16  ;;  %v1948_v35 = vrot.slane %v1946_v61, 4 }
 0x243   : > { %v1998_v10 = vpop.f32.mrf.mxu3  ;;  %2584 = vmatmul.msk.bf16.gmra.mxu2 %vm653_vm3, %v3471_v52  ;;  %v1662_v55 = vsel %vm3055_vm7, %v2548_v0, %v1661_v11 }
 0x244   : > { %v1713_v1 = vpop.f32.mrf.mxu1  ;;  %v2065_v42 = vadd.f32 %v1998_v10, %v1909_v53  ;;  %v1938_v53 = vrot.slane %v1936_v12, 5 }
 0x245   : > { %v1777_v7 = vadd.f32 %v1713_v1, %v3475_v33  ;;  %v214_v1 = vld [vmem:[%s2704_s18 + $0xd4] sm:$0x1] }
 0x246   : > { %v2205_v34 = vadd.f32 %v2138_v24, %v2065_v42  ;;  %v1845_v47 = vpop.f32.mrf.mxu2 }
 0x247   : > { %v1910_v43 = vadd.f32 %v1845_v47, %v1776_v57 }
 0x248   : > { %v2237_v21 = vadd.f32 %v2236_v39, %v2205_v34  ;;  %v2278_v14 = vmul.f32 %v2205_v34, %v2205_v34  ;;  %2601 = vmatmul.msk.bf16.gmra.mxu3 %vm653_vm3, %v3063_v62  ;;  %v1933_v62 = vshrl.u32 %v3691_v50, 16  ;;  %v1944_v39 = vrot.slane %v1942_v8, 5 }
 0x24a   : > { %v2309_v51 = vadd.f32 %v2308_v40, %v2278_v14  ;;  %v2141_v37 = vpop.f32.mrf.mxu0  ;;  %v1935_v28 = vrot.slane %v1933_v62, 4  ;;  %v1952_v14 = vshll.u32 %v214_v1, 16 }
 0x24b   : > { %v2001_v52 = vpop.f32.mrf.mxu3 }
 0x24c   : > { %v1716_v46 = vpop.f32.mrf.mxu1  ;;  %v2066_v38 = vadd.f32 %v2001_v52, %v1910_v43  ;;  %v1939_v43 = vor.u32 %v1938_v53, %v1935_v28  ;;  %v1954_v15 = vrot.slane %v1952_v14, 5 }
 0x24d   : > { %v1778_v33 = vadd.f32 %v1716_v46, %v3492_v4  ;;  %2619 = vmatmul.msk.bf16.gmra.mxu0 %vm653_vm3, %v3494_v22  ;;  %v1663_v4 = vrot.slane %v1661_v11, 4 }
 0x24e   : > { %v2206_v5 = vadd.f32 %v2141_v37, %v2066_v38  ;;  %v1847_v32 = vpop.f32.mrf.mxu2  ;;  %v1940_v38 = vrot.slane %v1939_v43, 4 }
 0x24f   : > { %2564 = vmatmul.msk.bf16.gmra.mxu1 %vm653_vm3, %v3494_v22  ;;  %v1911_v49 = vadd.f32 %v1847_v32, %v1777_v7  ;;  %v1665_v10 = vsel %vm3055_vm7, %v1663_v4, %v1664_v2  ;;  %v1668_v7 = vunpack.c.l.b16 %v1662_v55  ;;  %v2604_v2 = vrot.slane %v3691_v50, 9 }
 0x250   : > { %v2238_v57 = vadd.f32 %v2237_v21, %v2206_v5  ;;  %v2279_v13 = vmul.f32 %v2206_v5, %v2206_v5  ;;  %v1669_v47 = vunpack.c.l.b16 %v1665_v10  ;;  %v1949_v21 = vor.u32 %v1948_v35, %v1944_v39 }
 0x252   : > { %v2310_v40 = vadd.f32 %v2309_v51, %v2279_v13  ;;  %v2143_v24 = vpop.f32.mrf.mxu0  ;;  %v1670_v46 = vpack.c.b16 %v1669_v47, %v1668_v7  ;;  %v2641_v13 = vld [vmem:[%s2704_s18 + $0xcc] sm:$0xff] }
 0x253   : > { %v2003_v22 = vpop.f32.mrf.mxu3  ;;  %2585 = vmatmul.msk.bf16.gmra.mxu2 %vm653_vm3, %v3503_v41  ;;  %v1950_v41 = vrot.slane %v1949_v21, 4 }
 0x254   : > { %v1718_v19 = vpop.f32.mrf.mxu1  ;;  %v2067_v42 = vadd.f32 %v2003_v22, %v1911_v49  ;;  %v2094_v49 = vrot.slane %v214_v1, 5 }
 0x255   : > { %v1779_v34 = vadd.f32 %v1718_v19, %v3506_v23  ;;  %v2091_v23 = vrot.slane %v3694_v18, 5 }
 0x256   : > { %v2207_v37 = vadd.f32 %v2143_v24, %v2067_v42  ;;  %v1850_v51 = vpop.f32.mrf.mxu2 }
 0x257   : > { %v1912_v48 = vadd.f32 %v1850_v51, %v1778_v33  ;;  %v1945_v33 = vsel %vm2736_vm4, %v1940_v38, %v1944_v39  ;;  %v2093_v18 = vrot.slane %v2091_v23, 4  ;;  %v2092_v25 = vsel %vm3055_vm7, %v2604_v2, %v2091_v23 }
 0x258   : > { %v2239_v11 = vadd.f32 %v2238_v57, %v2207_v37  ;;  %v2280_v52 = vmul.f32 %v2207_v37, %v2207_v37  ;;  %2602 = vmatmul.msk.bf16.gmra.mxu3 %vm653_vm3, %v3510_v6  ;;  %v1955_v6 = vsel %vm2736_vm4, %v1950_v41, %v1954_v15  ;;  %v1958_v28 = vunpack.c.l.b16 %v1945_v33 }
 0x259   : > { %v1959_v53 = vunpack.c.l.b16 %v1955_v6  ;;  %v2095_v39 = vsel %vm3055_vm7, %v2093_v18, %v2094_v49  ;;  %v2098_v19 = vunpack.c.l.b16 %v2092_v25 }
 0x25a   : > { %v2311_v0 = vadd.f32 %v2310_v40, %v2280_v52  ;;  %v2146_v62 = vpop.f32.mrf.mxu0  ;;  %v2099_v42 = vunpack.c.l.b16 %v2095_v39 }
 0x25b   : > { %v2006_v12 = vpop.f32.mrf.mxu3  ;;  %v1960_v1 = vpack.c.b16 %v1959_v53, %v1958_v28 }
 0x25c   : > { %v1721_v8 = vpop.f32.mrf.mxu1  ;;  %v2068_v61 = vadd.f32 %v2006_v12, %v1912_v48  ;;  %v2100_v14 = vpack.c.b16 %v2099_v42, %v2098_v19 }
 0x25d   : > { %v1780_v5 = vadd.f32 %v1721_v8, %v3517_v36  ;;  %2620 = vmatmul.msk.bf16.gmra.mxu0 %vm653_vm3, %v1670_v46 }
 0x25e   : > { %v2208_v32 = vadd.f32 %v2146_v62, %v2068_v61  ;;  %v1852_v4 = vpop.f32.mrf.mxu2 }
 0x25f   : > { %2565 = vmatmul.msk.bf16.gmra.mxu1 %vm653_vm3, %v1670_v46  ;;  %v1913_v57 = vadd.f32 %v1852_v4, %v1779_v34 }
 0x260   : > { %v2240_v55 = vadd.f32 %v2239_v11, %v2208_v32  ;;  %v2281_v36 = vmul.f32 %v2208_v32, %v2208_v32 }
 0x262   : > { %v2312_v35 = vadd.f32 %v2311_v0, %v2281_v36  ;;  %v2148_v40 = vpop.f32.mrf.mxu0 }
 0x263   : > { %v2008_v24 = vpop.f32.mrf.mxu3  ;;  %2586 = vmatmul.msk.bf16.gmra.mxu2 %vm653_vm3, %v2641_v13 }
 0x264   : > { %v1723_v50 = vpop.f32.mrf.mxu1  ;;  %v2069_v10 = vadd.f32 %v2008_v24, %v1913_v57 }
 0x265   : > { %v1781_v22 = vadd.f32 %v1723_v50, %v3522_v20 }
 0x266   : > { %v2209_v7 = vadd.f32 %v2148_v40, %v2069_v10  ;;  %v1855_v34 = vpop.f32.mrf.mxu2 }
 0x267   : > { %v1914_v47 = vadd.f32 %v1855_v34, %v1780_v5 }
 0x268   : > { %v2241_v43 = vadd.f32 %v2240_v55, %v2209_v7  ;;  %v2282_v21 = vmul.f32 %v2209_v7, %v2209_v7  ;;  %2603 = vmatmul.msk.bf16.gmra.mxu3 %vm653_vm3, %v1960_v1 }
 0x26a   : > { %v2313_v16 = vadd.f32 %v2312_v35, %v2282_v21  ;;  %v2151_v37 = vpop.f32.mrf.mxu0 }
 0x26b   : > { %v2011_v51 = vpop.f32.mrf.mxu3 }
 0x26c   : > { %v1726_v48 = vpop.f32.mrf.mxu1  ;;  %v2070_v11 = vadd.f32 %v2011_v51, %v1914_v47 }
 0x26d   : > { %v1782_v52 = vadd.f32 %v1726_v48, %v3531_v3  ;;  %2621 = vmatmul.msk.bf16.gmra.mxu0 %vm653_vm3, %v2100_v14 }
 0x26e   : > { %v2210_v20 = vadd.f32 %v2151_v37, %v2070_v11  ;;  %v1857_v46 = vpop.f32.mrf.mxu2 }
 0x26f   : > { %v1915_v38 = vadd.f32 %v1857_v46, %v1781_v22 }
 0x270   : > { %v2242_v41 = vadd.f32 %v2241_v43, %v2210_v20  ;;  %v2283_v15 = vmul.f32 %v2210_v20, %v2210_v20 }
 0x272   : > { %v2314_v0 = vadd.f32 %v2313_v16, %v2283_v15  ;;  %v2153_v62 = vpop.f32.mrf.mxu0 }
 0x273   : > { %v2013_v23 = vpop.f32.mrf.mxu3 }
 0x274   : > { %v1728_v12 = vpop.f32.mrf.mxu1  ;;  %v2071_v8 = vadd.f32 %v2013_v23, %v1915_v38 }
 0x275   : > { %v1783_v61 = vadd.f32 %v1728_v12, %v3536_v9 }
 0x276   : > { %v2211_v5 = vadd.f32 %v2153_v62, %v2071_v8  ;;  %v1860_v33 = vpop.f32.mrf.mxu2 }
 0x277   : > { %v1916_v6 = vadd.f32 %v1860_v33, %v1782_v52 }
 0x278   : > { %v2243_v32 = vadd.f32 %v2242_v41, %v2211_v5  ;;  %v2284_v4 = vmul.f32 %v2211_v5, %v2211_v5 }
 0x27a   : > { %v2315_v3 = vadd.f32 %v2314_v0, %v2284_v4  ;;  %v2156_v2 = vpop.f32.mrf.mxu0 }
 0x27b   : > { %v2016_v18 = vpop.f32.mrf.mxu3 }
 0x27c   : > { %v1731_v49 = vpop.f32.mrf.mxu1  ;;  %v2072_v57 = vadd.f32 %v2016_v18, %v1916_v6 }
 0x27d   : > { %v1784_v13 = vadd.f32 %v1731_v49, %v3545_v54 }
 0x27e   : > { %v2212_v55 = vadd.f32 %v2156_v2, %v2072_v57  ;;  %v1862_v36 = vpop.f32.mrf.mxu2 }
 0x27f   : > { %v1917_v28 = vadd.f32 %v1862_v36, %v1783_v61 }
 0x280   : > { %v2244_v53 = vadd.f32 %v2243_v32, %v2212_v55  ;;  %v2285_v35 = vmul.f32 %v2212_v55, %v2212_v55 }
 0x282   : > { %v2316_v40 = vadd.f32 %v2315_v3, %v2285_v35  ;;  %v2158_v25 = vpop.f32.mrf.mxu0 }
 0x283   : > { %v2018_v9 = vpop.f32.mrf.mxu3 }
 0x284   : > { %v1733_v39 = vpop.f32.mrf.mxu1  ;;  %v2073_v24 = vadd.f32 %v2018_v9, %v1917_v28 }
 0x285   : > { %v1785_v50 = vadd.f32 %v1733_v39, %v3550_v27 }
 0x286   : > { %v2213_v10 = vadd.f32 %v2158_v25, %v2073_v24  ;;  %v1865_v1 = vpop.f32.mrf.mxu2 }
 0x287   : > { %v1918_v22 = vadd.f32 %v1865_v1, %v1784_v13 }
 0x288   : > { %v2245_v19 = vadd.f32 %v2244_v53, %v2213_v10  ;;  %v2286_v42 = vmul.f32 %v2213_v10, %v2213_v10 }
 0x28a   : > { %v2317_v7 = vadd.f32 %v2316_v40, %v2286_v42  ;;  %v2161_v34 = vpop.f32.mrf.mxu0 }
 0x28b   : > { %v2021_v54 = vpop.f32.mrf.mxu3 }
 0x28c   : > { %v1736_v47 = vpop.f32.mrf.mxu1  ;;  %v2074_v43 = vadd.f32 %v2021_v54, %v1918_v22 }
 0x28d   : > { %v1786_v21 = vadd.f32 %v1736_v47, %v3559_v60 }
 0x28e   : > { %v2214_v14 = vadd.f32 %v2161_v34, %v2074_v43  ;;  %v1867_v16 = vpop.f32.mrf.mxu2 }
 0x28f   : > { %v1919_v37 = vadd.f32 %v1867_v16, %v1785_v50 }
 0x290   : > { %v2246_v51 = vadd.f32 %v2245_v19, %v2214_v14  ;;  %v2287_v48 = vmul.f32 %v2214_v14, %v2214_v14 }
 0x292   : > { %v2318_v11 = vadd.f32 %v2317_v7, %v2287_v48  ;;  %v2163_v52 = vpop.f32.mrf.mxu0 }
 0x293   : > { %v2023_v27 = vpop.f32.mrf.mxu3 }
 0x294   : > { %v1738_v20 = vpop.f32.mrf.mxu1  ;;  %v2075_v46 = vadd.f32 %v2023_v27, %v1919_v37 }
 0x295   : > { %v1787_v33 = vadd.f32 %v1738_v20, %v3564_v45 }
 0x296   : > { %v2215_v38 = vadd.f32 %v2163_v52, %v2075_v46  ;;  %v1870_v41 = vpop.f32.mrf.mxu2 }
 0x297   : > { %v1920_v15 = vadd.f32 %v1870_v41, %v1786_v21 }
 0x298   : > { %v2247_v0 = vadd.f32 %v2246_v51, %v2215_v38  ;;  %v2288_v62 = vmul.f32 %v2215_v38, %v2215_v38 }
 0x29a   : > { %v2319_v23 = vadd.f32 %v2318_v11, %v2288_v62  ;;  %v2166_v12 = vpop.f32.mrf.mxu0 }
 0x29b   : > { %v2026_v8 = vpop.f32.mrf.mxu3 }
 0x29c   : > { %v1741_v61 = vpop.f32.mrf.mxu1  ;;  %v2076_v60 = vadd.f32 %v2026_v8, %v1920_v15 }
 0x29d   : > { %v1788_v36 = vadd.f32 %v1741_v61, %v3573_v63 }
 0x29e   : > { %v2216_v5 = vadd.f32 %v2166_v12, %v2076_v60  ;;  %v1872_v6 = vpop.f32.mrf.mxu2 }
 0x29f   : > { %v1921_v3 = vadd.f32 %v1872_v6, %v1787_v33 }
 0x2a0   : > { %v2248_v32 = vadd.f32 %v2247_v0, %v2216_v5  ;;  %v2289_v4 = vmul.f32 %v2216_v5, %v2216_v5 }
 0x2a2   : > { %v2320_v2 = vadd.f32 %v2319_v23, %v2289_v4  ;;  %v2168_v18 = vpop.f32.mrf.mxu0 }
 0x2a3   : > { %v2028_v49 = vpop.f32.mrf.mxu3 }
 0x2a4   : > { %v1743_v57 = vpop.f32.mrf.mxu1  ;;  %v2077_v13 = vadd.f32 %v2028_v49, %v1921_v3 }
 0x2a5   : > { %v1789_v10 = vadd.f32 %v1743_v57, %v3578_v44 }
 0x2a6   : > { %v2217_v55 = vadd.f32 %v2168_v18, %v2077_v13  ;;  %v1875_v28 = vpop.f32.mrf.mxu2 }
 0x2a7   : > { %v1922_v40 = vadd.f32 %v1875_v28, %v1788_v36 }
 0x2a8   : > { %v2249_v53 = vadd.f32 %v2248_v32, %v2217_v55  ;;  %v2290_v35 = vmul.f32 %v2217_v55, %v2217_v55 }
 0x2aa   : > { %v2321_v25 = vadd.f32 %v2320_v2, %v2290_v35  ;;  %v2171_v9 = vpop.f32.mrf.mxu0 }
 0x2ab   : > { %v2031_v39 = vpop.f32.mrf.mxu3 }
 0x2ac   : > { %v1746_v45 = vpop.f32.mrf.mxu1  ;;  %v2078_v24 = vadd.f32 %v2031_v39, %v1922_v40 }
 0x2ad   : > { %v1790_v21 = vadd.f32 %v1746_v45, %v3587_v59 }
 0x2ae   : > { %v2218_v50 = vadd.f32 %v2171_v9, %v2078_v24  ;;  %v1877_v1 = vpop.f32.mrf.mxu2 }
 0x2af   : > { %v1923_v42 = vadd.f32 %v1877_v1, %v1789_v10 }
 0x2b0   : > { %v2250_v22 = vadd.f32 %v2249_v53, %v2218_v50  ;;  %v2291_v19 = vmul.f32 %v2218_v50, %v2218_v50 }
 0x2b2   : > { %v2322_v7 = vadd.f32 %v2321_v25, %v2291_v19  ;;  %v2173_v34 = vpop.f32.mrf.mxu0 }
 0x2b3   : > { %v2033_v54 = vpop.f32.mrf.mxu3 }
 0x2b4   : > { %v1748_v63 = vpop.f32.mrf.mxu1  ;;  %v2079_v47 = vadd.f32 %v2033_v54, %v1923_v42 }
 0x2b5   : > { %v1791_v46 = vadd.f32 %v1748_v63, %v3592_v26 }
 0x2b6   : > { %v2219_v43 = vadd.f32 %v2173_v34, %v2079_v47  ;;  %v1880_v14 = vpop.f32.mrf.mxu2 }
 0x2b7   : > { %v1924_v51 = vadd.f32 %v1880_v14, %v1790_v21 }
 0x2b8   : > { %v2251_v16 = vadd.f32 %v2250_v22, %v2219_v43  ;;  %v2292_v37 = vmul.f32 %v2219_v43, %v2219_v43 }
 0x2ba   : > { %v2323_v48 = vadd.f32 %v2322_v7, %v2292_v37  ;;  %v2176_v11 = vpop.f32.mrf.mxu0 }
 0x2bb   : > { %v2036_v52 = vpop.f32.mrf.mxu3 }
 0x2bc   : > { %v1751_v44 = vpop.f32.mrf.mxu1  ;;  %v2080_v27 = vadd.f32 %v2036_v52, %v1924_v51 }
 0x2bd   : > { %v1792_v60 = vadd.f32 %v1751_v44, %v3601_v29 }
 0x2be   : > { %v2220_v20 = vadd.f32 %v2176_v11, %v2080_v27  ;;  %v1882_v38 = vpop.f32.mrf.mxu2 }
 0x2bf   : > { %v1925_v0 = vadd.f32 %v1882_v38, %v1791_v46 }
 0x2c0   : > { %v2252_v41 = vadd.f32 %v2251_v16, %v2220_v20  ;;  %v2293_v15 = vmul.f32 %v2220_v20, %v2220_v20 }
 0x2c2   : > { %v2324_v62 = vadd.f32 %v2323_v48, %v2293_v15  ;;  %v2178_v23 = vpop.f32.mrf.mxu0 }
 0x2c3   : > { %v2038_v12 = vpop.f32.mrf.mxu3 }
 0x2c4   : > { %v1753_v59 = vpop.f32.mrf.mxu1  ;;  %v2081_v8 = vadd.f32 %v2038_v12, %v1925_v0 }
 0x2c5   : > { %v1793_v57 = vadd.f32 %v1753_v59, %v3606_v31 }
 0x2c6   : > { %v2221_v61 = vadd.f32 %v2178_v23, %v2081_v8  ;;  %v1885_v5 = vpop.f32.mrf.mxu2 }
 0x2c7   : > { %v1926_v32 = vadd.f32 %v1885_v5, %v1792_v60 }
 0x2c8   : > { %v2253_v33 = vadd.f32 %v2252_v41, %v2221_v61  ;;  %v2294_v6 = vmul.f32 %v2221_v61, %v2221_v61 }
 0x2ca   : > { %v2325_v4 = vadd.f32 %v2324_v62, %v2294_v6  ;;  %v2181_v3 = vpop.f32.mrf.mxu0 }
 0x2cb   : > { %v2041_v2 = vpop.f32.mrf.mxu3 }
 0x2cc   : > { %v2082_v26 = vadd.f32 %v2041_v2, %v1926_v32  ;;  %v1756_v18 = vpop.f32.mrf.mxu1 }
 0x2cd   : > { %v1794_v9 = vadd.f32 %v1756_v18, %v3615_v56 }
 0x2ce   : > { %v2222_v49 = vadd.f32 %v2181_v3, %v2082_v26  ;;  %v1887_v13 = vpop.f32.mrf.mxu2 }
 0x2cf   : > { %v1927_v28 = vadd.f32 %v1887_v13, %v1793_v57  ;;  %v2228_v13 = vld [vmem:[%s3768_s2] sm:$0x1] }
 0x2d0   : > { %v2254_v55 = vadd.f32 %v2253_v33, %v2222_v49  ;;  %v2295_v36 = vmul.f32 %v2222_v49, %v2222_v49 }
 0x2d2   : > { %v2326_v53 = vadd.f32 %v2325_v4, %v2295_v36  ;;  %v2183_v35 = vpop.f32.mrf.mxu0 }
 0x2d3   : > { %v2043_v40 = vpop.f32.mrf.mxu3 }
 0x2d4   : > { %v2083_v29 = vadd.f32 %v2043_v40, %v1927_v28  ;;  %v1758_v45 = vpop.f32.mrf.mxu1  ;;  %v2268_v28 = vld [vmem:[%s3769_s3] sm:$0x1] }
 0x2d5   : > { %v1795_v7 = vadd.f32 %v1758_v45, %v3620_v30 }
 0x2d6   : > { %v2223_v25 = vadd.f32 %v2183_v35, %v2083_v29  ;;  %v1890_v39 = vpop.f32.mrf.mxu2 }
 0x2d7   : > { %v1928_v10 = vadd.f32 %v1890_v39, %v1794_v9 }
 0x2d8   : > { %v2255_v24 = vadd.f32 %v2254_v55, %v2223_v25  ;;  %v2296_v50 = vmul.f32 %v2223_v25, %v2223_v25 }
 0x2da   : > { %v2327_v1 = vadd.f32 %v2326_v53, %v2296_v50  ;;  %v2186_v22 = vpop.f32.mrf.mxu0 }
 0x2db   : > { %v2046_v19 = vpop.f32.mrf.mxu3 }
 0x2dc   : > { %v2084_v31 = vadd.f32 %v2046_v19, %v1928_v10  ;;  %v1761_v43 = vpop.f32.mrf.mxu1 }
 0x2dd   : > { %v1796_v51 = vadd.f32 %v1761_v43, %v3630_v58 }
 0x2de   : > { %v2224_v42 = vadd.f32 %v2186_v22, %v2084_v31  ;;  %v1892_v34 = vpop.f32.mrf.mxu2 }
 0x2df   : > { %v1929_v47 = vadd.f32 %v1892_v34, %v1795_v7 }
 0x2e0   : > { %v2256_v54 = vadd.f32 %v2255_v24, %v2224_v42  ;;  %v2297_v63 = vmul.f32 %v2224_v42, %v2224_v42 }
 0x2e2   : > { %v2328_v21 = vadd.f32 %v2327_v1, %v2297_v63  ;;  %v2188_v14 = vpop.f32.mrf.mxu0 }
 0x2e3   : > { %v2048_v56 = vpop.f32.mrf.mxu3 }
 0x2e4   : > { %v2085_v16 = vadd.f32 %v2048_v56, %v1929_v47  ;;  %v1763_v20 = vpop.f32.mrf.mxu1 }
 0x2e5   : > { %v1797_v15 = vadd.f32 %v1763_v20, %v3635_v17 }
 0x2e6   : > { %v2225_v37 = vadd.f32 %v2188_v14, %v2085_v16  ;;  %v1895_v48 = vpop.f32.mrf.mxu2 }
 0x2e7   : > { %v1930_v44 = vadd.f32 %v1895_v48, %v1796_v51 }
 0x2e8   : > { %v2257_v11 = vadd.f32 %v2256_v54, %v2225_v37  ;;  %v2298_v52 = vmul.f32 %v2225_v37, %v2225_v37 }
 0x2ea   : > { %v2329_v27 = vadd.f32 %v2328_v21, %v2298_v52  ;;  %v2191_v46 = vpop.f32.mrf.mxu0 }
 0x2eb   : > { %v2051_v30 = vpop.f32.mrf.mxu3 }
 0x2ec   : > { %v2086_v38 = vadd.f32 %v2051_v30, %v1930_v44 }
 0x2ee   : > { %v2226_v41 = vadd.f32 %v2191_v46, %v2086_v38  ;;  %v1897_v0 = vpop.f32.mrf.mxu2 }
 0x2ef   : > { %v1931_v12 = vadd.f32 %v1897_v0, %v1797_v15 }
 0x2f0   : > { %v2258_v62 = vadd.f32 %v2257_v11, %v2226_v41  ;;  %v2299_v23 = vmul.f32 %v2226_v41, %v2226_v41 }
 0x2f2   : > { %v2330_v59 = vadd.f32 %v2329_v27, %v2299_v23  ;;  %v2193_v58 = vpop.f32.mrf.mxu0 }
 0x2f3   : > { %v2053_v8 = vpop.f32.mrf.mxu3 }
 0x2f4   : > { %v2087_v61 = vadd.f32 %v2053_v8, %v1931_v12 }
 0x2f6   : > { %v2227_v60 = vadd.f32 %v2193_v58, %v2087_v61 }
 0x2f8   : > { %v2259_v5 = vadd.f32 %v2258_v62, %v2227_v60  ;;  %v2300_v33 = vmul.f32 %v2227_v60, %v2227_v60 }
 0x2fa   : > { %v2260_v6 = vrot.slane %v2259_v5, 4  ;;  %v2331_v32 = vadd.f32 %v2330_v59, %v2300_v33 }
 0x2fc   : > { %v2261_v4 = vadd.f32 %v2260_v6, %v2259_v5  ;;  %v2332_v3 = vrot.slane %v2331_v32, 4 }
 0x2fe   : > { %v2262_v2 = vrot.slane %v2261_v4, 2  ;;  %v2333_v26 = vadd.f32 %v2332_v3, %v2331_v32 }
 0x300   : > { %v2263_v18 = vadd.f32 %v2262_v2, %v2261_v4  ;;  %v2334_v49 = vrot.slane %v2333_v26, 2 }
 0x302   : > { %v2264_v17 = vrot.slane %v2263_v18, 1  ;;  %v2335_v57 = vadd.f32 %v2334_v49, %v2333_v26 }
 0x304   : > { %v2265_v55 = vadd.f32 %v2264_v17, %v2263_v18  ;;  %v2336_v36 = vrot.slane %v2335_v57, 1 }
 0x306   : > { %v2266_v53 = vadd.f32 %v2265_v55, %v2228_v13  ;;  %v2337_v35 = vadd.f32 %v2336_v36, %v2335_v57 }
 0x308   : > { %2267 = vst [vmem:[%s3768_s2] sm:$0x1] %v2266_v53  ;;  %v2338_v40 = vadd.f32 %v2337_v35, %v2268_v28 }
 0x30a   : > { %2339 = vst [vmem:[%s3769_s3] sm:$0x1] %v2338_v40 }
 0x30b PF: > { %s14_s12 = sadd.s32 1, %s2670_s12  }
 0x30c   : > { %p11_p5 = scmp.ge.s32.totalorder %s14_s12, 4  }
 0x30e   :  { %13 = sbr.rel (!%p11_p5) target bundleno = 1 (0x1), region = 74 }

</bundles_post_ra>
